<compile_context>
chip_gen: v6e
topology: v6e:2x2x1
jax: 0.10.0
libtpu: 0.0.40
codegen_flags: <defaults>
</compile_context>

<pallas_src>
import functools

import jax
import jax.numpy as jnp
from jax import lax
from jax.experimental import pallas as pl
from jax.experimental.pallas import tpu as pltpu

EPS = 1e-5
LANE = 128
VMEM_LIMIT = 48 * 1024 * 1024   # < v7x 64 MiB physical, > default scoped on all gens


def _round_up(x, m):
    return ((x + m - 1) // m) * m


# ---------------------------------------------------------------------------
# Pass 1: fused im2col + conv matmul (MXU) + per-tile partial BN statistics.
# ---------------------------------------------------------------------------
def conv_stats_kernel(img_ref, w_ref, y_ref, stats_ref, *,
                      K, stride, TH, Wo, Ho, Ho_p, Cp):
    """img_ref: (1, Hp2, Wp, Cin) bf16 -- whole zero-padded NHWC image of batch n
       w_ref:   (K, K, Cin, Cp)   bf16
       y_ref:   (1, TH, Wo, Cp)   bf16 -- pre-BN conv output tile
       stats:   (1, 1, 2, Cp)     f32  -- [sum, sum-of-squares] over valid rows."""
    ho_t = pl.program_id(1)
    h0 = ho_t * (TH * stride)            # first padded-input row used by this tile

    acc = jnp.zeros((TH * Wo, Cp), jnp.float32)
    for kh in range(K):
        for kw in range(K):
            if stride == 1:
                slab = img_ref[0, pl.ds(h0 + kh, TH), pl.ds(kw, Wo), :]
            else:
                # TODO(synk): stride > 1 uses strided in-VMEM window reads; only
                # the stride == 1 path is exercised by this script.
                slab = img_ref[0, pl.ds(h0 + kh, TH, stride),
                               pl.ds(kw, Wo, stride), :]
            lhs = slab.reshape(TH * Wo, slab.shape[-1])      # (TH*Wo, Cin) bf16
            acc = acc + jnp.dot(lhs, w_ref[kh, kw],
                                preferred_element_type=jnp.float32)

    y3 = acc.reshape(TH, Wo, Cp)
    # bf16 intermediate activation (halves inter-pass HBM traffic).
    y_ref[0] = y3.astype(y_ref.dtype)

    # BN partial statistics from the f32 accumulator (not the bf16 store).
    if Ho_p != Ho:   # mask fake (row-padded) output rows out of the statistics
        th_idx = lax.broadcasted_iota(jnp.int32, (TH, Wo, 1), 0)
        y3 = jnp.where(ho_t * TH + th_idx < Ho, y3, 0.0)
    ys = y3.reshape(TH * Wo, Cp)
    s = jnp.sum(ys, axis=0, keepdims=True)         # (1, Cp)
    sq = jnp.sum(ys * ys, axis=0, keepdims=True)   # (1, Cp)
    stats_ref[0, 0] = jnp.concatenate([s, sq], axis=0)   # (2, Cp), no zero rows


# ---------------------------------------------------------------------------
# Pass 2: y * scale + shift, ReLU  (per-channel scale/shift precomputed once).
# ---------------------------------------------------------------------------
def bn_relu_kernel(y_ref, scale_ref, shift_ref, o_ref):
    y = y_ref[...].astype(jnp.float32)             # bf16 -> f32 (v5e-safe VPU math)
    o_ref[...] = jnp.maximum(y * scale_ref[...] + shift_ref[...], 0.0)


def conv_block_forward(x_nchw, weight_oikk, gamma, beta, *, stride=1, padding=0,
                       tile_rows=512, tile_rows_bn=1024):
    """x_nchw: (N, Cin, H, W); weight_oikk: (Cout, Cin, K, K); gamma/beta: (Cout,)."""
    N, Cin, H, W = x_nchw.shape
    Cout, Cin_w, K, K2 = weight_oikk.shape
    assert Cin_w == Cin and K == K2
    # TODO(synk): groups > 1 (depthwise) path not implemented.
    Ho = (H + 2 * padding - K) // stride + 1
    Wo = (W + 2 * padding - K) // stride + 1
    Cp = _round_up(Cout, LANE)

    # Output-row tiling: ~tile_rows MXU rows per step.
    TH = max(1, min(Ho, tile_rows // max(Wo, 1)))
    Ho_p = _round_up(Ho, TH)
    n_ho_tiles = Ho_p // TH
    Wp = W + 2 * padding
    Hp2 = max((Ho_p - 1) * stride + K, H + 2 * padding)   # rows the kernel may read
    M2 = N * Ho_p * Wo

    # NHWC zero-padded image in bf16; the K*K-inflated im2col matrix is never
    # materialized in HBM -- patches are built in-kernel from this image.
    # TODO(synk): for very small Cin the lane padding of the VMEM image block is
    # wasteful; a channels-in-sublane layout would reduce VMEM for the first layer.
    x_nhwc = jnp.transpose(x_nchw, (0, 2, 3, 1)).astype(jnp.bfloat16)
    xp = jnp.pad(x_nhwc, ((0, 0),
                          (padding, Hp2 - H - padding),
                          (padding, padding),
                          (0, 0)))
    # Weights: (Cout, Cin, K, K) -> (K, K, Cin, Cp), bf16.
    w4 = jnp.transpose(weight_oikk, (2, 3, 1, 0))
    w4 = jnp.pad(w4, ((0, 0), (0, 0), (0, 0), (0, Cp - Cout))).astype(jnp.bfloat16)

    kernel1 = functools.partial(conv_stats_kernel, K=K, stride=stride, TH=TH,
                                Wo=Wo, Ho=Ho, Ho_p=Ho_p, Cp=Cp)
    cparams1 = pltpu.CompilerParams(
        dimension_semantics=("parallel", "parallel"),
        vmem_limit_bytes=VMEM_LIMIT)
    cost1 = pl.CostEstimate(
        flops=2 * N * Ho_p * Wo * K * K * Cin * Cp,
        transcendentals=0,
        bytes_accessed=(N * Hp2 * Wp * Cin * 2 + K * K * Cin * Cp * 2
                        + M2 * Cp * 2 + N * n_ho_tiles * 2 * Cp * 4))

    y, stats = pl.pallas_call(
        kernel1,
        out_shape=(
            jax.ShapeDtypeStruct((N, Ho_p, Wo, Cp), jnp.bfloat16),
            jax.ShapeDtypeStruct((N, n_ho_tiles, 2, Cp), jnp.float32),
        ),
        grid=(N, n_ho_tiles),
        in_specs=[
            # Whole image per n: block index constant over the ho-tile axis, so
            # it is (re-)DMA'd only when n changes.
            pl.BlockSpec((1, Hp2, Wp, Cin), lambda n, t: (n, 0, 0, 0)),
            pl.BlockSpec((K, K, Cin, Cp), lambda n, t: (0, 0, 0, 0)),
        ],
        out_specs=(
            pl.BlockSpec((1, TH, Wo, Cp), lambda n, t: (n, t, 0, 0)),
            pl.BlockSpec((1, 1, 2, Cp), lambda n, t: (n, t, 0, 0)),
        ),
        compiler_params=cparams1,
        cost_estimate=cost1,
    )(xp, w4)

    # --- tiny per-channel BN finalize in plain JAX (f32) ---
    Mtrue = N * Ho * Wo
    sums = jnp.sum(stats[:, :, 0, :], axis=(0, 1))     # (Cp,)
    sumsq = jnp.sum(stats[:, :, 1, :], axis=(0, 1))    # (Cp,)
    mean = sums / Mtrue
    var = jnp.maximum(sumsq / Mtrue - mean * mean, 0.0)  # biased (training) variance
    # TODO(synk): sum/sum-sq can cancel for very large activations; switch to a
    # true two-pass / Welford variance if that regime matters.
    inv = lax.rsqrt(var + EPS)
    gamma_p = jnp.pad(gamma.astype(jnp.float32), (0, Cp - Cout))
    beta_p = jnp.pad(beta.astype(jnp.float32), (0, Cp - Cout))
    scale = (gamma_p * inv).reshape(1, Cp)
    shift = (beta_p - mean * gamma_p * inv).reshape(1, Cp)

    # --- pass 2: fused scale/shift + ReLU over lane-dense (M2, Cp) tiles ---
    y2 = y.reshape(M2, Cp)                     # collapses leading dims only (free)
    TM2 = min(tile_rows_bn, _round_up(M2, 8))
    cparams2 = pltpu.CompilerParams(
        dimension_semantics=("parallel",), vmem_limit_bytes=VMEM_LIMIT)
    cost2 = pl.CostEstimate(flops=2 * M2 * Cp, transcendentals=0,
                            bytes_accessed=M2 * Cp * (2 + 4) + 2 * Cp * 4)
    # NOTE: input_output_aliases skipped here because the bf16 intermediate and
    # the f32 output differ in dtype; alias when chaining blocks in bf16.
    out_flat = pl.pallas_call(
        bn_relu_kernel,
        out_shape=jax.ShapeDtypeStruct((M2, Cp), jnp.float32),
        grid=(pl.cdiv(M2, TM2),),
        in_specs=[
            pl.BlockSpec((TM2, Cp), lambda i: (i, 0)),
            pl.BlockSpec((1, Cp), lambda i: (0, 0)),
            pl.BlockSpec((1, Cp), lambda i: (0, 0)),
        ],
        out_specs=pl.BlockSpec((TM2, Cp), lambda i: (i, 0)),
        compiler_params=cparams2,
        cost_estimate=cost2,
    )(y2, scale, shift)

    # TODO(synk): when ConvBlocks are chained keep this NHWC (and bf16) and drop
    # the transpose; NCHW f32 is produced here to match the PyTorch module contract.
    out = out_flat.reshape(N, Ho_p, Wo, Cp)[:, :Ho, :, :Cout]
    return jnp.transpose(out, (0, 3, 1, 2))


def reference_forward(x_nchw, weight_oikk, gamma, beta, *, stride=1, padding=0):
    y = lax.conv_general_dilated(
        x_nchw.astype(jnp.float32),
        weight_oikk.astype(jnp.float32),
        window_strides=(stride, stride),
        padding=[(padding, padding), (padding, padding)],
        dimension_numbers=("NCHW", "OIHW", "NCHW"),
    )
    mean = jnp.mean(y, axis=(0, 2, 3), keepdims=True)
    var = jnp.mean((y - mean) ** 2, axis=(0, 2, 3), keepdims=True)
    y = (y - mean) * lax.rsqrt(var + EPS)
    y = y * gamma.reshape(1, -1, 1, 1) + beta.reshape(1, -1, 1, 1)
    return jnp.maximum(y, 0.0)


if __name__ == "__main__":
    # ConvBlock(in_channels=4, out_channels=8, kernel_size=3, stride=1, padding=1)
    N, Cin, H, W = 2, 4, 16, 16
    Cout, K, stride, padding = 8, 3, 1, 1

    key = jax.random.PRNGKey(0)
    kx, kw = jax.random.split(key)
    x = jax.random.normal(kx, (N, Cin, H, W), dtype=jnp.float32)
    weight = jax.random.normal(kw, (Cout, Cin, K, K), dtype=jnp.float32) * 0.1
    gamma = jnp.ones((Cout,), jnp.float32)   # BatchNorm2d default affine init
    beta = jnp.zeros((Cout,), jnp.float32)

    fwd = jax.jit(functools.partial(conv_block_forward, stride=stride, padding=padding))
    out = fwd(x, weight, gamma, beta)
    jax.block_until_ready(out)

    ref = reference_forward(x, weight, gamma, beta, stride=stride, padding=padding)
    assert out.shape == (N, Cout, H, W)
    max_err = float(jnp.max(jnp.abs(out - ref)))
    # bf16 MXU inputs + bf16 intermediate vs f32 reference -> loosened tolerance.
    assert jnp.allclose(out, ref, atol=3e-2, rtol=3e-2), max_err

    print("KERNEL_OK")
</pallas_src>

<mosaic_0001>
module attributes {stable_mosaic.version = 11 : i64} {
  func.func @bn_relu_kernel(%arg0: i32, %arg1: memref<512x128xbf16, #tpu.memory_space<vmem>>, %arg2: memref<1x128xf32, #tpu.memory_space<vmem>>, %arg3: memref<1x128xf32, #tpu.memory_space<vmem>>, %arg4: memref<512x128xf32, #tpu.memory_space<vmem>>) attributes {dimension_semantics = [#tpu.dimension_semantics<parallel>], iteration_bounds = array<i64: 1>, scalar_prefetch = 0 : i64, scratch_operands = 0 : i64, tpu.core_type = #tpu.core_type<tc>, window_params = [{transform_indices = @transform_0, window_bounds = array<i64: 512, 128>}, {pipeline_mode = #tpu.pipeline_mode<synchronous>, transform_indices = @transform_1, window_bounds = array<i64: 1, 128>}, {pipeline_mode = #tpu.pipeline_mode<synchronous>, transform_indices = @transform_2, window_bounds = array<i64: 1, 128>}, {transform_indices = @transform_3, window_bounds = array<i64: 512, 128>}]} {
    %c0 = arith.constant 0 : index
    %c0_0 = arith.constant 0 : index
    %0 = vector.load %arg1[%c0, %c0_0] : memref<512x128xbf16, #tpu.memory_space<vmem>>, vector<512x128xbf16>
    %1 = arith.extf %0 : vector<512x128xbf16> to vector<512x128xf32>
    %c0_1 = arith.constant 0 : index
    %c0_2 = arith.constant 0 : index
    %2 = vector.load %arg2[%c0_1, %c0_2] : memref<1x128xf32, #tpu.memory_space<vmem>>, vector<1x128xf32>
    %3 = vector.broadcast %2 : vector<1x128xf32> to vector<512x128xf32>
    %4 = arith.mulf %1, %3 : vector<512x128xf32>
    %c0_3 = arith.constant 0 : index
    %c0_4 = arith.constant 0 : index
    %5 = vector.load %arg3[%c0_3, %c0_4] : memref<1x128xf32, #tpu.memory_space<vmem>>, vector<1x128xf32>
    %6 = vector.broadcast %5 : vector<1x128xf32> to vector<512x128xf32>
    %7 = arith.addf %4, %6 : vector<512x128xf32>
    %cst = arith.constant 0.000000e+00 : f32
    %8 = vector.broadcast %cst : f32 to vector<512x128xf32>
    %9 = arith.maximumf %7, %8 : vector<512x128xf32>
    %c0_5 = arith.constant 0 : index
    %c0_6 = arith.constant 0 : index
    %10 = vector.load %arg4[%c0_5, %c0_6] : memref<512x128xf32, #tpu.memory_space<vmem>>, vector<512x128xf32>
    tpu.vector_store %arg4[%c0_5, %c0_6], %9 {strides = array<i32>} : memref<512x128xf32, #tpu.memory_space<vmem>>, vector<512x128xf32>,
    return
  }
  func.func @transform_0(%arg0: i32) -> (i32, i32) {
    %c0_i32 = arith.constant 0 : i32
    %c0_i32_0 = arith.constant 0 : i32
    return %arg0, %c0_i32 : i32, i32
  }
  func.func @transform_1(%arg0: i32) -> (i32, i32) {
    %c0_i32 = arith.constant 0 : i32
    %c0_i32_0 = arith.constant 0 : i32
    %c0_i32_1 = arith.constant 0 : i32
    return %c0_i32, %c0_i32_0 : i32, i32
  }
  func.func @transform_2(%arg0: i32) -> (i32, i32) {
    %c0_i32 = arith.constant 0 : i32
    %c0_i32_0 = arith.constant 0 : i32
    %c0_i32_1 = arith.constant 0 : i32
    return %c0_i32, %c0_i32_0 : i32, i32
  }
  func.func @transform_3(%arg0: i32) -> (i32, i32) {
    %c0_i32 = arith.constant 0 : i32
    %c0_i32_0 = arith.constant 0 : i32
    return %arg0, %c0_i32 : i32, i32
  }
}

module attributes {stable_mosaic.version = 11 : i64} {
  func.func @conv_stats_kernel(%arg0: i32, %arg1: i32, %arg2: memref<1x18x18x4xbf16, #tpu.memory_space<vmem>>, %arg3: memref<3x3x4x128xbf16, #tpu.memory_space<vmem>>, %arg4: memref<1x16x16x128xbf16, #tpu.memory_space<vmem>>, %arg5: memref<1x1x2x128xf32, #tpu.memory_space<vmem>>) attributes {dimension_semantics = [#tpu.dimension_semantics<parallel>, #tpu.dimension_semantics<parallel>], iteration_bounds = array<i64: 2, 1>, scalar_prefetch = 0 : i64, scratch_operands = 0 : i64, tpu.core_type = #tpu.core_type<tc>, window_params = [{transform_indices = @transform_0, window_bounds = array<i64: 1, 18, 18, 4>}, {pipeline_mode = #tpu.pipeline_mode<synchronous>, transform_indices = @transform_1, window_bounds = array<i64: 3, 3, 4, 128>}, {transform_indices = @transform_2, window_bounds = array<i64: 1, 16, 16, 128>}, {transform_indices = @transform_3, window_bounds = array<i64: 1, 1, 2, 128>}]} {
    %c16_i32 = arith.constant 16 : i32
    %0 = arith.muli %arg1, %c16_i32 : i32
    %cst = arith.constant 0.000000e+00 : f32
    %1 = vector.broadcast %cst : f32 to vector<256x128xf32>
    %c0_i32 = arith.constant 0 : i32
    %2 = arith.addi %0, %c0_i32 : i32
    %c0 = arith.constant 0 : index
    %3 = arith.index_cast %2 : i32 to index
    %c0_0 = arith.constant 0 : index
    %c0_1 = arith.constant 0 : index
    %4 = vector.load %arg2[%c0, %3, %c0_0, %c0_1] : memref<1x18x18x4xbf16, #tpu.memory_space<vmem>>, vector<1x16x16x4xbf16>
    %5 = vector.shape_cast %4 : vector<1x16x16x4xbf16> to vector<16x16x4xbf16>
    %6 = vector.shape_cast %5 : vector<16x16x4xbf16> to vector<256x4xbf16>
    %c0_2 = arith.constant 0 : index
    %c0_3 = arith.constant 0 : index
    %c0_4 = arith.constant 0 : index
    %c0_5 = arith.constant 0 : index
    %7 = vector.load %arg3[%c0_2, %c0_3, %c0_4, %c0_5] : memref<3x3x4x128xbf16, #tpu.memory_space<vmem>>, vector<1x1x4x128xbf16>
    %8 = vector.shape_cast %7 : vector<1x1x4x128xbf16> to vector<4x128xbf16>
    %cst_6 = arith.constant dense<0.000000e+00> : vector<256x128xf32>
    %9 = tpu.matmul %6, %8, %cst_6 {dimension_numbers = #tpu.dot_dimension_numbers<[1], [0], [0], [1], [0, 0, 1, 1], [], []>} : vector<256x4xbf16>, vector<4x128xbf16>, vector<256x128xf32> -> vector<256x128xf32>
    %10 = arith.addf %1, %9 : vector<256x128xf32>
    %c0_i32_7 = arith.constant 0 : i32
    %11 = arith.addi %0, %c0_i32_7 : i32
    %c0_8 = arith.constant 0 : index
    %12 = arith.index_cast %11 : i32 to index
    %c1 = arith.constant 1 : index
    %c0_9 = arith.constant 0 : index
    %13 = vector.load %arg2[%c0_8, %12, %c1, %c0_9] : memref<1x18x18x4xbf16, #tpu.memory_space<vmem>>, vector<1x16x16x4xbf16>
    %14 = vector.shape_cast %13 : vector<1x16x16x4xbf16> to vector<16x16x4xbf16>
    %15 = vector.shape_cast %14 : vector<16x16x4xbf16> to vector<256x4xbf16>
    %c0_10 = arith.constant 0 : index
    %c1_11 = arith.constant 1 : index
    %c0_12 = arith.constant 0 : index
    %c0_13 = arith.constant 0 : index
    %16 = vector.load %arg3[%c0_10, %c1_11, %c0_12, %c0_13] : memref<3x3x4x128xbf16, #tpu.memory_space<vmem>>, vector<1x1x4x128xbf16>
    %17 = vector.shape_cast %16 : vector<1x1x4x128xbf16> to vector<4x128xbf16>
    %cst_14 = arith.constant dense<0.000000e+00> : vector<256x128xf32>
    %18 = tpu.matmul %15, %17, %cst_14 {dimension_numbers = #tpu.dot_dimension_numbers<[1], [0], [0], [1], [0, 0, 1, 1], [], []>} : vector<256x4xbf16>, vector<4x128xbf16>, vector<256x128xf32> -> vector<256x128xf32>
    %19 = arith.addf %10, %18 : vector<256x128xf32>
    %c0_i32_15 = arith.constant 0 : i32
    %20 = arith.addi %0, %c0_i32_15 : i32
    %c0_16 = arith.constant 0 : index
    %21 = arith.index_cast %20 : i32 to index
    %c2 = arith.constant 2 : index
    %c0_17 = arith.constant 0 : index
    %22 = vector.load %arg2[%c0_16, %21, %c2, %c0_17] : memref<1x18x18x4xbf16, #tpu.memory_space<vmem>>, vector<1x16x16x4xbf16>
    %23 = vector.shape_cast %22 : vector<1x16x16x4xbf16> to vector<16x16x4xbf16>
    %24 = vector.shape_cast %23 : vector<16x16x4xbf16> to vector<256x4xbf16>
    %c0_18 = arith.constant 0 : index
    %c2_19 = arith.constant 2 : index
    %c0_20 = arith.constant 0 : index
    %c0_21 = arith.constant 0 : index
    %25 = vector.load %arg3[%c0_18, %c2_19, %c0_20, %c0_21] : memref<3x3x4x128xbf16, #tpu.memory_space<vmem>>, vector<1x1x4x128xbf16>
    %26 = vector.shape_cast %25 : vector<1x1x4x128xbf16> to vector<4x128xbf16>
    %cst_22 = arith.constant dense<0.000000e+00> : vector<256x128xf32>
    %27 = tpu.matmul %24, %26, %cst_22 {dimension_numbers = #tpu.dot_dimension_numbers<[1], [0], [0], [1], [0, 0, 1, 1], [], []>} : vector<256x4xbf16>, vector<4x128xbf16>, vector<256x128xf32> -> vector<256x128xf32>
    %28 = arith.addf %19, %27 : vector<256x128xf32>
    %c1_i32 = arith.constant 1 : i32
    %29 = arith.addi %0, %c1_i32 : i32
    %c0_23 = arith.constant 0 : index
    %30 = arith.index_cast %29 : i32 to index
    %c0_24 = arith.constant 0 : index
    %c0_25 = arith.constant 0 : index
    %31 = vector.load %arg2[%c0_23, %30, %c0_24, %c0_25] : memref<1x18x18x4xbf16, #tpu.memory_space<vmem>>, vector<1x16x16x4xbf16>
    %32 = vector.shape_cast %31 : vector<1x16x16x4xbf16> to vector<16x16x4xbf16>
    %33 = vector.shape_cast %32 : vector<16x16x4xbf16> to vector<256x4xbf16>
    %c1_26 = arith.constant 1 : index
    %c0_27 = arith.constant 0 : index
    %c0_28 = arith.constant 0 : index
    %c0_29 = arith.constant 0 : index
    %34 = vector.load %arg3[%c1_26, %c0_27, %c0_28, %c0_29] : memref<3x3x4x128xbf16, #tpu.memory_space<vmem>>, vector<1x1x4x128xbf16>
    %35 = vector.shape_cast %34 : vector<1x1x4x128xbf16> to vector<4x128xbf16>
    %cst_30 = arith.constant dense<0.000000e+00> : vector<256x128xf32>
    %36 = tpu.matmul %33, %35, %cst_30 {dimension_numbers = #tpu.dot_dimension_numbers<[1], [0], [0], [1], [0, 0, 1, 1], [], []>} : vector<256x4xbf16>, vector<4x128xbf16>, vector<256x128xf32> -> vector<256x128xf32>
    %37 = arith.addf %28, %36 : vector<256x128xf32>
    %c1_i32_31 = arith.constant 1 : i32
    %38 = arith.addi %0, %c1_i32_31 : i32
    %c0_32 = arith.constant 0 : index
    %39 = arith.index_cast %38 : i32 to index
    %c1_33 = arith.constant 1 : index
    %c0_34 = arith.constant 0 : index
    %40 = vector.load %arg2[%c0_32, %39, %c1_33, %c0_34] : memref<1x18x18x4xbf16, #tpu.memory_space<vmem>>, vector<1x16x16x4xbf16>
    %41 = vector.shape_cast %40 : vector<1x16x16x4xbf16> to vector<16x16x4xbf16>
    %42 = vector.shape_cast %41 : vector<16x16x4xbf16> to vector<256x4xbf16>
    %c1_35 = arith.constant 1 : index
    %c1_36 = arith.constant 1 : index
    %c0_37 = arith.constant 0 : index
    %c0_38 = arith.constant 0 : index
    %43 = vector.load %arg3[%c1_35, %c1_36, %c0_37, %c0_38] : memref<3x3x4x128xbf16, #tpu.memory_space<vmem>>, vector<1x1x4x128xbf16>
    %44 = vector.shape_cast %43 : vector<1x1x4x128xbf16> to vector<4x128xbf16>
    %cst_39 = arith.constant dense<0.000000e+00> : vector<256x128xf32>
    %45 = tpu.matmul %42, %44, %cst_39 {dimension_numbers = #tpu.dot_dimension_numbers<[1], [0], [0], [1], [0, 0, 1, 1], [], []>} : vector<256x4xbf16>, vector<4x128xbf16>, vector<256x128xf32> -> vector<256x128xf32>
    %46 = arith.addf %37, %45 : vector<256x128xf32>
    %c1_i32_40 = arith.constant 1 : i32
    %47 = arith.addi %0, %c1_i32_40 : i32
    %c0_41 = arith.constant 0 : index
    %48 = arith.index_cast %47 : i32 to index
    %c2_42 = arith.constant 2 : index
    %c0_43 = arith.constant 0 : index
    %49 = vector.load %arg2[%c0_41, %48, %c2_42, %c0_43] : memref<1x18x18x4xbf16, #tpu.memory_space<vmem>>, vector<1x16x16x4xbf16>
    %50 = vector.shape_cast %49 : vector<1x16x16x4xbf16> to vector<16x16x4xbf16>
    %51 = vector.shape_cast %50 : vector<16x16x4xbf16> to vector<256x4xbf16>
    %c1_44 = arith.constant 1 : index
    %c2_45 = arith.constant 2 : index
    %c0_46 = arith.constant 0 : index
    %c0_47 = arith.constant 0 : index
    %52 = vector.load %arg3[%c1_44, %c2_45, %c0_46, %c0_47] : memref<3x3x4x128xbf16, #tpu.memory_space<vmem>>, vector<1x1x4x128xbf16>
    %53 = vector.shape_cast %52 : vector<1x1x4x128xbf16> to vector<4x128xbf16>
    %cst_48 = arith.constant dense<0.000000e+00> : vector<256x128xf32>
    %54 = tpu.matmul %51, %53, %cst_48 {dimension_numbers = #tpu.dot_dimension_numbers<[1], [0], [0], [1], [0, 0, 1, 1], [], []>} : vector<256x4xbf16>, vector<4x128xbf16>, vector<256x128xf32> -> vector<256x128xf32>
    %55 = arith.addf %46, %54 : vector<256x128xf32>
    %c2_i32 = arith.constant 2 : i32
    %56 = arith.addi %0, %c2_i32 : i32
    %c0_49 = arith.constant 0 : index
    %57 = arith.index_cast %56 : i32 to index
    %c0_50 = arith.constant 0 : index
    %c0_51 = arith.constant 0 : index
    %58 = vector.load %arg2[%c0_49, %57, %c0_50, %c0_51] : memref<1x18x18x4xbf16, #tpu.memory_space<vmem>>, vector<1x16x16x4xbf16>
    %59 = vector.shape_cast %58 : vector<1x16x16x4xbf16> to vector<16x16x4xbf16>
    %60 = vector.shape_cast %59 : vector<16x16x4xbf16> to vector<256x4xbf16>
    %c2_52 = arith.constant 2 : index
    %c0_53 = arith.constant 0 : index
    %c0_54 = arith.constant 0 : index
    %c0_55 = arith.constant 0 : index
    %61 = vector.load %arg3[%c2_52, %c0_53, %c0_54, %c0_55] : memref<3x3x4x128xbf16, #tpu.memory_space<vmem>>, vector<1x1x4x128xbf16>
    %62 = vector.shape_cast %61 : vector<1x1x4x128xbf16> to vector<4x128xbf16>
    %cst_56 = arith.constant dense<0.000000e+00> : vector<256x128xf32>
    %63 = tpu.matmul %60, %62, %cst_56 {dimension_numbers = #tpu.dot_dimension_numbers<[1], [0], [0], [1], [0, 0, 1, 1], [], []>} : vector<256x4xbf16>, vector<4x128xbf16>, vector<256x128xf32> -> vector<256x128xf32>
    %64 = arith.addf %55, %63 : vector<256x128xf32>
    %c2_i32_57 = arith.constant 2 : i32
    %65 = arith.addi %0, %c2_i32_57 : i32
    %c0_58 = arith.constant 0 : index
    %66 = arith.index_cast %65 : i32 to index
    %c1_59 = arith.constant 1 : index
    %c0_60 = arith.constant 0 : index
    %67 = vector.load %arg2[%c0_58, %66, %c1_59, %c0_60] : memref<1x18x18x4xbf16, #tpu.memory_space<vmem>>, vector<1x16x16x4xbf16>
    %68 = vector.shape_cast %67 : vector<1x16x16x4xbf16> to vector<16x16x4xbf16>
    %69 = vector.shape_cast %68 : vector<16x16x4xbf16> to vector<256x4xbf16>
    %c2_61 = arith.constant 2 : index
    %c1_62 = arith.constant 1 : index
    %c0_63 = arith.constant 0 : index
    %c0_64 = arith.constant 0 : index
    %70 = vector.load %arg3[%c2_61, %c1_62, %c0_63, %c0_64] : memref<3x3x4x128xbf16, #tpu.memory_space<vmem>>, vector<1x1x4x128xbf16>
    %71 = vector.shape_cast %70 : vector<1x1x4x128xbf16> to vector<4x128xbf16>
    %cst_65 = arith.constant dense<0.000000e+00> : vector<256x128xf32>
    %72 = tpu.matmul %69, %71, %cst_65 {dimension_numbers = #tpu.dot_dimension_numbers<[1], [0], [0], [1], [0, 0, 1, 1], [], []>} : vector<256x4xbf16>, vector<4x128xbf16>, vector<256x128xf32> -> vector<256x128xf32>
    %73 = arith.addf %64, %72 : vector<256x128xf32>
    %c2_i32_66 = arith.constant 2 : i32
    %74 = arith.addi %0, %c2_i32_66 : i32
    %c0_67 = arith.constant 0 : index
    %75 = arith.index_cast %74 : i32 to index
    %c2_68 = arith.constant 2 : index
    %c0_69 = arith.constant 0 : index
    %76 = vector.load %arg2[%c0_67, %75, %c2_68, %c0_69] : memref<1x18x18x4xbf16, #tpu.memory_space<vmem>>, vector<1x16x16x4xbf16>
    %77 = vector.shape_cast %76 : vector<1x16x16x4xbf16> to vector<16x16x4xbf16>
    %78 = vector.shape_cast %77 : vector<16x16x4xbf16> to vector<256x4xbf16>
    %c2_70 = arith.constant 2 : index
    %c2_71 = arith.constant 2 : index
    %c0_72 = arith.constant 0 : index
    %c0_73 = arith.constant 0 : index
    %79 = vector.load %arg3[%c2_70, %c2_71, %c0_72, %c0_73] : memref<3x3x4x128xbf16, #tpu.memory_space<vmem>>, vector<1x1x4x128xbf16>
    %80 = vector.shape_cast %79 : vector<1x1x4x128xbf16> to vector<4x128xbf16>
    %cst_74 = arith.constant dense<0.000000e+00> : vector<256x128xf32>
    %81 = tpu.matmul %78, %80, %cst_74 {dimension_numbers = #tpu.dot_dimension_numbers<[1], [0], [0], [1], [0, 0, 1, 1], [], []>} : vector<256x4xbf16>, vector<4x128xbf16>, vector<256x128xf32> -> vector<256x128xf32>
    %82 = arith.addf %73, %81 : vector<256x128xf32>
    %83 = vector.shape_cast %82 : vector<256x128xf32> to vector<16x16x128xf32>
    %84 = arith.truncf %83 : vector<16x16x128xf32> to vector<16x16x128xbf16>
    %c0_75 = arith.constant 0 : index
    %c0_76 = arith.constant 0 : index
    %c0_77 = arith.constant 0 : index
    %c0_78 = arith.constant 0 : index
    %85 = vector.load %arg4[%c0_75, %c0_76, %c0_77, %c0_78] : memref<1x16x16x128xbf16, #tpu.memory_space<vmem>>, vector<1x16x16x128xbf16>
    %86 = vector.shape_cast %85 : vector<1x16x16x128xbf16> to vector<16x16x128xbf16>
    %87 = vector.shape_cast %84 : vector<16x16x128xbf16> to vector<1x16x16x128xbf16>
    tpu.vector_store %arg4[%c0_75, %c0_76, %c0_77, %c0_78], %87 {strides = array<i32>} : memref<1x16x16x128xbf16, #tpu.memory_space<vmem>>, vector<1x16x16x128xbf16>,
    %88 = vector.shape_cast %83 : vector<16x16x128xf32> to vector<256x128xf32>
    %cst_79 = arith.constant dense<0.000000e+00> : vector<128xf32>
    %89 = vector.multi_reduction <add>, %88, %cst_79 [0] : vector<256x128xf32> to vector<128xf32>
    %90 = vector.shape_cast %89 : vector<128xf32> to vector<1x128xf32>
    %91 = arith.mulf %88, %88 : vector<256x128xf32>
    %cst_80 = arith.constant dense<0.000000e+00> : vector<128xf32>
    %92 = vector.multi_reduction <add>, %91, %cst_80 [0] : vector<256x128xf32> to vector<128xf32>
    %93 = vector.shape_cast %92 : vector<128xf32> to vector<1x128xf32>
    %94 = tpu.concatenate %90, %93 in 0 : vector<1x128xf32>, vector<1x128xf32> -> vector<2x128xf32>
    %c0_81 = arith.constant 0 : index
    %c0_82 = arith.constant 0 : index
    %c0_83 = arith.constant 0 : index
    %c0_84 = arith.constant 0 : index
    %95 = vector.load %arg5[%c0_81, %c0_82, %c0_83, %c0_84] : memref<1x1x2x128xf32, #tpu.memory_space<vmem>>, vector<1x1x2x128xf32>
    %96 = vector.shape_cast %95 : vector<1x1x2x128xf32> to vector<2x128xf32>
    %97 = vector.shape_cast %94 : vector<2x128xf32> to vector<1x1x2x128xf32>
    tpu.vector_store %arg5[%c0_81, %c0_82, %c0_83, %c0_84], %97 {strides = array<i32>} : memref<1x1x2x128xf32, #tpu.memory_space<vmem>>, vector<1x1x2x128xf32>,
    return
  }
  func.func @transform_0(%arg0: i32, %arg1: i32) -> (i32, i32, i32, i32) {
    %c0_i32 = arith.constant 0 : i32
    %c0_i32_0 = arith.constant 0 : i32
    %c0_i32_1 = arith.constant 0 : i32
    %c0_i32_2 = arith.constant 0 : i32
    return %arg0, %c0_i32, %c0_i32_0, %c0_i32_1 : i32, i32, i32, i32
  }
  func.func @transform_1(%arg0: i32, %arg1: i32) -> (i32, i32, i32, i32) {
    %c0_i32 = arith.constant 0 : i32
    %c0_i32_0 = arith.constant 0 : i32
    %c0_i32_1 = arith.constant 0 : i32
    %c0_i32_2 = arith.constant 0 : i32
    %c0_i32_3 = arith.constant 0 : i32
    return %c0_i32, %c0_i32_0, %c0_i32_1, %c0_i32_2 : i32, i32, i32, i32
  }
  func.func @transform_2(%arg0: i32, %arg1: i32) -> (i32, i32, i32, i32) {
    %c0_i32 = arith.constant 0 : i32
    %c0_i32_0 = arith.constant 0 : i32
    %c0_i32_1 = arith.constant 0 : i32
    return %arg0, %arg1, %c0_i32, %c0_i32_0 : i32, i32, i32, i32
  }
  func.func @transform_3(%arg0: i32, %arg1: i32) -> (i32, i32, i32, i32) {
    %c0_i32 = arith.constant 0 : i32
    %c0_i32_0 = arith.constant 0 : i32
    %c0_i32_1 = arith.constant 0 : i32
    return %arg0, %arg1, %c0_i32, %c0_i32_0 : i32, i32, i32, i32
  }
}

</mosaic_0001>

<bundles_post_ra>
// kernel: conv_block_forward.3
= control target key start
LH: loop header
LB: loop body
LE: loop exit
PB: predicated region body
PF: predicated region fallthrough
CT: control target
= control target key end

     0   :  { %s1023_s0 = inlined_call_operand.vmem [shape: bf16[512,128], index: 0, kind: input, shape index: {}]   ;;  %s1024_s1 = inlined_call_operand.vmem [shape: f32[1,128], index: 1, kind: input, shape index: {}]   ;;  %s1025_s2 = inlined_call_operand.vmem [shape: f32[1,128], index: 2, kind: input, shape index: {}]   ;;  %s1026_s3 = inlined_call_operand.vmem [shape: f32[512,128], index: 3, kind: output, shape index: {}]  }
   0x1   :  { %v419_v0 = vld [vmem:[%s1023_s0] sm:$0xff]   ;;  %v546_v4 = vld [vmem:[%s1023_s0 + $0x8] sm:$0xff]   ;;  %v547_v5 = vld [vmem:[%s1023_s0 + $0x10] sm:$0xff]  }
   0x2   :  { %v603_v1 = vld [vmem:[%s1024_s1] ss:$0 sm:$0xff]  ;;  %v420_v2 = vunpack.c.l.bf16 %v419_v0  ;;  %v421_v3 = vunpack.c.h.bf16 %v419_v0  ;;  %v548_v6 = vld [vmem:[%s1023_s0 + $0x18] sm:$0xff]   ;;  %v424_v8 = vunpack.c.l.bf16 %v546_v4  ;;  %v425_v9 = vunpack.c.h.bf16 %v546_v4  ;;  %v550_v33 = vld [vmem:[%s1023_s0 + $0x28] sm:$0xff]  }
   0x3   :  { %v617_v7 = vld [vmem:[%s1025_s2] ss:$0 sm:$0xff]  ;;  %v428_v10 = vunpack.c.l.bf16 %v547_v5  ;;  %v429_v11 = vunpack.c.h.bf16 %v547_v5  ;;  %v432_v14 = vunpack.c.l.bf16 %v548_v6  ;;  %v433_v15 = vunpack.c.h.bf16 %v548_v6  ;;  %v551_v34 = vld [vmem:[%s1023_s0 + $0x30] sm:$0xff]   ;;  %v552_v39 = vld [vmem:[%s1023_s0 + $0x38] sm:$0xff]  }
   0x4   :  { %v149_v12 = vmul.f32 %v420_v2, %v603_v1  ;;  %v150_v13 = vmul.f32 %v421_v3, %v603_v1  ;;  %v151_v16 = vmul.f32 %v424_v8, %v603_v1  ;;  %v152_v17 = vmul.f32 %v425_v9, %v603_v1  ;;  %v549_v28 = vld [vmem:[%s1023_s0 + $0x20] sm:$0xff]   ;;  %v554_v6 = vld [vmem:[%s1023_s0 + $0x48] sm:$0xff]   ;;  %v555_v8 = vld [vmem:[%s1023_s0 + $0x50] sm:$0xff]  }
   0x5   :  { %v153_v18 = vmul.f32 %v428_v10, %v603_v1  ;;  %v154_v19 = vmul.f32 %v429_v11, %v603_v1  ;;  %v155_v22 = vmul.f32 %v432_v14, %v603_v1  ;;  %v156_v23 = vmul.f32 %v433_v15, %v603_v1  ;;  %v553_v0 = vld [vmem:[%s1023_s0 + $0x40] sm:$0xff]  }
   0x6   :  { %v220_v20 = vadd.f32 %v617_v7, %v149_v12  ;;  %v221_v21 = vadd.f32 %v617_v7, %v150_v13  ;;  %v222_v24 = vadd.f32 %v617_v7, %v151_v16  ;;  %v223_v25 = vadd.f32 %v617_v7, %v152_v17  ;;  %v556_v13 = vld [vmem:[%s1023_s0 + $0x58] sm:$0xff]  }
   0x7   :  { %v224_v26 = vadd.f32 %v617_v7, %v153_v18  ;;  %v225_v27 = vadd.f32 %v617_v7, %v154_v19  ;;  %v226_v31 = vadd.f32 %v617_v7, %v155_v22  ;;  %v227_v32 = vadd.f32 %v617_v7, %v156_v23 }
   0x8   :  { %v284_v29 = vmax.f32 %v220_v20, 0.0  ;;  %v285_v30 = vmax.f32 %v221_v21, 0.0  ;;  %v286_v35 = vmax.f32 %v222_v24, 0.0  ;;  %v287_v36 = vmax.f32 %v223_v25, 0.0 }
   0x9   :  { %v288_v37 = vmax.f32 %v224_v26, 0.0  ;;  %v289_v38 = vmax.f32 %v225_v27, 0.0  ;;  %v290_v40 = vmax.f32 %v226_v31, 0.0  ;;  %v291_v41 = vmax.f32 %v227_v32, 0.0 }
   0xa   :  { %348 = vst [vmem:[%s1026_s3] sm:$0xff] %v284_v29  ;;  %349 = vst [vmem:[%s1026_s3 + $0x8] sm:$0xff] %v285_v30  ;;  %v436_v42 = vunpack.c.l.bf16 %v549_v28  ;;  %v437_v43 = vunpack.c.h.bf16 %v549_v28  ;;  %v440_v44 = vunpack.c.l.bf16 %v550_v33  ;;  %v441_v45 = vunpack.c.h.bf16 %v550_v33 }
   0xb   :  { %350 = vst [vmem:[%s1026_s3 + $0x10] sm:$0xff] %v286_v35  ;;  %351 = vst [vmem:[%s1026_s3 + $0x18] sm:$0xff] %v287_v36  ;;  %v444_v46 = vunpack.c.l.bf16 %v551_v34  ;;  %v445_v47 = vunpack.c.h.bf16 %v551_v34  ;;  %v448_v50 = vunpack.c.l.bf16 %v552_v39  ;;  %v449_v51 = vunpack.c.h.bf16 %v552_v39 }
   0xc   :  { %352 = vst [vmem:[%s1026_s3 + $0x20] sm:$0xff] %v288_v37  ;;  %353 = vst [vmem:[%s1026_s3 + $0x28] sm:$0xff] %v289_v38  ;;  %v157_v48 = vmul.f32 %v436_v42, %v603_v1  ;;  %v158_v49 = vmul.f32 %v437_v43, %v603_v1  ;;  %v159_v52 = vmul.f32 %v440_v44, %v603_v1  ;;  %v452_v16 = vunpack.c.l.bf16 %v553_v0  ;;  %v557_v38 = vld [vmem:[%s1023_s0 + $0x60] sm:$0xff]   ;;  %v558_v43 = vld [vmem:[%s1023_s0 + $0x68] sm:$0xff]  }
   0xd   :  { %354 = vst [vmem:[%s1026_s3 + $0x30] sm:$0xff] %v290_v40  ;;  %355 = vst [vmem:[%s1026_s3 + $0x38] sm:$0xff] %v291_v41  ;;  %v160_v53 = vmul.f32 %v441_v45, %v603_v1  ;;  %v161_v54 = vmul.f32 %v444_v46, %v603_v1  ;;  %v162_v55 = vmul.f32 %v445_v47, %v603_v1  ;;  %v453_v17 = vunpack.c.h.bf16 %v553_v0  ;;  %v559_v44 = vld [vmem:[%s1023_s0 + $0x70] sm:$0xff]  }
   0xe   :  { %v228_v56 = vadd.f32 %v617_v7, %v157_v48  ;;  %v229_v57 = vadd.f32 %v617_v7, %v158_v49  ;;  %v163_v58 = vmul.f32 %v448_v50, %v603_v1  ;;  %v164_v59 = vmul.f32 %v449_v51, %v603_v1  ;;  %v560_v49 = vld [vmem:[%s1023_s0 + $0x78] sm:$0xff]  }
   0xf   :  { %v230_v60 = vadd.f32 %v617_v7, %v159_v52  ;;  %v231_v61 = vadd.f32 %v617_v7, %v160_v53  ;;  %v232_v62 = vadd.f32 %v617_v7, %v161_v54  ;;  %v233_v63 = vadd.f32 %v617_v7, %v162_v55 }
  0x10   :  { %v292_v2 = vmax.f32 %v228_v56, 0.0  ;;  %v293_v3 = vmax.f32 %v229_v57, 0.0  ;;  %v234_v4 = vadd.f32 %v617_v7, %v163_v58  ;;  %v235_v5 = vadd.f32 %v617_v7, %v164_v59 }
  0x11   :  { %v294_v9 = vmax.f32 %v230_v60, 0.0  ;;  %v295_v10 = vmax.f32 %v231_v61, 0.0  ;;  %v296_v11 = vmax.f32 %v232_v62, 0.0  ;;  %v297_v12 = vmax.f32 %v233_v63, 0.0 }
  0x12   :  { %356 = vst [vmem:[%s1026_s3 + $0x40] sm:$0xff] %v292_v2  ;;  %357 = vst [vmem:[%s1026_s3 + $0x48] sm:$0xff] %v293_v3  ;;  %v298_v14 = vmax.f32 %v234_v4, 0.0  ;;  %v299_v15 = vmax.f32 %v235_v5, 0.0  ;;  %v456_v18 = vunpack.c.l.bf16 %v554_v6  ;;  %v457_v19 = vunpack.c.h.bf16 %v554_v6 }
  0x13   :  { %358 = vst [vmem:[%s1026_s3 + $0x50] sm:$0xff] %v294_v9  ;;  %359 = vst [vmem:[%s1026_s3 + $0x58] sm:$0xff] %v295_v10  ;;  %v460_v20 = vunpack.c.l.bf16 %v555_v8  ;;  %v461_v21 = vunpack.c.h.bf16 %v555_v8  ;;  %v165_v22 = vmul.f32 %v452_v16, %v603_v1  ;;  %v166_v23 = vmul.f32 %v453_v17, %v603_v1  ;;  %v562_v17 = vld [vmem:[%s1023_s0 + $0x88] sm:$0xff]  }
  0x14   :  { %360 = vst [vmem:[%s1026_s3 + $0x60] sm:$0xff] %v296_v11  ;;  %361 = vst [vmem:[%s1026_s3 + $0x68] sm:$0xff] %v297_v12  ;;  %v464_v24 = vunpack.c.l.bf16 %v556_v13  ;;  %v465_v25 = vunpack.c.h.bf16 %v556_v13  ;;  %v167_v26 = vmul.f32 %v456_v18, %v603_v1  ;;  %v168_v27 = vmul.f32 %v457_v19, %v603_v1  ;;  %v561_v12 = vld [vmem:[%s1023_s0 + $0x80] sm:$0xff]   ;;  %v563_v18 = vld [vmem:[%s1023_s0 + $0x90] sm:$0xff]  }
  0x15   :  { %362 = vst [vmem:[%s1026_s3 + $0x70] sm:$0xff] %v298_v14  ;;  %363 = vst [vmem:[%s1026_s3 + $0x78] sm:$0xff] %v299_v15  ;;  %v169_v28 = vmul.f32 %v460_v20, %v603_v1  ;;  %v170_v29 = vmul.f32 %v461_v21, %v603_v1  ;;  %v236_v30 = vadd.f32 %v617_v7, %v165_v22  ;;  %v468_v52 = vunpack.c.l.bf16 %v557_v38 }
  0x16   :  { %v237_v31 = vadd.f32 %v617_v7, %v166_v23  ;;  %v171_v32 = vmul.f32 %v464_v24, %v603_v1  ;;  %v172_v33 = vmul.f32 %v465_v25, %v603_v1  ;;  %v238_v34 = vadd.f32 %v617_v7, %v167_v26  ;;  %v564_v23 = vld [vmem:[%s1023_s0 + $0x98] sm:$0xff]  }
  0x17   :  { %v239_v35 = vadd.f32 %v617_v7, %v168_v27  ;;  %v240_v36 = vadd.f32 %v617_v7, %v169_v28  ;;  %v241_v37 = vadd.f32 %v617_v7, %v170_v29  ;;  %v300_v39 = vmax.f32 %v236_v30, 0.0 }
  0x18   :  { %v301_v40 = vmax.f32 %v237_v31, 0.0  ;;  %v242_v41 = vadd.f32 %v617_v7, %v171_v32  ;;  %v243_v42 = vadd.f32 %v617_v7, %v172_v33  ;;  %v302_v45 = vmax.f32 %v238_v34, 0.0 }
  0x19   :  { %v303_v46 = vmax.f32 %v239_v35, 0.0  ;;  %v304_v47 = vmax.f32 %v240_v36, 0.0  ;;  %v305_v48 = vmax.f32 %v241_v37, 0.0  ;;  %364 = vst [vmem:[%s1026_s3 + $0x80] sm:$0xff] %v300_v39  ;;  %v469_v53 = vunpack.c.h.bf16 %v557_v38 }
  0x1a   :  { %365 = vst [vmem:[%s1026_s3 + $0x88] sm:$0xff] %v301_v40  ;;  %v306_v50 = vmax.f32 %v242_v41, 0.0  ;;  %v307_v51 = vmax.f32 %v243_v42, 0.0  ;;  %366 = vst [vmem:[%s1026_s3 + $0x90] sm:$0xff] %v302_v45  ;;  %v472_v54 = vunpack.c.l.bf16 %v558_v43  ;;  %v473_v55 = vunpack.c.h.bf16 %v558_v43 }
  0x1b   :  { %367 = vst [vmem:[%s1026_s3 + $0x98] sm:$0xff] %v303_v46  ;;  %368 = vst [vmem:[%s1026_s3 + $0xa0] sm:$0xff] %v304_v47  ;;  %v476_v56 = vunpack.c.l.bf16 %v559_v44  ;;  %v477_v57 = vunpack.c.h.bf16 %v559_v44  ;;  %v173_v58 = vmul.f32 %v468_v52, %v603_v1  ;;  %v174_v59 = vmul.f32 %v469_v53, %v603_v1  ;;  %v566_v53 = vld [vmem:[%s1023_s0 + $0xa8] sm:$0xff]  }
  0x1c   :  { %369 = vst [vmem:[%s1026_s3 + $0xa8] sm:$0xff] %v305_v48  ;;  %370 = vst [vmem:[%s1026_s3 + $0xb0] sm:$0xff] %v306_v50  ;;  %v480_v60 = vunpack.c.l.bf16 %v560_v49  ;;  %v481_v61 = vunpack.c.h.bf16 %v560_v49  ;;  %v175_v62 = vmul.f32 %v472_v54, %v603_v1  ;;  %v176_v63 = vmul.f32 %v473_v55, %v603_v1  ;;  %v565_v48 = vld [vmem:[%s1023_s0 + $0xa0] sm:$0xff]   ;;  %v567_v54 = vld [vmem:[%s1023_s0 + $0xb0] sm:$0xff]  }
  0x1d   :  { %371 = vst [vmem:[%s1026_s3 + $0xb8] sm:$0xff] %v307_v51  ;;  %v177_v0 = vmul.f32 %v476_v56, %v603_v1  ;;  %v178_v2 = vmul.f32 %v477_v57, %v603_v1  ;;  %v244_v3 = vadd.f32 %v617_v7, %v173_v58  ;;  %v245_v4 = vadd.f32 %v617_v7, %v174_v59  ;;  %v568_v59 = vld [vmem:[%s1023_s0 + $0xb8] sm:$0xff]  }
  0x1e   :  { %v179_v5 = vmul.f32 %v480_v60, %v603_v1  ;;  %v180_v6 = vmul.f32 %v481_v61, %v603_v1  ;;  %v246_v8 = vadd.f32 %v617_v7, %v175_v62  ;;  %v247_v9 = vadd.f32 %v617_v7, %v176_v63 }
  0x1f   :  { %v248_v10 = vadd.f32 %v617_v7, %v177_v0  ;;  %v249_v11 = vadd.f32 %v617_v7, %v178_v2  ;;  %v308_v13 = vmax.f32 %v244_v3, 0.0  ;;  %v309_v14 = vmax.f32 %v245_v4, 0.0 }
  0x20   :  { %v250_v15 = vadd.f32 %v617_v7, %v179_v5  ;;  %v251_v16 = vadd.f32 %v617_v7, %v180_v6  ;;  %v310_v19 = vmax.f32 %v246_v8, 0.0  ;;  %v311_v20 = vmax.f32 %v247_v9, 0.0 }
  0x21   :  { %v312_v21 = vmax.f32 %v248_v10, 0.0  ;;  %v313_v22 = vmax.f32 %v249_v11, 0.0  ;;  %372 = vst [vmem:[%s1026_s3 + $0xc0] sm:$0xff] %v308_v13  ;;  %373 = vst [vmem:[%s1026_s3 + $0xc8] sm:$0xff] %v309_v14  ;;  %v484_v26 = vunpack.c.l.bf16 %v561_v12  ;;  %v485_v27 = vunpack.c.h.bf16 %v561_v12 }
  0x22   :  { %v314_v24 = vmax.f32 %v250_v15, 0.0  ;;  %v315_v25 = vmax.f32 %v251_v16, 0.0  ;;  %374 = vst [vmem:[%s1026_s3 + $0xd0] sm:$0xff] %v310_v19  ;;  %375 = vst [vmem:[%s1026_s3 + $0xd8] sm:$0xff] %v311_v20  ;;  %v488_v28 = vunpack.c.l.bf16 %v562_v17  ;;  %v489_v29 = vunpack.c.h.bf16 %v562_v17 }
  0x23   :  { %376 = vst [vmem:[%s1026_s3 + $0xe0] sm:$0xff] %v312_v21  ;;  %377 = vst [vmem:[%s1026_s3 + $0xe8] sm:$0xff] %v313_v22  ;;  %v492_v30 = vunpack.c.l.bf16 %v563_v18  ;;  %v493_v31 = vunpack.c.h.bf16 %v563_v18  ;;  %v181_v32 = vmul.f32 %v484_v26, %v603_v1  ;;  %v182_v33 = vmul.f32 %v485_v27, %v603_v1  ;;  %v569_v22 = vld [vmem:[%s1023_s0 + $0xc0] sm:$0xff]   ;;  %v570_v27 = vld [vmem:[%s1023_s0 + $0xc8] sm:$0xff]  }
  0x24   :  { %378 = vst [vmem:[%s1026_s3 + $0xf0] sm:$0xff] %v314_v24  ;;  %379 = vst [vmem:[%s1026_s3 + $0xf8] sm:$0xff] %v315_v25  ;;  %v496_v34 = vunpack.c.l.bf16 %v564_v23  ;;  %v497_v35 = vunpack.c.h.bf16 %v564_v23  ;;  %v183_v36 = vmul.f32 %v488_v28, %v603_v1  ;;  %v184_v37 = vmul.f32 %v489_v29, %v603_v1  ;;  %v571_v28 = vld [vmem:[%s1023_s0 + $0xd0] sm:$0xff]  }
  0x25   :  { %v185_v38 = vmul.f32 %v492_v30, %v603_v1  ;;  %v186_v39 = vmul.f32 %v493_v31, %v603_v1  ;;  %v252_v40 = vadd.f32 %v617_v7, %v181_v32  ;;  %v253_v41 = vadd.f32 %v617_v7, %v182_v33  ;;  %v572_v33 = vld [vmem:[%s1023_s0 + $0xd8] sm:$0xff]  }
  0x26   :  { %v187_v42 = vmul.f32 %v496_v34, %v603_v1  ;;  %v188_v43 = vmul.f32 %v497_v35, %v603_v1  ;;  %v254_v44 = vadd.f32 %v617_v7, %v183_v36  ;;  %v255_v45 = vadd.f32 %v617_v7, %v184_v37 }
  0x27   :  { %v256_v46 = vadd.f32 %v617_v7, %v185_v38  ;;  %v257_v47 = vadd.f32 %v617_v7, %v186_v39  ;;  %v316_v49 = vmax.f32 %v252_v40, 0.0  ;;  %v317_v50 = vmax.f32 %v253_v41, 0.0 }
  0x28   :  { %v258_v51 = vadd.f32 %v617_v7, %v187_v42  ;;  %v259_v52 = vadd.f32 %v617_v7, %v188_v43  ;;  %v318_v55 = vmax.f32 %v254_v44, 0.0  ;;  %v319_v56 = vmax.f32 %v255_v45, 0.0 }
  0x29   :  { %v320_v57 = vmax.f32 %v256_v46, 0.0  ;;  %v321_v58 = vmax.f32 %v257_v47, 0.0  ;;  %380 = vst [vmem:[%s1026_s3 + $0x100] sm:$0xff] %v316_v49  ;;  %381 = vst [vmem:[%s1026_s3 + $0x108] sm:$0xff] %v317_v50  ;;  %v500_v62 = vunpack.c.l.bf16 %v565_v48  ;;  %v501_v63 = vunpack.c.h.bf16 %v565_v48 }
  0x2a   :  { %v322_v60 = vmax.f32 %v258_v51, 0.0  ;;  %v323_v61 = vmax.f32 %v259_v52, 0.0  ;;  %382 = vst [vmem:[%s1026_s3 + $0x110] sm:$0xff] %v318_v55  ;;  %383 = vst [vmem:[%s1026_s3 + $0x118] sm:$0xff] %v319_v56  ;;  %v504_v0 = vunpack.c.l.bf16 %v566_v53  ;;  %v505_v2 = vunpack.c.h.bf16 %v566_v53 }
  0x2b   :  { %384 = vst [vmem:[%s1026_s3 + $0x120] sm:$0xff] %v320_v57  ;;  %385 = vst [vmem:[%s1026_s3 + $0x128] sm:$0xff] %v321_v58  ;;  %v508_v3 = vunpack.c.l.bf16 %v567_v54  ;;  %v509_v4 = vunpack.c.h.bf16 %v567_v54  ;;  %v189_v5 = vmul.f32 %v500_v62, %v603_v1  ;;  %v190_v6 = vmul.f32 %v501_v63, %v603_v1  ;;  %v573_v58 = vld [vmem:[%s1023_s0 + $0xe0] sm:$0xff]   ;;  %v574_v63 = vld [vmem:[%s1023_s0 + $0xe8] sm:$0xff]  }
  0x2c   :  { %386 = vst [vmem:[%s1026_s3 + $0x130] sm:$0xff] %v322_v60  ;;  %387 = vst [vmem:[%s1026_s3 + $0x138] sm:$0xff] %v323_v61  ;;  %v512_v8 = vunpack.c.l.bf16 %v568_v59  ;;  %v513_v9 = vunpack.c.h.bf16 %v568_v59  ;;  %v191_v10 = vmul.f32 %v504_v0, %v603_v1  ;;  %v192_v11 = vmul.f32 %v505_v2, %v603_v1  ;;  %v575_v0 = vld [vmem:[%s1023_s0 + $0xf0] sm:$0xff]  }
  0x2d   :  { %v193_v12 = vmul.f32 %v508_v3, %v603_v1  ;;  %v194_v13 = vmul.f32 %v509_v4, %v603_v1  ;;  %v260_v14 = vadd.f32 %v617_v7, %v189_v5  ;;  %v261_v15 = vadd.f32 %v617_v7, %v190_v6  ;;  %v576_v6 = vld [vmem:[%s1023_s0 + $0xf8] sm:$0xff]  }
  0x2e   :  { %v195_v16 = vmul.f32 %v512_v8, %v603_v1  ;;  %v196_v17 = vmul.f32 %v513_v9, %v603_v1  ;;  %v262_v18 = vadd.f32 %v617_v7, %v191_v10  ;;  %v263_v19 = vadd.f32 %v617_v7, %v192_v11 }
  0x2f   :  { %v264_v20 = vadd.f32 %v617_v7, %v193_v12  ;;  %v265_v21 = vadd.f32 %v617_v7, %v194_v13  ;;  %v324_v23 = vmax.f32 %v260_v14, 0.0  ;;  %v325_v24 = vmax.f32 %v261_v15, 0.0 }
  0x30   :  { %v266_v25 = vadd.f32 %v617_v7, %v195_v16  ;;  %v267_v26 = vadd.f32 %v617_v7, %v196_v17  ;;  %v326_v29 = vmax.f32 %v262_v18, 0.0  ;;  %v327_v30 = vmax.f32 %v263_v19, 0.0 }
  0x31   :  { %v328_v31 = vmax.f32 %v264_v20, 0.0  ;;  %v329_v32 = vmax.f32 %v265_v21, 0.0  ;;  %388 = vst [vmem:[%s1026_s3 + $0x140] sm:$0xff] %v324_v23  ;;  %389 = vst [vmem:[%s1026_s3 + $0x148] sm:$0xff] %v325_v24  ;;  %v516_v36 = vunpack.c.l.bf16 %v569_v22  ;;  %v517_v37 = vunpack.c.h.bf16 %v569_v22 }
  0x32   :  { %v330_v34 = vmax.f32 %v266_v25, 0.0  ;;  %v331_v35 = vmax.f32 %v267_v26, 0.0  ;;  %390 = vst [vmem:[%s1026_s3 + $0x150] sm:$0xff] %v326_v29  ;;  %391 = vst [vmem:[%s1026_s3 + $0x158] sm:$0xff] %v327_v30  ;;  %v520_v38 = vunpack.c.l.bf16 %v570_v27  ;;  %v521_v39 = vunpack.c.h.bf16 %v570_v27 }
  0x33   :  { %392 = vst [vmem:[%s1026_s3 + $0x160] sm:$0xff] %v328_v31  ;;  %393 = vst [vmem:[%s1026_s3 + $0x168] sm:$0xff] %v329_v32  ;;  %v524_v40 = vunpack.c.l.bf16 %v571_v28  ;;  %v525_v41 = vunpack.c.h.bf16 %v571_v28  ;;  %v197_v42 = vmul.f32 %v516_v36, %v603_v1  ;;  %v198_v43 = vmul.f32 %v517_v37, %v603_v1 }
  0x34   :  { %394 = vst [vmem:[%s1026_s3 + $0x170] sm:$0xff] %v330_v34  ;;  %395 = vst [vmem:[%s1026_s3 + $0x178] sm:$0xff] %v331_v35  ;;  %v528_v44 = vunpack.c.l.bf16 %v572_v33  ;;  %v529_v45 = vunpack.c.h.bf16 %v572_v33  ;;  %v199_v46 = vmul.f32 %v520_v38, %v603_v1  ;;  %v200_v47 = vmul.f32 %v521_v39, %v603_v1 }
  0x35   :  { %v201_v48 = vmul.f32 %v524_v40, %v603_v1  ;;  %v202_v49 = vmul.f32 %v525_v41, %v603_v1  ;;  %v268_v50 = vadd.f32 %v617_v7, %v197_v42  ;;  %v269_v51 = vadd.f32 %v617_v7, %v198_v43 }
  0x36   :  { %v203_v52 = vmul.f32 %v528_v44, %v603_v1  ;;  %v204_v53 = vmul.f32 %v529_v45, %v603_v1  ;;  %v270_v54 = vadd.f32 %v617_v7, %v199_v46  ;;  %v271_v55 = vadd.f32 %v617_v7, %v200_v47 }
  0x37   :  { %v272_v56 = vadd.f32 %v617_v7, %v201_v48  ;;  %v273_v57 = vadd.f32 %v617_v7, %v202_v49  ;;  %v332_v59 = vmax.f32 %v268_v50, 0.0  ;;  %v333_v60 = vmax.f32 %v269_v51, 0.0 }
  0x38   :  { %v274_v61 = vadd.f32 %v617_v7, %v203_v52  ;;  %v275_v62 = vadd.f32 %v617_v7, %v204_v53  ;;  %v334_v2 = vmax.f32 %v270_v54, 0.0  ;;  %v335_v3 = vmax.f32 %v271_v55, 0.0 }
  0x39   :  { %v336_v4 = vmax.f32 %v272_v56, 0.0  ;;  %v337_v5 = vmax.f32 %v273_v57, 0.0  ;;  %396 = vst [vmem:[%s1026_s3 + $0x180] sm:$0xff] %v332_v59  ;;  %397 = vst [vmem:[%s1026_s3 + $0x188] sm:$0xff] %v333_v60  ;;  %v532_v10 = vunpack.c.l.bf16 %v573_v58  ;;  %v533_v11 = vunpack.c.h.bf16 %v573_v58 }
  0x3a   :  { %v338_v8 = vmax.f32 %v274_v61, 0.0  ;;  %v339_v9 = vmax.f32 %v275_v62, 0.0  ;;  %398 = vst [vmem:[%s1026_s3 + $0x190] sm:$0xff] %v334_v2  ;;  %399 = vst [vmem:[%s1026_s3 + $0x198] sm:$0xff] %v335_v3  ;;  %v536_v12 = vunpack.c.l.bf16 %v574_v63  ;;  %v537_v13 = vunpack.c.h.bf16 %v574_v63 }
  0x3b   :  { %400 = vst [vmem:[%s1026_s3 + $0x1a0] sm:$0xff] %v336_v4  ;;  %401 = vst [vmem:[%s1026_s3 + $0x1a8] sm:$0xff] %v337_v5  ;;  %v540_v14 = vunpack.c.l.bf16 %v575_v0  ;;  %v541_v15 = vunpack.c.h.bf16 %v575_v0  ;;  %v205_v16 = vmul.f32 %v532_v10, %v603_v1  ;;  %v206_v17 = vmul.f32 %v533_v11, %v603_v1 }
  0x3c   :  { %402 = vst [vmem:[%s1026_s3 + $0x1b0] sm:$0xff] %v338_v8  ;;  %403 = vst [vmem:[%s1026_s3 + $0x1b8] sm:$0xff] %v339_v9  ;;  %v544_v18 = vunpack.c.l.bf16 %v576_v6  ;;  %v545_v19 = vunpack.c.h.bf16 %v576_v6  ;;  %v207_v20 = vmul.f32 %v536_v12, %v603_v1  ;;  %v208_v21 = vmul.f32 %v537_v13, %v603_v1 }
  0x3d   :  { %v209_v22 = vmul.f32 %v540_v14, %v603_v1  ;;  %v210_v23 = vmul.f32 %v541_v15, %v603_v1  ;;  %v276_v24 = vadd.f32 %v617_v7, %v205_v16  ;;  %v277_v25 = vadd.f32 %v617_v7, %v206_v17 }
  0x3e   :  { %v211_v26 = vmul.f32 %v544_v18, %v603_v1  ;;  %v212_v27 = vmul.f32 %v545_v19, %v603_v1  ;;  %v278_v28 = vadd.f32 %v617_v7, %v207_v20  ;;  %v279_v29 = vadd.f32 %v617_v7, %v208_v21 }
  0x3f   :  { %v280_v30 = vadd.f32 %v617_v7, %v209_v22  ;;  %v281_v31 = vadd.f32 %v617_v7, %v210_v23  ;;  %v340_v32 = vmax.f32 %v276_v24, 0.0  ;;  %v341_v33 = vmax.f32 %v277_v25, 0.0 }
  0x40   :  { %v282_v34 = vadd.f32 %v617_v7, %v211_v26  ;;  %v283_v35 = vadd.f32 %v617_v7, %v212_v27  ;;  %v342_v36 = vmax.f32 %v278_v28, 0.0  ;;  %v343_v37 = vmax.f32 %v279_v29, 0.0 }
  0x41   :  { %v344_v38 = vmax.f32 %v280_v30, 0.0  ;;  %v345_v39 = vmax.f32 %v281_v31, 0.0  ;;  %404 = vst [vmem:[%s1026_s3 + $0x1c0] sm:$0xff] %v340_v32  ;;  %405 = vst [vmem:[%s1026_s3 + $0x1c8] sm:$0xff] %v341_v33 }
  0x42   :  { %v346_v1 = vmax.f32 %v282_v34, 0.0  ;;  %v347_v40 = vmax.f32 %v283_v35, 0.0  ;;  %406 = vst [vmem:[%s1026_s3 + $0x1d0] sm:$0xff] %v342_v36  ;;  %407 = vst [vmem:[%s1026_s3 + $0x1d8] sm:$0xff] %v343_v37 }
  0x43   :  { %408 = vst [vmem:[%s1026_s3 + $0x1e0] sm:$0xff] %v344_v38  ;;  %409 = vst [vmem:[%s1026_s3 + $0x1e8] sm:$0xff] %v345_v39 }
  0x44   :  { %410 = vst [vmem:[%s1026_s3 + $0x1f0] sm:$0xff] %v346_v1  ;;  %411 = vst [vmem:[%s1026_s3 + $0x1f8] sm:$0xff] %v347_v40 }

// kernel: conv_block_forward.2
= control target key start
LH: loop header
LB: loop body
LE: loop exit
PB: predicated region body
PF: predicated region fallthrough
CT: control target
= control target key end

     0   :  { %s6489_s12 = smov 0   ;;  %s6491_s13 = smov 0   ;;  %s9083_s0 = inlined_call_operand.vmem [shape: bf16[2,18,18,4], index: 0, kind: input, shape index: {}]   ;;  %s9084_s1 = inlined_call_operand.vmem [shape: bf16[3,3,4,128], index: 1, kind: input, shape index: {}]   ;;  %s9085_s2 = inlined_call_operand.vmem [shape: bf16[2,16,16,128], index: 2, kind: output, shape index: {0}]   ;;  %s9086_s3 = inlined_call_operand.vmem [shape: f32[2,1,2,128], index: 3, kind: output, shape index: {1}]  }
   0x1   :  { %s6493_s14 = smov 0  }
   0x2 LB: > { %s26_s15 = sadd.s32 1, %s6463_s13  ;;  %p5196_p0 = scmp.ge.s32.totalorder %s6467_s14, 1  ;;  %s6467_s14 = sphi %s6493_s14, %s14_s14   ;;  %s6463_s13 = sphi %s6491_s13, %s9336_s13   ;;  %s6459_s12 = sphi %s6489_s12, %s9335_s12  }
   0x3   : > { %p28_p1 = scmp.ge.s32.totalorder %s26_s15, 2  ;;  %p156_p2 = scmp.lt.s32.totalorder %s6467_s14, 3 }
   0x5   : > { %s9338_s15 = smov (%p28_p1, %s26_s15), 0  ;;  %p157_p3 = pnand %p5196_p0, %p156_p2 }
   0x7   : > { %160 = sbr.rel (%p157_p3) target bundleno = 575 (0x23f), region = 28 }
   0xc   : > { %v5201_v0 = vld [vmem:[%s9084_s1 + $0x2] sm:$0x3]  ;;  %vm755_vm0 = vcmask 1041408   ;;  %p192_p4 = scmp.lt.s32.totalorder %s6459_s12, 1  ;;  %v252_v2 = vld [vmem:[%s9084_s1] sm:$0x3] }
   0xd   : > { %6361 = vmatprep.subr.msk.bf16.mxu1 %vm755_vm0, %v5201_v0  ;;  %6360 = vmatprep.subr.msk.bf16.mxu0 %vm755_vm0, %v5201_v0  ;;  %v757_v1 = vsel %vm755_vm0, %v5201_v0, 0  ;;  %v5282_v3 = vld [vmem:[%s9084_s1 + $0x4] sm:$0x3]  ;;  %vm269_vm1 = vsmask.f32 3328  ;;  %v6530_v4 = vsel %vm755_vm0, %v252_v2, 0 }
   0xe   : > { %6359 = vmatpush3.bf16.msra.mxu1 %v757_v1  ;;  %6053 = vmatpush3.bf16.msra.mxu0 %v757_v1  ;;  %s9340_s12 = smov (!%p192_p4, %s6459_s12), 1  ;;  %vm270_vm2 = vsmask.f32 7440  ;;  %vm706_vm3 = vcmask 31744   ;;  %v6556_v16 = vsel %vm755_vm0, %v5282_v3, 0  ;;  %vm1260_vm5 = vcmask 1042432  }
   0xf   : > { %6362 = vmatprep.subr.msk.bf16.mxu1 %vm755_vm0, %v252_v2  ;;  %6363 = vmatprep.subr.msk.bf16.mxu0 %vm755_vm0, %v5282_v3  ;;  %s6370_s22 = smul.u32 216, %s9340_s12  ;;  %vm6571_vm4 = vmor %vm269_vm1, %vm270_vm2  ;;  %vm1261_vm6 = vcmask 1046532   ;;  %s5771_s11 = sshll.u32 %s9340_s12, 7  ;;  %vm5051_vm8 = vcmask 1040384  }
  0x10   : > { %vm6857_vm7 = vmor %vm1260_vm5, %vm1261_vm6  ;;  %s8988_s18 = scalar_lea.vmem %s9085_s2, %s5771_s11  ;;  %s5200_s19 = sshll.u32 %s9340_s12, 1 }
  0x11   : > { %s6527_s25 = scalar_lea.vmem %s9083_s0, %s6370_s22  ;;  %s214_s22 = scalar_lea.vmem %s9086_s3, %s5200_s19 }
  0x12   : > { %v6533_v5 = vld [vmem:[%s6527_s25] sm:$0xf]  ;;  %v6536_v6 = vld [vmem:[%s6527_s25 + $0x4] sm:$0xf]  ;;  %v6539_v7 = vld [vmem:[%s6527_s25 + $0x8] sm:$0x1] }
  0x13   : > { %v273_v8 = vshrl.u32 %v6533_v5, 16  ;;  %v276_v9 = vshll.u32 %v6533_v5, 16  ;;  %v282_v10 = vshll.u32 %v6536_v6, 16  ;;  %v286_v11 = vshrl.u32 %v6536_v6, 16  ;;  %v6546_v12 = vld [vmem:[%s6527_s25 + $0x60] sm:$0xf] }
  0x14   : > { %v292_v13 = vshll.u32 %v6539_v7, 16  ;;  %v6550_v14 = vld [vmem:[%s6527_s25 + $0x64] sm:$0xf]  ;;  %v6553_v15 = vld [vmem:[%s6527_s25 + $0x68] sm:$0x1]  ;;  %v465_v22 = vshrl.u32 %v6546_v12, 16 }
  0x15   : > { %v275_v17 = vrot.slane %v273_v8, 4  ;;  %v278_v18 = vrot.slane %v276_v9, 5  ;;  %v284_v19 = vrot.slane %v282_v10, 5  ;;  %v288_v20 = vrot.slane %v286_v11, 4  ;;  %v6564_v29 = vld [vmem:[%s6527_s25 + $0xc] sm:$0xf] }
  0x16   : > { %v294_v21 = vrot.slane %v292_v13, 5  ;;  %v468_v23 = vshll.u32 %v6546_v12, 16  ;;  %v474_v24 = vshll.u32 %v6550_v14, 16  ;;  %v478_v27 = vshrl.u32 %v6550_v14, 16  ;;  %v6567_v30 = vld [vmem:[%s6527_s25 + $0x10] sm:$0xf] }
  0x17   : > { %v279_v25 = vor.u32 %v278_v18, %v275_v17  ;;  %v289_v26 = vor.u32 %v288_v20, %v284_v19  ;;  %v484_v28 = vshll.u32 %v6553_v15, 16  ;;  %v467_v33 = vrot.slane %v465_v22, 4  ;;  %v6577_v41 = vld [vmem:[%s6527_s25 + $0x14] sm:$0x1]  ;;  %v6588_v53 = vld [vmem:[%s6527_s25 + $0x6c] sm:$0xf] }
  0x18   : > { %v470_v34 = vrot.slane %v468_v23, 5  ;;  %v476_v35 = vrot.slane %v474_v24, 5  ;;  %v480_v38 = vrot.slane %v478_v27, 4  ;;  %v297_v42 = vshrl.u32 %v6564_v29, 16  ;;  %v6592_v58 = vld [vmem:[%s6527_s25 + $0x70] sm:$0xf] }
  0x19   : > { %v280_v36 = vrot.slane %v279_v25, 4  ;;  %v290_v37 = vrot.slane %v289_v26, 4  ;;  %v486_v39 = vrot.slane %v484_v28, 5  ;;  %v300_v43 = vshll.u32 %v6564_v29, 16  ;;  %v6600_v63 = vld [vmem:[%s6527_s25 + $0x74] sm:$0x1] }
  0x1a   : > { %v471_v40 = vor.u32 %v470_v34, %v467_v33  ;;  %v306_v44 = vshll.u32 %v6567_v30, 16  ;;  %v481_v47 = vor.u32 %v480_v38, %v476_v35  ;;  %v310_v48 = vshrl.u32 %v6567_v30, 16  ;;  %v6606_v8 = vld [vmem:[%s6527_s25 + $0x18] sm:$0xf]  ;;  %v6619_v25 = vld [vmem:[%s6527_s25 + $0x20] sm:$0x1] }
  0x1b   : > { %v285_v45 = vsel %vm6571_vm4, %v280_v36, %v284_v19  ;;  %v295_v46 = vsel %vm6571_vm4, %v290_v37, %v294_v21  ;;  %v299_v51 = vrot.slane %v297_v42, 4  ;;  %v302_v52 = vrot.slane %v300_v43, 5  ;;  %v6613_v21 = vld [vmem:[%s6527_s25 + $0x1c] sm:$0xf] }
  0x1c   : > { %v5202_v49 = vcombine.low %v285_v45, %v295_v46  ;;  %v472_v50 = vrot.slane %v471_v40, 4  ;;  %v482_v54 = vrot.slane %v481_v47, 4  ;;  %v308_v55 = vrot.slane %v306_v44, 5  ;;  %v6632_v40 = vld [vmem:[%s9084_s1 + $0x8] sm:$0x3] }
  0x1d   : > { %v312_v56 = vrot.slane %v310_v48, 4  ;;  %v316_v57 = vshll.u32 %v6577_v41, 16  ;;  %v303_v60 = vor.u32 %v302_v52, %v299_v51  ;;  %v489_v3 = vshrl.u32 %v6588_v53, 16  ;;  %v6637_v46 = vld [vmem:[%s6527_s25 + $0x7c] sm:$0xf] }
  0x1e   : > { %6054 = vmatprep.mubr.msk.bf16.mxu0 %vm706_vm3, %v5202_v49  ;;  %v477_v59 = vsel %vm6571_vm4, %v472_v50, %v476_v35  ;;  %v487_v0 = vsel %vm6571_vm4, %v482_v54, %v486_v39  ;;  %v492_v11 = vshll.u32 %v6588_v53, 16  ;;  %v498_v13 = vshll.u32 %v6592_v58, 16  ;;  %v6626_v35 = vld [vmem:[%s6527_s25 + $0x78] sm:$0xf] }
  0x1f   : > { %v313_v1 = vor.u32 %v312_v56, %v308_v55  ;;  %v318_v2 = vrot.slane %v316_v57, 5  ;;  %v5210_v9 = vcombine.low %v477_v59, %v487_v0  ;;  %v304_v10 = vrot.slane %v303_v60, 4  ;;  %v6644_v56 = vld [vmem:[%s6527_s25 + $0x80] sm:$0x1] }
  0x20   : > { %v491_v18 = vrot.slane %v489_v3, 4  ;;  %v502_v19 = vshrl.u32 %v6592_v58, 16  ;;  %v508_v20 = vshll.u32 %v6600_v63, 16  ;;  %v494_v23 = vrot.slane %v492_v11, 5  ;;  %9122 = vst [vmem:[#allocation2_spill] sm:$0xff] %v6644_v56 }
  0x21   : > { %v314_v17 = vrot.slane %v313_v1, 4  ;;  %6070 = vmatprep.mubr.msk.bf16.mxu1 %vm706_vm3, %v5210_v9  ;;  %v309_v22 = vsel %vm6571_vm4, %v304_v10, %v308_v55  ;;  %v500_v24 = vrot.slane %v498_v13, 5  ;;  %v321_v26 = vshrl.u32 %v6606_v8, 16  ;;  %v6650_v1 = vld [vmem:[%s6527_s25 + $0x24] sm:$0xf] }
  0x22   : > { %v504_v28 = vrot.slane %v502_v19, 4  ;;  %v510_v33 = vrot.slane %v508_v20, 5  ;;  %v324_v34 = vshll.u32 %v6606_v8, 16  ;;  %v495_v37 = vor.u32 %v494_v23, %v491_v18  ;;  %v6658_v10 = vld [vmem:[%s6527_s25 + $0x28] sm:$0xf] }
  0x23   : > { %v319_v27 = vsel %vm6571_vm4, %v314_v17, %v318_v2  ;;  %v323_v38 = vrot.slane %v321_v26, 4  ;;  %v330_v39 = vshll.u32 %v6613_v21, 16  ;;  %v334_v44 = vshrl.u32 %v6613_v21, 16  ;;  %v6664_v19 = vld [vmem:[%s9084_s1 + $0x6] sm:$0x3] }
  0x24   : > { %v5203_v36 = vcombine.low %v309_v22, %v319_v27  ;;  %v505_v42 = vor.u32 %v504_v28, %v500_v24  ;;  %v326_v43 = vrot.slane %v324_v34, 5  ;;  %v340_v45 = vshll.u32 %v6619_v25, 16 }
  0x25   : > { %v496_v47 = vrot.slane %v495_v37, 4  ;;  %v332_v48 = vrot.slane %v330_v39, 5  ;;  %v513_v49 = vshrl.u32 %v6626_v35, 16  ;;  %v516_v50 = vshll.u32 %v6626_v35, 16 }
  0x26   : > { %6055 = vmatmul.mubr.msk.bf16.vlgmr.msra.gmra.mxu0 %vm706_vm3, %v5203_v36  ;;  %v506_v51 = vrot.slane %v505_v42, 4  ;;  %v327_v52 = vor.u32 %v326_v43, %v323_v38  ;;  %v336_v54 = vrot.slane %v334_v44, 4  ;;  %v342_v55 = vrot.slane %v340_v45, 5  ;;  %v6676_v36 = vld [vmem:[%s6527_s25 + $0x84] sm:$0xf] }
  0x27   : > { %6121 = vmatpush3.bf16.msra.mxu0 %v6556_v16  ;;  %v501_v57 = vsel %vm6571_vm4, %v496_v47, %v500_v24  ;;  %v515_v59 = vrot.slane %v513_v49, 4  ;;  %v518_v60 = vrot.slane %v516_v50, 5  ;;  %v522_v0 = vshll.u32 %v6637_v46, 16  ;;  %v6669_v24 = vld [vmem:[%s6527_s25 + $0x2c] sm:$0x1] }
  0x28   : > { %6365 = vmatprep.subr.msk.bf16.mxu0 %vm755_vm0, %v6632_v40  ;;  %v511_v16 = vsel %vm6571_vm4, %v506_v51, %v510_v33  ;;  %v328_v2 = vrot.slane %v327_v52, 4  ;;  %v337_v3 = vor.u32 %v336_v54, %v332_v48  ;;  %v526_v9 = vshrl.u32 %v6637_v46, 16  ;;  %v6683_v43 = vld [vmem:[%s6527_s25 + $0x88] sm:$0xf]  ;;  %v6691_v51 = vld [vmem:[%s6527_s25 + $0x8c] sm:$0x1] }
  0x29   : > { %v5211_v11 = vcombine.low %v501_v57, %v511_v16  ;;  %v519_v13 = vor.u32 %v518_v60, %v515_v59  ;;  %v524_v17 = vrot.slane %v522_v0, 5  ;;  %v532_v18 = vshll.u32 %v6644_v56, 16  ;;  %9123 = vst [vmem:[#allocation3_spill] sm:$0xff] %v6691_v51  ;;  %v6699_v60 = vld [vmem:[%s6527_s25 + $0x30] sm:$0xf] }
  0x2a   : > { %v333_v20 = vsel %vm6571_vm4, %v328_v2, %v332_v48  ;;  %v338_v22 = vrot.slane %v337_v3, 4  ;;  %v528_v23 = vrot.slane %v526_v9, 4  ;;  %v345_v26 = vshrl.u32 %v6650_v1, 16  ;;  %v6704_v9 = vld [vmem:[%s6527_s25 + $0x34] sm:$0xf] }
  0x2b   : > { %6071 = vmatmul.mubr.msk.bf16.vlgmr.msra.gmra.mxu1 %vm706_vm3, %v5211_v11  ;;  %v520_v27 = vrot.slane %v519_v13, 4  ;;  %v534_v28 = vrot.slane %v532_v18, 5  ;;  %v348_v33 = vshll.u32 %v6650_v1, 16  ;;  %v354_v34 = vshll.u32 %v6658_v10, 16 }
  0x2c   : > { %6087 = vmatpush3.bf16.msra.mxu1 %v6530_v4  ;;  %v343_v37 = vsel %vm6571_vm4, %v338_v22, %v342_v55  ;;  %v529_v38 = vor.u32 %v528_v23, %v524_v17  ;;  %v347_v39 = vrot.slane %v345_v26, 4  ;;  %v358_v42 = vshrl.u32 %v6658_v10, 16 }
  0x2d   : > { %v5204_v44 = vcombine.low %v333_v20, %v343_v37  ;;  %v525_v45 = vsel %vm6571_vm4, %v520_v27, %v524_v17  ;;  %v350_v47 = vrot.slane %v348_v33, 5  ;;  %v356_v48 = vrot.slane %v354_v34, 5  ;;  %6364 = vmatprep.subr.msk.bf16.mxu1 %vm755_vm0, %v6664_v19  ;;  %v6712_v33 = vld [vmem:[%s6527_s25 + $0x38] sm:$0x1] }
  0x2e   : > { %v530_v4 = vrot.slane %v529_v38, 4  ;;  %v360_v49 = vrot.slane %v358_v42, 4  ;;  %v364_v50 = vshll.u32 %v6669_v24, 16  ;;  %v537_v52 = vshrl.u32 %v6676_v36, 16  ;;  %v6717_v38 = vld [vmem:[%s6527_s25 + $0x90] sm:$0xf] }
  0x2f   : > { %6058 = vmatprep.mubr.msk.bf16.mxu0 %vm706_vm3, %v5204_v44  ;;  %v351_v54 = vor.u32 %v350_v47, %v347_v39  ;;  %v540_v55 = vshll.u32 %v6676_v36, 16  ;;  %v546_v57 = vshll.u32 %v6683_v43, 16  ;;  %v550_v59 = vshrl.u32 %v6683_v43, 16  ;;  %9124 = vst [vmem:[#allocation4_spill] sm:$0xff] %v6717_v38  ;;  %v6722_v47 = vld [vmem:[%s6527_s25 + $0x94] sm:$0xf] }
  0x30   : > { %v535_v0 = vsel %vm6571_vm4, %v530_v4, %v534_v28  ;;  %v361_v16 = vor.u32 %v360_v49, %v356_v48  ;;  %v366_v2 = vrot.slane %v364_v50, 5  ;;  %v539_v3 = vrot.slane %v537_v52, 4  ;;  %9125 = vst [vmem:[#allocation5_spill] sm:$0xff] %v6722_v47 }
  0x31   : > { %v5212_v11 = vcombine.low %v525_v45, %v535_v0  ;;  %v352_v13 = vrot.slane %v351_v54, 4  ;;  %v542_v17 = vrot.slane %v540_v55, 5  ;;  %v548_v18 = vrot.slane %v546_v57, 5 }
  0x32   : > { %v362_v20 = vrot.slane %v361_v16, 4  ;;  %v552_v22 = vrot.slane %v550_v59, 4  ;;  %v556_v23 = vshll.u32 %v6691_v51, 16  ;;  %v369_v26 = vshrl.u32 %v6699_v60, 16  ;;  %v6731_v16 = vld [vmem:[%s6527_s25 + $0x98] sm:$0x1] }
  0x33   : > { %6074 = vmatprep.mubr.msk.bf16.mxu1 %vm706_vm3, %v5212_v11  ;;  %v357_v27 = vsel %vm6571_vm4, %v352_v13, %v356_v48  ;;  %v543_v28 = vor.u32 %v542_v17, %v539_v3  ;;  %v372_v34 = vshll.u32 %v6699_v60, 16  ;;  %v378_v37 = vshll.u32 %v6704_v9, 16  ;;  %9126 = vst [vmem:[#allocation6_spill] sm:$0xff] %v6731_v16  ;;  %v6736_v11 = vld [vmem:[%s6527_s25 + $0x3c] sm:$0xf] }
  0x34   : > { %v367_v39 = vsel %vm6571_vm4, %v362_v20, %v366_v2  ;;  %v553_v42 = vor.u32 %v552_v22, %v548_v18  ;;  %v558_v44 = vrot.slane %v556_v23, 5  ;;  %v371_v45 = vrot.slane %v369_v26, 4  ;;  %v6741_v23 = vld [vmem:[%s6527_s25 + $0x40] sm:$0xf]  ;;  %v1213_v51 = vld [vmem:[%s6527_s25 + $0xc] sm:$0xe] }
  0x35   : > { %v5205_v48 = vcombine.low %v357_v27, %v367_v39  ;;  %v544_v4 = vrot.slane %v543_v28, 4  ;;  %v374_v49 = vrot.slane %v372_v34, 5  ;;  %v380_v50 = vrot.slane %v378_v37, 5 }
  0x36   : > { %v554_v52 = vrot.slane %v553_v42, 4  ;;  %v382_v54 = vshrl.u32 %v6704_v9, 16  ;;  %v388_v55 = vshll.u32 %v6712_v33, 16  ;;  %v561_v57 = vshrl.u32 %v6717_v38, 16 }
  0x37   : > { %6059 = vmatmul.mubr.msk.bf16.gmra.mxu0 %vm706_vm3, %v5205_v48  ;;  %v549_v59 = vsel %vm6571_vm4, %v544_v4, %v548_v18  ;;  %v375_v0 = vor.u32 %v374_v49, %v371_v45  ;;  %v564_v2 = vshll.u32 %v6717_v38, 16  ;;  %v570_v3 = vshll.u32 %v6722_v47, 16  ;;  %v6750_v48 = vld [vmem:[%s6527_s25 + $0x44] sm:$0x1] }
  0x38   : > { %v559_v13 = vsel %vm6571_vm4, %v554_v52, %v558_v44  ;;  %v384_v17 = vrot.slane %v382_v54, 4  ;;  %v390_v20 = vrot.slane %v388_v55, 5  ;;  %v563_v22 = vrot.slane %v561_v57, 4  ;;  %v6755_v52 = vld [vmem:[%s6527_s25 + $0x9c] sm:$0xf] }
  0x39   : > { %v5213_v18 = vcombine.low %v549_v59, %v559_v13  ;;  %v376_v26 = vrot.slane %v375_v0, 4  ;;  %v566_v27 = vrot.slane %v564_v2, 5  ;;  %v572_v28 = vrot.slane %v570_v3, 5  ;;  %9127 = vst [vmem:[#allocation7_spill] sm:$0xff] %v6755_v52  ;;  %v6759_v13 = vld [vmem:[%s6527_s25 + $0xa0] sm:$0xf] }
  0x3a   : > { %v385_v34 = vor.u32 %v384_v17, %v380_v50  ;;  %v574_v37 = vshrl.u32 %v6722_v47, 16  ;;  %v580_v39 = vshll.u32 %v6731_v16, 16  ;;  %v393_v42 = vshrl.u32 %v6736_v11, 16  ;;  %9128 = vst [vmem:[#allocation8_spill] sm:$0xff] %v6759_v13 }
  0x3b   : > { %6075 = vmatmul.mubr.msk.bf16.gmra.mxu1 %vm706_vm3, %v5213_v18  ;;  %v381_v44 = vsel %vm6571_vm4, %v376_v26, %v380_v50  ;;  %v567_v45 = vor.u32 %v566_v27, %v563_v22  ;;  %v396_v4 = vshll.u32 %v6736_v11, 16  ;;  %v402_v49 = vshll.u32 %v6741_v23, 16  ;;  %v6765_v26 = vld [vmem:[%s6527_s25 + $0xa4] sm:$0x1] }
  0x3c   : > { %v386_v54 = vrot.slane %v385_v34, 4  ;;  %v576_v55 = vrot.slane %v574_v37, 4  ;;  %v582_v57 = vrot.slane %v580_v39, 5  ;;  %v395_v59 = vrot.slane %v393_v42, 4  ;;  %9129 = vst [vmem:[#allocation9_spill] sm:$0xff] %v6765_v26 }
  0x3d   : > { %v568_v0 = vrot.slane %v567_v45, 4  ;;  %v398_v2 = vrot.slane %v396_v4, 5  ;;  %v404_v3 = vrot.slane %v402_v49, 5  ;;  %v406_v50 = vshrl.u32 %v6741_v23, 16  ;;  %v6769_v34 = vld [vmem:[%s6527_s25 + $0x48] sm:$0xf] }
  0x3e   : > { %v391_v17 = vsel %vm6571_vm4, %v386_v54, %v390_v20  ;;  %v577_v22 = vor.u32 %v576_v55, %v572_v28  ;;  %v412_v18 = vshll.u32 %v6750_v48, 16  ;;  %v585_v27 = vshrl.u32 %v6755_v52, 16 }
  0x3f   : > { %v5206_v37 = vcombine.low %v381_v44, %v391_v17  ;;  %v573_v39 = vsel %vm6571_vm4, %v568_v0, %v572_v28  ;;  %v399_v42 = vor.u32 %v398_v2, %v395_v59  ;;  %v408_v45 = vrot.slane %v406_v50, 4  ;;  %v6778_v17 = vld [vmem:[%s6527_s25 + $0x4c] sm:$0xf]  ;;  %v6784_v2 = vld [vmem:[%s6527_s25 + $0x50] sm:$0x1] }
  0x40   : > { %v578_v4 = vrot.slane %v577_v22, 4  ;;  %v414_v49 = vrot.slane %v412_v18, 5  ;;  %v587_v20 = vrot.slane %v585_v27, 4  ;;  %v588_v54 = vshll.u32 %v6755_v52, 16 }
  0x41   : > { %6062 = vmatprep.mubr.msk.bf16.mxu0 %vm706_vm3, %v5206_v37  ;;  %v400_v55 = vrot.slane %v399_v42, 4  ;;  %v409_v62 = vor.u32 %v408_v45, %v404_v3  ;;  %v594_v32 = vshll.u32 %v6759_v13, 16  ;;  %v598_v44 = vshrl.u32 %v6759_v13, 16  ;;  %v6790_v42 = vld [vmem:[%s6527_s25 + $0xa8] sm:$0xf] }
  0x42   : > { %v583_v28 = vsel %vm6571_vm4, %v578_v4, %v582_v57  ;;  %v590_v59 = vrot.slane %v588_v54, 5  ;;  %v604_v0 = vshll.u32 %v6765_v26, 16  ;;  %v417_v50 = vshrl.u32 %v6769_v34, 16  ;;  %9130 = vst [vmem:[#allocation10_spill] sm:$0xff] %v6790_v42 }
  0x43   : > { %v5214_v22 = vcombine.low %v573_v39, %v583_v28  ;;  %v405_v18 = vsel %vm6571_vm4, %v400_v55, %v404_v3  ;;  %v410_v27 = vrot.slane %v409_v62, 4  ;;  %v596_v37 = vrot.slane %v594_v32, 5 }
  0x44   : > { %v591_v45 = vor.u32 %v590_v59, %v587_v20  ;;  %v600_v61 = vrot.slane %v598_v44, 4  ;;  %v606_v57 = vrot.slane %v604_v0, 5  ;;  %v419_v4 = vrot.slane %v417_v50, 4  ;;  %v6800_v44 = vld [vmem:[%s6527_s25 + $0xac] sm:$0xf] }
  0x45   : > { %6078 = vmatprep.mubr.msk.bf16.mxu1 %vm706_vm3, %v5214_v22  ;;  %v415_v54 = vsel %vm6571_vm4, %v410_v27, %v414_v49  ;;  %v420_v39 = vshll.u32 %v6769_v34, 16  ;;  %v426_v28 = vshll.u32 %v6778_v17, 16  ;;  %v430_v62 = vshrl.u32 %v6778_v17, 16  ;;  %9131 = vst [vmem:[#allocation11_spill] sm:$0xff] %v6800_v44  ;;  %v6803_v22 = vld [vmem:[%s6527_s25 + $0xb0] sm:$0x1] }
  0x46   : > { %v5207_v3 = vcombine.low %v405_v18, %v415_v54  ;;  %v592_v32 = vrot.slane %v591_v45, 4  ;;  %v601_v55 = vor.u32 %v600_v61, %v596_v37  ;;  %v436_v20 = vshll.u32 %v6784_v2, 16  ;;  %9132 = vst [vmem:[#allocation12_spill] sm:$0xff] %v6803_v22 }
  0x47   : > { %v422_v59 = vrot.slane %v420_v39, 5  ;;  %v428_v0 = vrot.slane %v426_v28, 5  ;;  %v432_v50 = vrot.slane %v430_v62, 4  ;;  %v609_v49 = vshrl.u32 %v6790_v42, 16  ;;  %v6812_v62 = vld [vmem:[%s6527_s25 + $0x54] sm:$0xf] }
  0x48   : > { %6063 = vmatmul.mubr.msk.bf16.gmra.mxu0 %vm706_vm3, %v5207_v3  ;;  %v597_v18 = vsel %vm6571_vm4, %v592_v32, %v596_v37  ;;  %v602_v27 = vrot.slane %v601_v55, 4  ;;  %v438_v61 = vrot.slane %v436_v20, 5  ;;  %v612_v45 = vshll.u32 %v6790_v42, 16  ;;  %v6819_v55 = vld [vmem:[%s6527_s25 + $0x58] sm:$0xf] }
  0x49   : > { %v423_v54 = vor.u32 %v422_v59, %v419_v4  ;;  %v433_v56 = vor.u32 %v432_v50, %v428_v0  ;;  %v611_v39 = vrot.slane %v609_v49, 4  ;;  %v618_v28 = vshll.u32 %v6800_v44, 16  ;;  %v6822_v49 = vld [vmem:[%s6527_s25 + $0x5c] sm:$0x1] }
  0x4a   : > { %v607_v3 = vsel %vm6571_vm4, %v602_v27, %v606_v57  ;;  %v614_v26 = vrot.slane %v612_v45, 5  ;;  %v622_v37 = vshrl.u32 %v6800_v44, 16  ;;  %v628_v32 = vshll.u32 %v6803_v22, 16  ;;  %v1212_v22 = vld [vmem:[%s6527_s25] sm:$0xe] }
  0x4b   : > { %v5215_v4 = vcombine.low %v597_v18, %v607_v3  ;;  %v424_v20 = vrot.slane %v423_v54, 4  ;;  %v434_v59 = vrot.slane %v433_v56, 4  ;;  %v620_v50 = vrot.slane %v618_v28, 5  ;;  %v6833_v54 = vld [vmem:[%s6527_s25 + $0xb4] sm:$0xf] }
  0x4c   : > { %v615_v42 = vor.u32 %v614_v26, %v611_v39  ;;  %v624_v52 = vrot.slane %v622_v37, 4  ;;  %v630_v13 = vrot.slane %v628_v32, 5  ;;  %v441_v57 = vshrl.u32 %v6812_v62, 16  ;;  %9133 = vst [vmem:[#allocation13_spill] sm:$0xff] %v6833_v54  ;;  %v6836_v37 = vld [vmem:[%s6527_s25 + $0xb8] sm:$0xf] }
  0x4d   : > { %6079 = vmatmul.mubr.msk.bf16.gmra.mxu1 %vm706_vm3, %v5215_v4  ;;  %v429_v27 = vsel %vm6571_vm4, %v424_v20, %v428_v0  ;;  %v439_v18 = vsel %vm6571_vm4, %v434_v59, %v438_v61  ;;  %v444_v56 = vshll.u32 %v6812_v62, 16  ;;  %v450_v45 = vshll.u32 %v6819_v55, 16  ;;  %v6841_v61 = vld [vmem:[%s6527_s25 + $0xbc] sm:$0x1] }
  0x4e   : > { %v5208_v26 = vcombine.low %v429_v27, %v439_v18  ;;  %v616_v39 = vrot.slane %v615_v42, 4  ;;  %v625_v28 = vor.u32 %v624_v52, %v620_v50  ;;  %v443_v3 = vrot.slane %v441_v57, 4 }
  0x4f   : > { %v446_v32 = vrot.slane %v444_v56, 5  ;;  %v452_v4 = vrot.slane %v450_v45, 5  ;;  %v454_v0 = vshrl.u32 %v6819_v55, 16  ;;  %v460_v20 = vshll.u32 %v6822_v49, 16 }
  0x50   : > { %6066 = vmatprep.mubr.msk.bf16.mxu0 %vm706_vm3, %v5208_v26  ;;  %v621_v59 = vsel %vm6571_vm4, %v616_v39, %v620_v50  ;;  %v626_v27 = vrot.slane %v625_v28, 4  ;;  %v633_v52 = vshrl.u32 %v6833_v54, 16  ;;  %v636_v42 = vshll.u32 %v6833_v54, 16 }
  0x51   : > { %v447_v57 = vor.u32 %v446_v32, %v443_v3  ;;  %v456_v18 = vrot.slane %v454_v0, 4  ;;  %v462_v56 = vrot.slane %v460_v20, 5  ;;  %v642_v45 = vshll.u32 %v6836_v37, 16 }
  0x52   : > { %v631_v44 = vsel %vm6571_vm4, %v626_v27, %v630_v13  ;;  %v635_v16 = vrot.slane %v633_v52, 4  ;;  %v638_v26 = vrot.slane %v636_v42, 5  ;;  %v646_v38 = vshrl.u32 %v6836_v37, 16 }
  0x53   : > { %v5216_v50 = vcombine.low %v621_v59, %v631_v44  ;;  %v448_v39 = vrot.slane %v447_v57, 4  ;;  %v457_v28 = vor.u32 %v456_v18, %v452_v4  ;;  %v644_v47 = vrot.slane %v642_v45, 5  ;;  %v1214_v57 = vld [vmem:[%s6527_s25 + $0x18] sm:$0xe] }
  0x54   : > { %v639_v54 = vor.u32 %v638_v26, %v635_v16  ;;  %v648_v3 = vrot.slane %v646_v38, 4  ;;  %v652_v32 = vshll.u32 %v6841_v61, 16  ;;  %v5266_v13 = vrot.slane %v1212_v22, 9 }
  0x55   : > { %6082 = vmatprep.mubr.msk.bf16.mxu1 %vm706_vm3, %v5216_v50  ;;  %v453_v44 = vsel %vm6571_vm4, %v448_v39, %v452_v4  ;;  %v458_v20 = vrot.slane %v457_v28, 4  ;;  %v1265_v59 = vrot.slane %v6536_v6, 5  ;;  %v5235_v38 = vcombine.low %v6564_v29, %v6567_v30 }
  0x56   : > { %v640_v16 = vrot.slane %v639_v54, 4  ;;  %v649_v27 = vor.u32 %v648_v3, %v644_v47  ;;  %v654_v52 = vrot.slane %v652_v32, 5  ;;  %v5267_v42 = vrot.slane %v1213_v51, 9 }
  0x57   : > { %v463_v18 = vsel %vm6571_vm4, %v458_v20, %v462_v56  ;;  %v1266_v22 = vsel %vm6857_vm7, %v5266_v13, %v1265_v59  ;;  %v1267_v45 = vrot.slane %v1265_v59, 4  ;;  %v9136_v4 = vrot.slane %v6567_v30, 5 }
  0x58   : > { %v5209_v50 = vcombine.low %v453_v44, %v463_v18  ;;  %v645_v54 = vsel %vm6571_vm4, %v640_v16, %v644_v47  ;;  %v650_v39 = vrot.slane %v649_v27, 4  ;;  %v5234_v51 = vcombine.low %v6533_v5, %v6536_v6  ;;  %v1215_v27 = vld [vmem:[%s6527_s25 + $0x24] sm:$0xe] }
  0x59   : > { %v1274_v26 = vrot.slane %v9136_v4, 4  ;;  %v9137_v28 = vrot.slane %v6539_v7, 5  ;;  %v9138_v3 = vmov %v9136_v4  ;;  %v5236_v13 = vcombine.low %v6606_v8, %v6613_v21  ;;  %v1217_v4 = vld [vmem:[%s6527_s25 + $0x3c] sm:$0xe] }
  0x5a   : > { %v1273_v32 = vsel %vm6857_vm7, %v5267_v42, %v9138_v3  ;;  %v5268_v44 = vrot.slane %v1214_v57, 9  ;;  %6067 = vmatmul.mubr.msk.bf16.gmra.mxu0 %vm706_vm3, %v5209_v50  ;;  %v655_v47 = vsel %vm6571_vm4, %v650_v39, %v654_v52  ;;  %v9139_v6 = vrot.slane %v6577_v41, 5  ;;  %v1216_v42 = vld [vmem:[%s6527_s25 + $0x30] sm:$0xe]  ;;  %v1218_v39 = vld [vmem:[%s6527_s25 + $0x48] sm:$0xe] }
  0x5b   : > { %v1269_v56 = vsel %vm6857_vm7, %v1267_v45, %v9137_v28  ;;  %v1279_v20 = vrot.slane %v6613_v21, 5  ;;  %v5217_v59 = vcombine.low %v645_v54, %v655_v47  ;;  %v1282_v16 = vrot.slane %v6619_v25, 5  ;;  %v1219_v47 = vld [vmem:[%s6527_s25 + $0x54] sm:$0xe]  ;;  %v7152_v21 = vld [vmem:[%s6527_s25 + $0x2c] sm:$0x1] }
  0x5c   : > { %v5283_v5 = vcombine.low %v1266_v22, %v1269_v56  ;;  %v1276_v7 = vsel %vm6857_vm7, %v1274_v26, %v9139_v6  ;;  %v1836_v52 = vsel %vm755_vm0, %v6664_v19, 0  ;;  %v1286_v18 = vrot.slane %v6658_v10, 5 }
  0x5d   : > { %v1280_v41 = vsel %vm6857_vm7, %v5268_v44, %v1279_v20  ;;  %v1281_v57 = vrot.slane %v1279_v20, 4  ;;  %6083 = vmatmul.mubr.msk.bf16.gmra.mxu1 %vm706_vm3, %v5217_v59  ;;  %v5284_v22 = vcombine.low %v1273_v32, %v1276_v7  ;;  %v2562_v25 = vsel %vm755_vm0, %v6632_v40, 0 }
  0x5e   : > { %6122 = vmatprep.mubr.msk.bf16.mxu0 %vm706_vm3, %v5283_v5  ;;  %v1293_v45 = vrot.slane %v6704_v9, 5  ;;  %6088 = vmatprep.mubr.msk.bf16.mxu1 %vm706_vm3, %v5234_v51  ;;  %v5269_v26 = vrot.slane %v1215_v27, 9  ;;  %v1289_v50 = vrot.slane %v6669_v24, 5  ;;  %v5270_v54 = vrot.slane %v1216_v42, 9  ;;  %v6924_v24 = vld [vmem:[%s9084_s1 + $0xc] sm:$0x3] }
  0x5f   : > { %v1283_v19 = vsel %vm6857_vm7, %v1281_v57, %v1282_v16  ;;  %v1288_v56 = vrot.slane %v1286_v18, 4  ;;  %v1296_v32 = vrot.slane %v6712_v33, 5  ;;  %v5271_v44 = vrot.slane %v1217_v4, 9 }
  0x60   : > { %v5285_v28 = vcombine.low %v1280_v41, %v1283_v19  ;;  %v1295_v3 = vrot.slane %v1293_v45, 4  ;;  %v1300_v40 = vrot.slane %v6741_v23, 5  ;;  %v1324_v5 = vrot.slane %v6553_v15, 5 }
  0x61   : > { %v1303_v51 = vrot.slane %v6750_v48, 5  ;;  %v5272_v6 = vrot.slane %v1218_v39, 9  ;;  %v1307_v7 = vrot.slane %v6778_v17, 5  ;;  %v5237_v33 = vcombine.low %v6650_v1, %v6658_v10  ;;  %v1220_v1 = vld [vmem:[%s6527_s25 + $0x60] sm:$0xe] }
  0x62   : > { %6123 = vmatmul.mubr.msk.bf16.vlgmr.msra.gmra.mxu0 %vm706_vm3, %v5284_v22  ;;  %v1287_v20 = vsel %vm6857_vm7, %v5269_v26, %v1286_v18  ;;  %v1302_v59 = vrot.slane %v1300_v40, 4  ;;  %v1310_v16 = vrot.slane %v6784_v2, 5  ;;  %v1290_v48 = vsel %vm6857_vm7, %v1288_v56, %v1289_v50  ;;  %v6952_v22 = vld [vmem:[%s9084_s1 + $0xa] sm:$0x3]  ;;  %v6977_v50 = vld [vmem:[%s6527_s25 + $0x6c] sm:$0xe] }
  0x63   : > { %6189 = vmatpush3.bf16.msra.mxu0 %v2562_v25  ;;  %6126 = vmatprep.mubr.msk.bf16.mxu0 %vm706_vm3, %v5285_v28  ;;  %v1294_v27 = vsel %vm6857_vm7, %v5270_v54, %v1293_v45  ;;  %v1297_v42 = vsel %vm6857_vm7, %v1295_v3, %v1296_v32  ;;  %v1309_v41 = vrot.slane %v1307_v7, 4  ;;  %v6942_v10 = vsel %vm6857_vm7, %v5271_v44, %v1300_v40  ;;  %v1223_v39 = vld [vmem:[%s6527_s25 + $0x84] sm:$0xe]  ;;  %v7006_v44 = vld [vmem:[%s6527_s25 + $0x78] sm:$0xe] }
  0x64   : > { %v6946_v2 = vsel %vm6857_vm7, %v5272_v6, %v1307_v7  ;;  %v5273_v57 = vrot.slane %v1219_v47, 9  ;;  %v1314_v18 = vrot.slane %v6819_v55, 5  ;;  %6367 = vmatprep.subr.msk.bf16.mxu0 %vm755_vm0, %v6924_v24  ;;  %v6962_v25 = vsel %vm6857_vm7, %v1302_v59, %v1303_v51  ;;  %v1224_v40 = vld [vmem:[%s6527_s25 + $0x90] sm:$0xe] }
  0x65   : > { %6089 = vmatmul.mubr.msk.bf16.vlgmr.msra.gmra.mxu1 %vm706_vm3, %v5235_v38  ;;  %v6966_v45 = vsel %vm6857_vm7, %v1309_v41, %v1310_v16  ;;  %v1317_v4 = vrot.slane %v6822_v49, 5  ;;  %v1321_v19 = vrot.slane %v6550_v14, 5  ;;  %v5286_v29 = vcombine.low %v1287_v20, %v1290_v48  ;;  %v9140_v48 = vld [vmem:[#allocation3_spill] sm:$0xff] }
  0x66   : > { %6155 = vmatpush3.bf16.msra.mxu1 %v1836_v52  ;;  %6092 = vmatprep.mubr.msk.bf16.mxu1 %vm706_vm3, %v5236_v13  ;;  %v5238_v30 = vcombine.low %v6699_v60, %v6704_v9  ;;  %v1316_v38 = vrot.slane %v1314_v18, 4  ;;  %v5274_v26 = vrot.slane %v1220_v1, 9  ;;  %v5287_v49 = vcombine.low %v1294_v27, %v1297_v42  ;;  %v1225_v42 = vld [vmem:[%s6527_s25 + $0x9c] sm:$0xe] }
  0x67   : > { %v5239_v52 = vcombine.low %v6736_v11, %v6741_v23  ;;  %v5240_v8 = vcombine.low %v6769_v34, %v6778_v17  ;;  %6366 = vmatprep.subr.msk.bf16.mxu1 %vm755_vm0, %v6952_v22  ;;  %v5288_v60 = vcombine.low %v6942_v10, %v6962_v25  ;;  %v5289_v9 = vcombine.low %v6946_v2, %v6966_v45  ;;  %v9141_v10 = vld [vmem:[#allocation5_spill] sm:$0xff]  ;;  %v9142_v2 = vld [vmem:[#allocation4_spill] sm:$0xff] }
  0x68   : > { %v1323_v54 = vrot.slane %v1321_v19, 4  ;;  %v6996_v28 = vsel %vm6857_vm7, %v5273_v57, %v1314_v18  ;;  %v7000_v56 = vsel %vm6857_vm7, %v1316_v38, %v1317_v4  ;;  %v5275_v32 = vrot.slane %v6977_v50, 9  ;;  %v1226_v18 = vld [vmem:[%s6527_s25 + $0xa8] sm:$0xe]  ;;  %v9144_v38 = vld [vmem:[#allocation8_spill] sm:$0xff] }
  0x69   : > { %v7012_v47 = vsel %vm6857_vm7, %v5274_v26, %v1321_v19  ;;  %v1328_v51 = vrot.slane %v6592_v58, 5  ;;  %v1331_v6 = vrot.slane %v6600_v63, 5  ;;  %v5277_v59 = vrot.slane %v1223_v39, 9  ;;  %v9143_v19 = vld [vmem:[#allocation6_spill] sm:$0xff]  ;;  %v9145_v26 = vld [vmem:[#allocation7_spill] sm:$0xff] }
  0x6a   : > { %6127 = vmatmul.mubr.msk.bf16.gmra.mxu0 %vm706_vm3, %v5286_v29  ;;  %v1342_v16 = vrot.slane %v6683_v43, 5  ;;  %v1345_v27 = vrot.slane %v9140_v48, 5  ;;  %v5290_v41 = vcombine.low %v6996_v28, %v7000_v56  ;;  %v7030_v63 = vsel %vm6857_vm7, %v1323_v54, %v1324_v5  ;;  %v9147_v48 = vld [vmem:[#allocation11_spill] sm:$0xff] }
  0x6b   : > { %6130 = vmatprep.mubr.msk.bf16.mxu0 %vm706_vm3, %v5287_v49  ;;  %v5276_v1 = vrot.slane %v7006_v44, 9  ;;  %v5278_v4 = vrot.slane %v1224_v40, 9  ;;  %v1349_v15 = vrot.slane %v9141_v10, 5  ;;  %v1330_v5 = vrot.slane %v1328_v51, 4  ;;  %v5380_v57 = vld [vmem:[%s6527_s25 + $0xc] sm:$0xf] }
  0x6c   : > { %v7039_v25 = vsel %vm6857_vm7, %v5277_v59, %v1342_v16  ;;  %v1344_v45 = vrot.slane %v1342_v16, 4  ;;  %v1352_v29 = vrot.slane %v9143_v19, 5  ;;  %v5279_v49 = vrot.slane %v1225_v42, 9  ;;  %v9146_v59 = vld [vmem:[#allocation9_spill] sm:$0xff]  ;;  %v9148_v42 = vld [vmem:[#allocation10_spill] sm:$0xff] }
  0x6d   : > { %6093 = vmatmul.mubr.msk.bf16.gmra.mxu1 %vm706_vm3, %v5237_v33  ;;  %v1335_v33 = vrot.slane %v6637_v46, 5  ;;  %v7053_v39 = vsel %vm6857_vm7, %v5278_v4, %v1349_v15  ;;  %v1351_v44 = vrot.slane %v1349_v15, 4  ;;  %v1356_v40 = vrot.slane %v9144_v38, 5  ;;  %v9149_v15 = vld [vmem:[#allocation12_spill] sm:$0xff] }
  0x6e   : > { %6096 = vmatprep.mubr.msk.bf16.mxu1 %vm706_vm3, %v5238_v30  ;;  %v7049_v54 = vsel %vm6857_vm7, %v1344_v45, %v1345_v27  ;;  %v1359_v16 = vrot.slane %v9146_v59, 5  ;;  %v5280_v45 = vrot.slane %v1226_v18, 9  ;;  %v1363_v4 = vrot.slane %v9147_v48, 5 }
  0x6f   : > { %v7063_v27 = vsel %vm6857_vm7, %v1351_v44, %v1352_v29  ;;  %v1366_v50 = vrot.slane %v9149_v15, 5  ;;  %v7073_v19 = vsel %vm6857_vm7, %v5279_v49, %v1356_v40  ;;  %v1358_v7 = vrot.slane %v1356_v40, 4  ;;  %v9150_v29 = vld [vmem:[#allocation13_spill] sm:$0xff]  ;;  %v9151_v15 = vld [vmem:[#allocation2_spill] sm:$0xff]  ;;  %v7088_v49 = vld [vmem:[%s6527_s25 + $0x10] sm:$0xf] }
  0x70   : > { %v7080_v18 = vsel %vm6857_vm7, %v5275_v32, %v1328_v51  ;;  %v7085_v59 = vsel %vm6857_vm7, %v5280_v45, %v1363_v4  ;;  %v1365_v30 = vrot.slane %v1363_v4, 4  ;;  %v5383_v40 = vld [vmem:[%s6527_s25 + $0x18] sm:$0xf]  ;;  %v1337_v20 = vrot.slane %v1335_v33, 4 }
  0x71   : > { %v2080_v44 = vshrl.u32 %v5380_v57, 16  ;;  %v2083_v32 = vshll.u32 %v5380_v57, 16  ;;  %v5291_v51 = vcombine.low %v7012_v47, %v7030_v63  ;;  %v7103_v45 = vsel %vm6857_vm7, %v1330_v5, %v1331_v6  ;;  %v1227_v57 = vld [vmem:[%s6527_s25 + $0xb4] sm:$0xe]  ;;  %v7124_v47 = vld [vmem:[%s6527_s25 + $0x14] sm:$0x1] }
  0x72   : > { %6131 = vmatmul.mubr.msk.bf16.gmra.mxu0 %vm706_vm3, %v5288_v60  ;;  %v1338_v60 = vrot.slane %v9151_v15, 5  ;;  %v7118_v11 = vsel %vm6857_vm7, %v5276_v1, %v1335_v33  ;;  %v2089_v6 = vshll.u32 %v7088_v49, 16  ;;  %v5384_v63 = vld [vmem:[%s6527_s25 + $0x1c] sm:$0xf]  ;;  %v2093_v17 = vshrl.u32 %v7088_v49, 16 }
  0x73   : > { %6134 = vmatprep.mubr.msk.bf16.mxu0 %vm706_vm3, %v5289_v9  ;;  %v7093_v9 = vsel %vm6857_vm7, %v1358_v7, %v1359_v16  ;;  %v7109_v7 = vsel %vm6857_vm7, %v1365_v30, %v1366_v50  ;;  %v2082_v5 = vrot.slane %v2080_v44, 4  ;;  %v2085_v34 = vrot.slane %v2083_v32, 5  ;;  %v5386_v15 = vld [vmem:[%s6527_s25 + $0x24] sm:$0xf]  ;;  %v7137_v44 = vld [vmem:[%s6527_s25 + $0x28] sm:$0xf] }
  0x74   : > { %v2104_v50 = vshrl.u32 %v5383_v40, 16  ;;  %v1339_v1 = vsel %vm6857_vm7, %v1337_v20, %v1338_v60  ;;  %v5281_v33 = vrot.slane %v1227_v57, 9  ;;  %v7132_v30 = vrot.slane %v2089_v6, 5 }
  0x75   : > { %6097 = vmatmul.mubr.msk.bf16.gmra.mxu1 %vm706_vm3, %v5239_v52  ;;  %v1370_v52 = vrot.slane %v6836_v37, 5  ;;  %v2107_v16 = vshll.u32 %v5383_v40, 16  ;;  %v1373_v23 = vrot.slane %v6841_v61, 5  ;;  %v2095_v4 = vrot.slane %v2093_v17, 4 }
  0x76   : > { %6100 = vmatprep.mubr.msk.bf16.mxu1 %vm706_vm3, %v5240_v8  ;;  %v5385_v8 = vld [vmem:[%s6527_s25 + $0x20] sm:$0x1]  ;;  %v2106_v3 = vrot.slane %v2104_v50, 4  ;;  %v2113_v13 = vshll.u32 %v5384_v63, 16  ;;  %v2099_v20 = vshll.u32 %v7124_v47, 16  ;;  %v2117_v57 = vshrl.u32 %v5384_v63, 16 }
  0x77   : > { %v1372_v32 = vrot.slane %v1370_v52, 4  ;;  %v2109_v60 = vrot.slane %v2107_v16, 5  ;;  %v5292_v61 = vcombine.low %v7080_v18, %v7103_v45  ;;  %v5293_v40 = vcombine.low %v7118_v11, %v1339_v1 }
  0x78   : > { %v2086_v6 = vor.u32 %v2085_v34, %v2082_v5  ;;  %v7148_v17 = vrot.slane %v2113_v13, 5  ;;  %v2096_v28 = vor.u32 %v2095_v4, %v7132_v30  ;;  %v2123_v50 = vshll.u32 %v5385_v8, 16  ;;  %v7175_v5 = vld [vmem:[%s6527_s25 + $0x34] sm:$0xf] }
  0x79   : > { %v2110_v56 = vor.u32 %v2109_v60, %v2106_v3  ;;  %v7160_v18 = vsel %vm6857_vm7, %v5281_v33, %v1370_v52  ;;  %v2128_v13 = vshrl.u32 %v5386_v15, 16  ;;  %v2131_v45 = vshll.u32 %v5386_v15, 16  ;;  %v5389_v52 = vld [vmem:[%s6527_s25 + $0x30] sm:$0xf] }
  0x7a   : > { %6135 = vmatmul.mubr.msk.bf16.gmra.mxu0 %vm706_vm3, %v5290_v41  ;;  %v2119_v41 = vrot.slane %v2117_v57, 4  ;;  %v2137_v11 = vshll.u32 %v7137_v44, 16  ;;  %v9153_v3 = vcombine.low %v6546_v12, %v6550_v14  ;;  %v7169_v4 = vsel %vm6857_vm7, %v1372_v32, %v1373_v23 }
  0x7b   : > { %6138 = vmatprep.mubr.msk.bf16.mxu0 %vm706_vm3, %v5291_v51  ;;  %v9152_v51 = vcombine.low %v6812_v62, %v6819_v55  ;;  %v2101_v62 = vrot.slane %v2099_v20, 5  ;;  %v2141_v63 = vshrl.u32 %v7137_v44, 16  ;;  %v2087_v34 = vrot.slane %v2086_v6, 4 }
  0x7c   : > { %v2120_v55 = vor.u32 %v2119_v41, %v7148_v17  ;;  %v2130_v8 = vrot.slane %v2128_v13, 4  ;;  %v2133_v1 = vrot.slane %v2131_v45, 5  ;;  %v7177_v33 = vrot.slane %v2137_v11, 5  ;;  %v7183_v41 = vld [vmem:[%s6527_s25 + $0x38] sm:$0x1] }
  0x7d   : > { %6101 = vmatmul.mubr.msk.bf16.gmra.mxu1 %vm706_vm3, %v9152_v51  ;;  %v2097_v12 = vrot.slane %v2096_v28, 4  ;;  %v2111_v14 = vrot.slane %v2110_v56, 4  ;;  %v2125_v16 = vrot.slane %v2123_v50, 5  ;;  %v2143_v23 = vrot.slane %v2141_v63, 4  ;;  %v5392_v13 = vld [vmem:[%s6527_s25 + $0x3c] sm:$0xf] }
  0x7e   : > { %6104 = vmatprep.mubr.msk.bf16.mxu1 %vm706_vm3, %v9153_v3  ;;  %v2121_v15 = vrot.slane %v2120_v55, 4  ;;  %v2147_v32 = vshll.u32 %v7152_v21, 16  ;;  %v2152_v20 = vshrl.u32 %v5389_v52, 16  ;;  %v2155_v60 = vshll.u32 %v5389_v52, 16 }
  0x7f   : > { %v2134_v57 = vor.u32 %v2133_v1, %v2130_v8  ;;  %v2144_v6 = vor.u32 %v2143_v23, %v7177_v33  ;;  %v2161_v28 = vshll.u32 %v7175_v5, 16  ;;  %v2165_v56 = vshrl.u32 %v7175_v5, 16  ;;  %v5395_v8 = vld [vmem:[%s6527_s25 + $0x48] sm:$0xf]  ;;  %v7210_v1 = vld [vmem:[%s6527_s25 + $0x4c] sm:$0xf] }
  0x80   : > { %v2154_v50 = vrot.slane %v2152_v20, 4  ;;  %v2157_v51 = vrot.slane %v2155_v60, 5  ;;  %v9154_v3 = vcombine.low %v6588_v53, %v6592_v58  ;;  %v5298_v55 = vcombine.low %v7160_v18, %v7169_v4 }
  0x81   : > { %v7189_v45 = vrot.slane %v2161_v28, 5  ;;  %v2167_v11 = vrot.slane %v2165_v56, 4  ;;  %v2102_v63 = vsel %vm6571_vm4, %v2097_v12, %v2101_v62  ;;  %v2116_v52 = vsel %vm6571_vm4, %v2111_v14, %v7148_v17 }
  0x82   : > { %6139 = vmatmul.mubr.msk.bf16.gmra.mxu0 %vm706_vm3, %v5292_v61  ;;  %v7192_v61 = vld [vmem:[%s6527_s25 + $0x40] sm:$0xf]  ;;  %v9155_v53 = vcombine.low %v6626_v35, %v6637_v46  ;;  %v2126_v58 = vsel %vm6571_vm4, %v2121_v15, %v2125_v16  ;;  %v2135_v23 = vrot.slane %v2134_v57, 4  ;;  %v2158_v20 = vor.u32 %v2157_v51, %v2154_v50  ;;  %v7244_v50 = vld [vmem:[%s6527_s25 + $0x44] sm:$0x1] }
  0x83   : > { %6142 = vmatprep.mubr.msk.bf16.mxu0 %vm706_vm3, %v5293_v40  ;;  %v2092_v40 = vsel %vm6571_vm4, %v2087_v34, %v7132_v30  ;;  %v2145_v30 = vrot.slane %v2144_v6, 4  ;;  %v2149_v34 = vrot.slane %v2147_v32, 5  ;;  %v2171_v62 = vshll.u32 %v7183_v41, 16  ;;  %v5398_v51 = vld [vmem:[%s6527_s25 + $0x54] sm:$0xf] }
  0x84   : > { %v2176_v12 = vshrl.u32 %v5392_v13, 16  ;;  %v2179_v17 = vshll.u32 %v5392_v13, 16  ;;  %v7221_v14 = vsel %vm755_vm0, %v6952_v22, 0  ;;  %v2168_v35 = vor.u32 %v2167_v11, %v7189_v45 }
  0x85   : > { %6105 = vmatmul.mubr.msk.bf16.gmra.mxu1 %vm706_vm3, %v9154_v3  ;;  %v2185_v46 = vshll.u32 %v7192_v61, 16  ;;  %v2189_v16 = vshrl.u32 %v7192_v61, 16  ;;  %v7226_v15 = vcombine.low %v2092_v40, %v2102_v63  ;;  %v7230_v32 = vsel %vm755_vm0, %v6924_v24, 0  ;;  %v7253_v40 = vld [vmem:[%s6527_s25 + $0x58] sm:$0xf] }
  0x86   : > { %6108 = vmatprep.mubr.msk.bf16.mxu1 %vm706_vm3, %v9155_v53  ;;  %v2200_v60 = vshrl.u32 %v5395_v8, 16  ;;  %v2203_v57 = vshll.u32 %v5395_v8, 16  ;;  %v9156_v6 = vcombine.low %v7039_v25, %v7049_v54  ;;  %v7236_v22 = vcombine.low %v2116_v52, %v2126_v58  ;;  %v7258_v8 = vld [vmem:[%s6527_s25 + $0x50] sm:$0x1] }
  0x87   : > { %v2140_v28 = vsel %vm6571_vm4, %v2135_v23, %v7177_v33  ;;  %v2150_v56 = vsel %vm6571_vm4, %v2145_v30, %v2149_v34  ;;  %v2209_v24 = vshll.u32 %v7210_v1, 16  ;;  %v9157_v25 = vcombine.low %v7053_v39, %v7063_v27  ;;  %v5401_v34 = vld [vmem:[%s6527_s25 + $0x60] sm:$0xf] }
  0x88   : > { %v2159_v54 = vrot.slane %v2158_v20, 4  ;;  %v2173_v13 = vrot.slane %v2171_v62, 5  ;;  %v2178_v11 = vrot.slane %v2176_v12, 4  ;;  %v2181_v3 = vrot.slane %v2179_v17, 5 }
  0x89   : > { %v2169_v33 = vrot.slane %v2168_v35, 4  ;;  %v7255_v63 = vrot.slane %v2185_v46, 5  ;;  %v2191_v52 = vrot.slane %v2189_v16, 4  ;;  %v2213_v53 = vshrl.u32 %v7210_v1, 16  ;;  %v7275_v35 = vld [vmem:[%s6527_s25 + $0x5c] sm:$0x1] }
  0x8a   : > { %6143 = vmatmul.mubr.msk.bf16.gmra.mxu0 %vm706_vm3, %v9156_v6  ;;  %v9158_v39 = vcombine.low %v6676_v36, %v6683_v43  ;;  %v2202_v27 = vrot.slane %v2200_v60, 4  ;;  %v2205_v58 = vrot.slane %v2203_v57, 5  ;;  %v2224_v23 = vshrl.u32 %v5398_v51, 16 }
  0x8b   : > { %6146 = vmatprep.mubr.msk.bf16.mxu0 %vm706_vm3, %v9157_v25  ;;  %v2227_v30 = vshll.u32 %v5398_v51, 16  ;;  %v9159_v20 = vcombine.low %v9142_v2, %v9141_v10  ;;  %v7270_v62 = vcombine.low %v2140_v28, %v2150_v56  ;;  %v7272_v12 = vrot.slane %v2209_v24, 5  ;;  %v7288_v28 = vld [vmem:[%s6527_s25 + $0x64] sm:$0xf] }
  0x8c   : > { %v2215_v17 = vrot.slane %v2213_v53, 4  ;;  %v2233_v36 = vshll.u32 %v7253_v40, 16  ;;  %v2195_v43 = vshll.u32 %v7244_v50, 16  ;;  %v2226_v46 = vrot.slane %v2224_v23, 4 }
  0x8d   : > { %6109 = vmatmul.mubr.msk.bf16.gmra.mxu1 %vm706_vm3, %v9158_v39  ;;  %v2229_v16 = vrot.slane %v2227_v30, 5  ;;  %v2237_v60 = vshrl.u32 %v7253_v40, 16  ;;  %v2164_v10 = vsel %vm6571_vm4, %v2159_v54, %v7189_v45  ;;  %v2174_v2 = vsel %vm6571_vm4, %v2169_v33, %v2173_v13  ;;  %v7310_v30 = vld [vmem:[%s6527_s25 + $0x68] sm:$0x1] }
  0x8e   : > { %6112 = vmatprep.mubr.msk.bf16.mxu1 %vm706_vm3, %v9159_v20  ;;  %v2182_v57 = vor.u32 %v2181_v3, %v2178_v11  ;;  %v7285_v6 = vrot.slane %v2233_v36, 5  ;;  %v2192_v56 = vor.u32 %v2191_v52, %v7255_v63  ;;  %v2206_v24 = vor.u32 %v2205_v58, %v2202_v27  ;;  %v5404_v3 = vld [vmem:[%s6527_s25 + $0x6c] sm:$0xf]  ;;  %v7307_v27 = vld [vmem:[%s6527_s25 + $0x70] sm:$0xf] }
  0x8f   : > { %v2219_v51 = vshll.u32 %v7258_v8, 16  ;;  %v2239_v25 = vrot.slane %v2237_v60, 4  ;;  %v9160_v53 = vcombine.low %v7073_v19, %v7093_v9  ;;  %v2216_v45 = vor.u32 %v2215_v17, %v7272_v12 }
  0x90   : > { %v2230_v54 = vor.u32 %v2229_v16, %v2226_v46  ;;  %v2248_v13 = vshrl.u32 %v5401_v34, 16  ;;  %v2251_v11 = vshll.u32 %v5401_v34, 16  ;;  %v9161_v33 = vcombine.low %v7085_v59, %v7109_v7  ;;  %v5407_v16 = vld [vmem:[%s6527_s25 + $0x78] sm:$0xf] }
  0x91   : > { %v2240_v52 = vor.u32 %v2239_v25, %v7285_v6  ;;  %v2243_v39 = vshll.u32 %v7275_v35, 16  ;;  %v2257_v19 = vshll.u32 %v7288_v28, 16  ;;  %v2261_v9 = vshrl.u32 %v7288_v28, 16 }
  0x92   : > { %6147 = vmatmul.mubr.msk.bf16.gmra.mxu0 %vm706_vm3, %v9160_v53  ;;  %v2183_v58 = vrot.slane %v2182_v57, 4  ;;  %v2197_v23 = vrot.slane %v2195_v43, 5  ;;  %v2250_v34 = vrot.slane %v2248_v13, 4  ;;  %v2253_v20 = vrot.slane %v2251_v11, 5 }
  0x93   : > { %6150 = vmatprep.mubr.msk.bf16.mxu0 %vm706_vm3, %v9161_v33  ;;  %v9162_v59 = vcombine.low %v9145_v26, %v9144_v38  ;;  %v7316_v7 = vcombine.low %v2164_v10, %v2174_v2  ;;  %v2193_v17 = vrot.slane %v2192_v56, 4  ;;  %v2207_v36 = vrot.slane %v2206_v24, 4  ;;  %v7326_v2 = vld [vmem:[%s6527_s25 + $0x7c] sm:$0xf] }
  0x94   : > { %v7318_v46 = vrot.slane %v2257_v19, 5  ;;  %v9163_v43 = vcombine.low %v9148_v42, %v9147_v48  ;;  %v2217_v60 = vrot.slane %v2216_v45, 4  ;;  %v2221_v57 = vrot.slane %v2219_v51, 5  ;;  %9164 = vst [vmem:[#allocation3_spill] sm:$0xff] %v7326_v2  ;;  %v5410_v19 = vld [vmem:[%s6527_s25 + $0x84] sm:$0xf] }
  0x95   : > { %6113 = vmatmul.mubr.msk.bf16.gmra.mxu1 %vm706_vm3, %v9162_v59  ;;  %v2231_v25 = vrot.slane %v2230_v54, 4  ;;  %v2263_v38 = vrot.slane %v2261_v9, 4  ;;  %v2241_v26 = vrot.slane %v2240_v52, 4  ;;  %v2245_v53 = vrot.slane %v2243_v39, 5 }
  0x96   : > { %6116 = vmatprep.mubr.msk.bf16.mxu1 %vm706_vm3, %v9163_v43  ;;  %v2254_v13 = vor.u32 %v2253_v20, %v2250_v34  ;;  %v2272_v10 = vshrl.u32 %v5404_v3, 16  ;;  %v2188_v56 = vsel %vm6571_vm4, %v2183_v58, %v7255_v63  ;;  %v2275_v24 = vshll.u32 %v5404_v3, 16  ;;  %v6411_v63 = vld [vmem:[%s6527_s25 + $0xc] sm:$0xff]   ;;  %v7360_v34 = vld [vmem:[%s6527_s25 + $0x88] sm:$0xf] }
  0x97   : > { %v2281_v48 = vshll.u32 %v7307_v27, 16  ;;  %v2285_v42 = vshrl.u32 %v7307_v27, 16  ;;  %v2198_v51 = vsel %vm6571_vm4, %v2193_v17, %v2197_v23  ;;  %v2212_v45 = vsel %vm6571_vm4, %v2207_v36, %v7272_v12  ;;  %9165 = vst [vmem:[#allocation5_spill] sm:$0xff] %v7360_v34  ;;  %v7369_v36 = vld [vmem:[%s6527_s25 + $0x74] sm:$0x1] }
  0x98   : > { %v2264_v54 = vor.u32 %v2263_v38, %v7318_v46  ;;  %v2267_v11 = vshll.u32 %v7310_v30, 16  ;;  %v2222_v3 = vsel %vm6571_vm4, %v2217_v60, %v2221_v57  ;;  %v2236_v33 = vsel %vm6571_vm4, %v2231_v25, %v7285_v6  ;;  %9167 = vst [vmem:[#allocation4_spill] sm:$0xff] %v7369_v36  ;;  %v7379_v38 = vld [vmem:[%s6527_s25 + $0x80] sm:$0x1] }
  0x99   : > { %v2296_v52 = vshrl.u32 %v5407_v16, 16  ;;  %v2299_v12 = vshll.u32 %v5407_v16, 16  ;;  %v2246_v18 = vsel %vm6571_vm4, %v2241_v26, %v2245_v53  ;;  %v2255_v4 = vrot.slane %v2254_v13, 4  ;;  %9168 = vst [vmem:[#allocation6_spill] sm:$0xff] %v7379_v38  ;;  %v7382_v26 = vld [vmem:[%s6527_s25 + $0x8c] sm:$0x1] }
  0x9a   : > { %6151 = vmatmul.mubr.msk.bf16.gmra.mxu0 %vm706_vm3, %v5298_v55  ;;  %v2274_v55 = vrot.slane %v2272_v10, 4  ;;  %v2305_v39 = vshll.u32 %v7326_v2, 16  ;;  %v2277_v9 = vrot.slane %v2275_v24, 5  ;;  %v7356_v58 = vrot.slane %v2281_v48, 5  ;;  %9169 = vst [vmem:[#allocation8_spill] sm:$0xff] %v7382_v26  ;;  %v6412_v10 = vld [vmem:[%s6527_s25 + $0x18] sm:$0xff]  }
  0x9b   : > { %6190 = vmatprep.mubr.msk.bf16.mxu0 %vm706_vm3, %v7226_v15  ;;  %v2287_v23 = vrot.slane %v2285_v42, 4  ;;  %v2309_v6 = vshrl.u32 %v7326_v2, 16  ;;  %v9166_v15 = vcombine.low %v9150_v29, %v6836_v37  ;;  %v7366_v20 = vcombine.low %v2188_v56, %v2198_v51  ;;  %v5413_v51 = vld [vmem:[%s6527_s25 + $0x90] sm:$0xf] }
  0x9c   : > { %v2265_v59 = vrot.slane %v2264_v54, 4  ;;  %v2269_v17 = vrot.slane %v2267_v11, 5  ;;  %v2298_v16 = vrot.slane %v2296_v52, 4  ;;  %v2301_v43 = vrot.slane %v2299_v12, 5 }
  0x9d   : > { %6117 = vmatmul.mubr.msk.bf16.gmra.mxu1 %vm706_vm3, %v9166_v15  ;;  %v7372_v60 = vrot.slane %v2305_v39, 5  ;;  %v2311_v57 = vrot.slane %v2309_v6, 4  ;;  %v2320_v25 = vshrl.u32 %v5410_v19, 16  ;;  %v7374_v37 = vcombine.low %v2212_v45, %v2222_v3  ;;  %v7393_v45 = vld [vmem:[%s6527_s25 + $0x94] sm:$0xf] }
  0x9e   : > { %6156 = vmatprep.mubr.msk.bf16.mxu1 %vm706_vm3, %v6411_v63  ;;  %v7376_v29 = vcombine.low %v2236_v33, %v2246_v18  ;;  %v2323_v53 = vshll.u32 %v5410_v19, 16  ;;  %v2329_v13 = vshll.u32 %v7360_v34, 16  ;;  %v2260_v56 = vsel %vm6571_vm4, %v2255_v4, %v7318_v46  ;;  %9170 = vst [vmem:[#allocation7_spill] sm:$0xff] %v7393_v45  ;;  %v7401_v33 = vld [vmem:[%s9084_s1 + $0x10] sm:$0x3]  ;;  %v6413_v46 = vld [vmem:[%s6527_s25 + $0x24] sm:$0xff]  }
  0x9f   : > { %v2278_v24 = vor.u32 %v2277_v9, %v2274_v55  ;;  %v2288_v48 = vor.u32 %v2287_v23, %v7356_v58  ;;  %v2291_v42 = vshll.u32 %v7369_v36, 16  ;;  %v2322_v54 = vrot.slane %v2320_v25, 4  ;;  %9171 = vst [vmem:[#allocation9_spill] sm:$0xff] %v7401_v33 }
  0xa0   : > { %v2325_v11 = vrot.slane %v2323_v53, 5  ;;  %v7395_v63 = vrot.slane %v2329_v13, 5  ;;  %v2333_v3 = vshrl.u32 %v7360_v34, 16  ;;  %v2270_v52 = vsel %vm6571_vm4, %v2265_v59, %v2269_v17 }
  0xa1   : > { %v2302_v12 = vor.u32 %v2301_v43, %v2298_v16  ;;  %v2312_v18 = vor.u32 %v2311_v57, %v7372_v60  ;;  %v2315_v4 = vshll.u32 %v7379_v38, 16  ;;  %v2344_v19 = vshrl.u32 %v5413_v51, 16  ;;  %v7435_v57 = vld [vmem:[%s6527_s25 + $0xa0] sm:$0xf] }
  0xa2   : > { %6191 = vmatmul.mubr.msk.bf16.vlgmr.msra.gmra.mxu0 %vm706_vm3, %v7236_v22  ;;  %v2326_v55 = vor.u32 %v2325_v11, %v2322_v54  ;;  %v2335_v39 = vrot.slane %v2333_v3, 4  ;;  %v2347_v9 = vshll.u32 %v5413_v51, 16  ;;  %v5416_v22 = vld [vmem:[%s6527_s25 + $0x9c] sm:$0xf]  ;;  %v7414_v23 = vrot.slane %v2278_v24, 4  ;;  %9173 = vst [vmem:[#allocation10_spill] sm:$0xff] %v7435_v57 }
  0xa3   : > { %6257 = vmatpush3.bf16.msra.mxu0 %v7230_v32  ;;  %6194 = vmatprep.mubr.msk.bf16.mxu0 %vm706_vm3, %v7270_v62  ;;  %v7416_v6 = vrot.slane %v2291_v42, 5  ;;  %v2339_v15 = vshll.u32 %v7382_v26, 16  ;;  %v2353_v59 = vshll.u32 %v7393_v45, 16  ;;  %v7423_v32 = vld [vmem:[%s9084_s1 + $0xe] sm:$0x3]  ;;  %v7428_v62 = vcombine.low %v2260_v56, %v2270_v52 }
  0xa4   : > { %9172 = vst [vmem:[#allocation11_spill] sm:$0xff] %v7423_v32  ;;  %6369 = vmatprep.subr.msk.bf16.mxu0 %vm755_vm0, %v7401_v33  ;;  %v7430_v17 = vrot.slane %v2288_v48, 4  ;;  %v2336_v16 = vor.u32 %v2335_v39, %v7395_v63  ;;  %v2357_v43 = vshrl.u32 %v7393_v45, 16  ;;  %v7439_v25 = vrot.slane %v2302_v12, 4  ;;  %v7448_v56 = vld [vmem:[%s6527_s25 + $0x98] sm:$0x1] }
  0xa5   : > { %6157 = vmatmul.mubr.msk.bf16.vlgmr.msra.gmra.mxu1 %vm706_vm3, %v6412_v10  ;;  %v7441_v53 = vrot.slane %v2312_v18, 4  ;;  %v7443_v13 = vrot.slane %v2315_v4, 5  ;;  %v7445_v10 = vrot.slane %v2326_v55, 4  ;;  %9174 = vst [vmem:[#allocation12_spill] sm:$0xff] %v7448_v56  ;;  %v2346_v24 = vrot.slane %v2344_v19, 4  ;;  %v6415_v19 = vld [vmem:[%s6527_s25 + $0x3c] sm:$0xff]  }
  0xa6   : > { %6223 = vmatpush3.bf16.msra.mxu1 %v7221_v14  ;;  %6160 = vmatprep.mubr.msk.bf16.mxu1 %vm706_vm3, %v6413_v46  ;;  %v2349_v48 = vrot.slane %v2347_v9, 5  ;;  %v2368_v42 = vshrl.u32 %v5416_v22, 16  ;;  %v2371_v51 = vshll.u32 %v5416_v22, 16  ;;  %v6414_v14 = vld [vmem:[%s6527_s25 + $0x30] sm:$0xff]   ;;  %v7457_v11 = vrot.slane %v2339_v15, 5 }
  0xa7   : > { %6368 = vmatprep.subr.msk.bf16.mxu1 %vm755_vm0, %v7423_v32  ;;  %v7459_v3 = vrot.slane %v2353_v59, 5  ;;  %v2377_v46 = vshll.u32 %v7435_v57, 16  ;;  %v5419_v52 = vld [vmem:[%s6527_s25 + $0xa8] sm:$0xf]  ;;  %v7463_v12 = vrot.slane %v2336_v16, 4  ;;  %v2359_v18 = vrot.slane %v2357_v43, 4 }
  0xa8   : > { %v2363_v4 = vshll.u32 %v7448_v56, 16  ;;  %v2381_v55 = vshrl.u32 %v7435_v57, 16  ;;  %v7468_v39 = vld [vmem:[%s6527_s25 + $0xac] sm:$0xf]  ;;  %v2350_v59 = vor.u32 %v2349_v48, %v2346_v24  ;;  %v7492_v16 = vld [vmem:[%s6527_s25 + $0xa4] sm:$0x1] }
  0xa9   : > { %9175 = vst [vmem:[#allocation13_spill] sm:$0xff] %v7468_v39  ;;  %9176 = vst [vmem:[#allocation2_spill] sm:$0xff] %v7492_v16  ;;  %v2370_v43 = vrot.slane %v2368_v42, 4  ;;  %v2373_v22 = vrot.slane %v2371_v51, 5  ;;  %v2392_v54 = vshrl.u32 %v5419_v52, 16  ;;  %v7494_v9 = vrot.slane %v2377_v46, 5 }
  0xaa   : > { %6195 = vmatmul.mubr.msk.bf16.gmra.mxu0 %vm706_vm3, %v7316_v7  ;;  %v2383_v32 = vrot.slane %v2381_v55, 4  ;;  %v2395_v15 = vshll.u32 %v5419_v52, 16  ;;  %v2401_v33 = vshll.u32 %v7468_v39, 16  ;;  %v5422_v57 = vld [vmem:[%s6527_s25 + $0xb4] sm:$0xf]  ;;  %v2360_v24 = vor.u32 %v2359_v18, %v7459_v3 }
  0xab   : > { %6198 = vmatprep.mubr.msk.bf16.mxu0 %vm706_vm3, %v7366_v20  ;;  %v2342_v20 = vsel %vm6571_vm4, %v7463_v12, %v7457_v11  ;;  %v7504_v48 = vrot.slane %v2363_v4, 5  ;;  %v7507_v42 = vld [vmem:[%s6527_s25 + $0xb0] sm:$0x1]  ;;  %v2394_v51 = vrot.slane %v2392_v54, 4  ;;  %v7510_v46 = vld [vmem:[%s6527_s25 + $0xb8] sm:$0xf]  ;;  %v2374_v18 = vor.u32 %v2373_v22, %v2370_v43 }
  0xac   : > { %9177 = vst [vmem:[#allocation14_spill] sm:$0xff] %v7507_v42  ;;  %9178 = vst [vmem:[#allocation15_spill] sm:$0xff] %v7510_v46  ;;  %v2397_v52 = vrot.slane %v2395_v15, 5  ;;  %v7514_v55 = vrot.slane %v2401_v33, 5  ;;  %v2405_v11 = vshrl.u32 %v7468_v39, 16  ;;  %v7517_v12 = vrot.slane %v2350_v59, 4 }
  0xad   : > { %6161 = vmatmul.mubr.msk.bf16.gmra.mxu1 %vm706_vm3, %v6414_v14  ;;  %v2387_v14 = vshll.u32 %v7492_v16, 16  ;;  %v7520_v4 = vld [vmem:[%s6527_s25 + $0xbc] sm:$0x1]  ;;  %v2416_v54 = vshrl.u32 %v5422_v57, 16  ;;  %v2419_v7 = vshll.u32 %v5422_v57, 16  ;;  %v2384_v56 = vor.u32 %v2383_v32, %v7494_v9  ;;  %v6416_v16 = vld [vmem:[%s6527_s25 + $0x48] sm:$0xff]  }
  0xae   : > { %6164 = vmatprep.mubr.msk.bf16.mxu1 %vm706_vm3, %v6415_v19  ;;  %v2407_v45 = vrot.slane %v2405_v11, 4  ;;  %v2411_v19 = vshll.u32 %v7507_v42, 16  ;;  %v2425_v15 = vshll.u32 %v7510_v46, 16  ;;  %v5425_v33 = vld [vmem:[%s6527_s25 + $0xc0] sm:$0xf]  ;;  %v2398_v26 = vor.u32 %v2397_v52, %v2394_v51  ;;  %v6417_v57 = vld [vmem:[%s6527_s25 + $0x54] sm:$0xff]  }
  0xaf   : > { %v2418_v39 = vrot.slane %v2416_v54, 4  ;;  %v2421_v34 = vrot.slane %v2419_v7, 5  ;;  %v2429_v59 = vshrl.u32 %v7510_v46, 16  ;;  %v7529_v22 = vld [vmem:[%s6527_s25 + $0xc4] sm:$0xf]  ;;  %v2361_v43 = vrot.slane %v2360_v24, 4 }
  0xb0   : > { %v2389_v32 = vrot.slane %v2387_v14, 5  ;;  %v2408_v11 = vor.u32 %v2407_v45, %v7514_v55  ;;  %v2427_v42 = vrot.slane %v2425_v15, 5  ;;  %v2435_v7 = vshll.u32 %v7520_v4, 16  ;;  %v7541_v45 = vld [vmem:[%s6527_s25 + $0xc8] sm:$0x1] }
  0xb1   : > { %v2422_v51 = vor.u32 %v2421_v34, %v2418_v39  ;;  %v2431_v52 = vrot.slane %v2429_v59, 4  ;;  %v2440_v54 = vshrl.u32 %v5425_v33, 16  ;;  %v2375_v46 = vrot.slane %v2374_v18, 4 }
  0xb2   : > { %6199 = vmatmul.mubr.msk.bf16.gmra.mxu0 %vm706_vm3, %v7374_v37  ;;  %v2385_v38 = vrot.slane %v2384_v56, 4  ;;  %v2443_v2 = vshll.u32 %v5425_v33, 16  ;;  %v2449_v37 = vshll.u32 %v7529_v22, 16  ;;  %v2399_v24 = vrot.slane %v2398_v26, 4 }
  0xb3   : > { %6202 = vmatprep.mubr.msk.bf16.mxu0 %vm706_vm3, %v7376_v29  ;;  %v2413_v14 = vrot.slane %v2411_v19, 5  ;;  %v2432_v36 = vor.u32 %v2431_v52, %v2427_v42  ;;  %v2442_v15 = vrot.slane %v2440_v54, 4  ;;  %v2409_v34 = vrot.slane %v2408_v11, 4 }
  0xb4   : > { %v2445_v29 = vrot.slane %v2443_v2, 5  ;;  %v7544_v39 = vrot.slane %v2449_v37, 5  ;;  %v2453_v56 = vshrl.u32 %v7529_v22, 16  ;;  %v9179_v26 = vsel %vm6571_vm4, %v7430_v17, %v7416_v6 }
  0xb5   : > { %6165 = vmatmul.mubr.msk.bf16.gmra.mxu1 %vm706_vm3, %v6416_v16  ;;  %v9180_v16 = vsel %vm6571_vm4, %v7414_v23, %v7356_v58  ;;  %v2423_v19 = vrot.slane %v2422_v51, 4  ;;  %v2433_v33 = vrot.slane %v2432_v36, 4  ;;  %v2437_v2 = vrot.slane %v2435_v7, 5  ;;  %v6418_v23 = vld [vmem:[%s6527_s25 + $0x60] sm:$0xff]  }
  0xb6   : > { %6168 = vmatprep.mubr.msk.bf16.mxu1 %vm706_vm3, %v6417_v57  ;;  %v5437_v18 = vcombine.low %v9180_v16, %v9179_v26  ;;  %v9181_v59 = vsel %vm6571_vm4, %v7441_v53, %v7443_v13  ;;  %v9182_v6 = vsel %vm6571_vm4, %v7439_v25, %v7372_v60  ;;  %v2446_v57 = vor.u32 %v2445_v29, %v2442_v15  ;;  %v5463_v13 = vld [vmem:[%s6527_s25 + $0x24] sm:$0xe]  ;;  %v5466_v26 = vld [vmem:[%s6527_s25 + $0x48] sm:$0xe] }
  0xb7   : > { %v5438_v17 = vcombine.low %v9182_v6, %v9181_v59  ;;  %v2455_v11 = vrot.slane %v2453_v56, 4  ;;  %v2459_v58 = vshll.u32 %v7541_v45, 16  ;;  %v9183_v36 = vsel %vm6571_vm4, %v7445_v10, %v7395_v63  ;;  %v6419_v63 = vld [vmem:[%s6527_s25 + $0x6c] sm:$0xff]   ;;  %v5467_v6 = vld [vmem:[%s6527_s25 + $0x54] sm:$0xe] }
  0xb8   : > { %v5439_v51 = vcombine.low %v9183_v36, %v2342_v20  ;;  %v2356_v53 = vsel %vm6571_vm4, %v7517_v12, %v7459_v3  ;;  %v2366_v60 = vsel %vm6571_vm4, %v2361_v43, %v7504_v48  ;;  %v2380_v25 = vsel %vm6571_vm4, %v2375_v46, %v7494_v9  ;;  %v7597_v12 = vld [vmem:[%s6527_s25 + $0xc] sm:$0xe] }
  0xb9   : > { %v2390_v10 = vsel %vm6571_vm4, %v2385_v38, %v2389_v32  ;;  %v2404_v3 = vsel %vm6571_vm4, %v2399_v24, %v7514_v55  ;;  %v2414_v20 = vsel %vm6571_vm4, %v2409_v34, %v2413_v14  ;;  %v2456_v48 = vor.u32 %v2455_v11, %v7544_v39  ;;  %v5464_v55 = vld [vmem:[%s6527_s25 + $0x30] sm:$0xe]  ;;  %v5465_v14 = vld [vmem:[%s6527_s25 + $0x3c] sm:$0xe] }
  0xba   : > { %6203 = vmatmul.mubr.msk.bf16.gmra.mxu0 %vm706_vm3, %v7428_v62  ;;  %v2428_v62 = vsel %vm6571_vm4, %v2423_v19, %v2427_v42  ;;  %v2438_v38 = vsel %vm6571_vm4, %v2433_v33, %v2437_v2  ;;  %v7604_v9 = vrot.slane %v2446_v57, 4  ;;  %v2823_v46 = vrot.slane %v7088_v49, 5  ;;  %v6420_v57 = vld [vmem:[%s6527_s25 + $0x78] sm:$0xff]  }
  0xbb   : > { %6206 = vmatprep.mubr.msk.bf16.mxu0 %vm706_vm3, %v5437_v18  ;;  %v7608_v43 = vcombine.low %v2356_v53, %v2366_v60  ;;  %v7610_v32 = vrot.slane %v2456_v48, 4  ;;  %v7612_v52 = vrot.slane %v2459_v58, 5  ;;  %v5479_v7 = vrot.slane %v5463_v13, 9  ;;  %v6421_v53 = vld [vmem:[%s6527_s25 + $0x84] sm:$0xff]   ;;  %v5468_v13 = vld [vmem:[%s6527_s25 + $0x60] sm:$0xe] }
  0xbc   : > { %v7615_v54 = vcombine.low %v2380_v25, %v2390_v10  ;;  %v7617_v42 = vcombine.low %v2404_v3, %v2414_v20  ;;  %v5477_v37 = vrot.slane %v7597_v12, 9  ;;  %v2837_v24 = vrot.slane %v7137_v44, 5  ;;  %v6427_v49 = vld [vmem:[%s6527_s25 + $0x18] sm:$0xff]  }
  0xbd   : > { %6169 = vmatmul.mubr.msk.bf16.gmra.mxu1 %vm706_vm3, %v6418_v23  ;;  %v7623_v15 = vcombine.low %v2428_v62, %v2438_v38  ;;  %v2826_v34 = vrot.slane %v7124_v47, 5  ;;  %v2840_v29 = vrot.slane %v7152_v21, 5  ;;  %v5480_v56 = vrot.slane %v5464_v55, 9  ;;  %v5470_v55 = vld [vmem:[%s6527_s25 + $0x78] sm:$0xe] }
  0xbe   : > { %6172 = vmatprep.mubr.msk.bf16.mxu1 %vm706_vm3, %v6419_v63  ;;  %v2452_v16 = vsel %vm6571_vm4, %v7604_v9, %v7544_v39  ;;  %v7634_v44 = vrot.slane %v2823_v46, 4  ;;  %v7638_v18 = vsel %vm6857_vm7, %v5479_v7, %v2837_v24  ;;  %v2839_v19 = vrot.slane %v2837_v24, 4 }
  0xbf   : > { %v2462_v21 = vsel %vm6571_vm4, %v7610_v32, %v7612_v52  ;;  %v2844_v33 = vrot.slane %v7175_v5, 5  ;;  %v2847_v2 = vrot.slane %v7183_v41, 5  ;;  %v5481_v59 = vrot.slane %v5465_v14, 9  ;;  %v6426_v52 = vld [vmem:[%s6527_s25 + $0xc0] sm:$0xff]  }
  0xc0   : > { %v7650_v11 = vsel %vm6857_vm7, %v2839_v19, %v2840_v29  ;;  %v2851_v58 = vrot.slane %v7192_v61, 5  ;;  %v2854_v23 = vrot.slane %v7244_v50, 5  ;;  %v5482_v36 = vrot.slane %v5466_v26, 9  ;;  %v5471_v19 = vld [vmem:[%s6527_s25 + $0x84] sm:$0xe] }
  0xc1   : > { %v5496_v5 = vcombine.low %v7638_v18, %v7650_v11  ;;  %v7660_v41 = vsel %vm6857_vm7, %v5480_v56, %v2844_v33  ;;  %v2846_v60 = vrot.slane %v2844_v33, 4  ;;  %v2858_v25 = vrot.slane %v7210_v1, 5 }
  0xc2   : > { %6207 = vmatmul.mubr.msk.bf16.gmra.mxu0 %vm706_vm3, %v5438_v17  ;;  %v7667_v61 = vsel %vm6857_vm7, %v5481_v59, %v2851_v58  ;;  %v2853_v50 = vrot.slane %v2851_v58, 4  ;;  %v2861_v17 = vrot.slane %v7258_v8, 5  ;;  %v5483_v63 = vrot.slane %v5467_v6, 9  ;;  %v9184_v59 = vld [vmem:[#allocation4_spill] sm:$0xff] }
  0xc3   : > { %6210 = vmatprep.mubr.msk.bf16.mxu0 %vm706_vm3, %v5439_v51  ;;  %v7672_v10 = vsel %vm6857_vm7, %v2846_v60, %v2847_v2  ;;  %v7676_v3 = vsel %vm6857_vm7, %v5482_v36, %v2858_v25  ;;  %v2860_v1 = vrot.slane %v2858_v25, 4  ;;  %v2865_v20 = vrot.slane %v7253_v40, 5  ;;  %v5469_v51 = vld [vmem:[%s6527_s25 + $0x6c] sm:$0xe]  ;;  %v6422_v58 = vld [vmem:[%s6527_s25 + $0x90] sm:$0xff]  }
  0xc4   : > { %v5497_v48 = vcombine.low %v7660_v41, %v7672_v10  ;;  %v7685_v8 = vsel %vm6857_vm7, %v2853_v50, %v2854_v23  ;;  %v2868_v62 = vrot.slane %v7275_v35, 5  ;;  %v5484_v38 = vrot.slane %v5468_v13, 9  ;;  %v9185_v36 = vld [vmem:[#allocation3_spill] sm:$0xff]  ;;  %v5472_v60 = vld [vmem:[%s6527_s25 + $0x90] sm:$0xe]  ;;  %v9186_v50 = vld [vmem:[#allocation6_spill] sm:$0xff] }
  0xc5   : > { %6173 = vmatmul.mubr.msk.bf16.gmra.mxu1 %vm706_vm3, %v6420_v57  ;;  %v5498_v40 = vcombine.low %v7667_v61, %v7685_v8  ;;  %v7694_v7 = vsel %vm6857_vm7, %v2860_v1, %v2861_v17  ;;  %v7698_v24 = vsel %vm6857_vm7, %v5483_v63, %v2865_v20  ;;  %v2867_v14 = vrot.slane %v2865_v20, 4 }
  0xc6   : > { %6176 = vmatprep.mubr.msk.bf16.mxu1 %vm706_vm3, %v6421_v53  ;;  %v5499_v35 = vcombine.low %v7676_v3, %v7694_v7  ;;  %v2872_v29 = vrot.slane %v7288_v28, 5  ;;  %v2875_v56 = vrot.slane %v7310_v30, 5  ;;  %v5485_v26 = vrot.slane %v5469_v51, 9  ;;  %v9187_v51 = vld [vmem:[#allocation5_spill] sm:$0xff]  ;;  %v5603_v3 = vld [vmem:[%s6527_s25 + $0x48] sm:$0xf] }
  0xc7   : > { %v7707_v33 = vsel %vm6857_vm7, %v2867_v14, %v2868_v62  ;;  %v2879_v2 = vrot.slane %v7307_v27, 5  ;;  %v2882_v6 = vrot.slane %v9184_v59, 5  ;;  %v5486_v57 = vrot.slane %v5470_v55, 9  ;;  %v6423_v27 = vld [vmem:[%s6527_s25 + $0x9c] sm:$0xff]   ;;  %v9195_v55 = vld [vmem:[#allocation15_spill] sm:$0xff] }
  0xc8   : > { %v5500_v23 = vcombine.low %v7698_v24, %v7707_v33  ;;  %v7716_v28 = vsel %vm6857_vm7, %v5484_v38, %v2872_v29  ;;  %v2874_v30 = vrot.slane %v2872_v29, 4  ;;  %v2886_v53 = vrot.slane %v9185_v36, 5  ;;  %v5473_v38 = vld [vmem:[%s6527_s25 + $0x9c] sm:$0xe]  ;;  %v9190_v36 = vld [vmem:[#allocation12_spill] sm:$0xff] }
  0xc9   : > { %v7725_v25 = vsel %vm6857_vm7, %v5485_v26, %v2879_v2  ;;  %v2881_v13 = vrot.slane %v2879_v2, 4  ;;  %v2889_v17 = vrot.slane %v9186_v50, 5  ;;  %v5487_v63 = vrot.slane %v5471_v19, 9  ;;  %v5474_v26 = vld [vmem:[%s6527_s25 + $0xa8] sm:$0xe] }
  0xca   : > { %6211 = vmatmul.mubr.msk.bf16.gmra.mxu0 %vm706_vm3, %v7608_v43  ;;  %v7732_v1 = vsel %vm6857_vm7, %v2874_v30, %v2875_v56  ;;  %v7736_v43 = vsel %vm6857_vm7, %v5486_v57, %v2886_v53  ;;  %v2888_v20 = vrot.slane %v2886_v53, 4  ;;  %v2893_v62 = vrot.slane %v9187_v51, 5  ;;  %v5476_v57 = vld [vmem:[%s6527_s25 + $0xc0] sm:$0xe]  ;;  %v6424_v19 = vld [vmem:[%s6527_s25 + $0xa8] sm:$0xff]  }
  0xcb   : > { %6214 = vmatprep.mubr.msk.bf16.mxu0 %vm706_vm3, %v7615_v54  ;;  %v7744_v14 = vsel %vm6857_vm7, %v2881_v13, %v2882_v6  ;;  %v9188_v54 = vld [vmem:[#allocation8_spill] sm:$0xff]  ;;  %v5488_v56 = vrot.slane %v5472_v60, 9  ;;  %v2903_v53 = vrot.slane %v9190_v36, 5  ;;  %v5489_v60 = vrot.slane %v5473_v38, 9  ;;  %v9193_v38 = vld [vmem:[#allocation13_spill] sm:$0xff] }
  0xcc   : > { %v2896_v29 = vrot.slane %v9188_v54, 5  ;;  %v7753_v2 = vsel %vm6857_vm7, %v2888_v20, %v2889_v17  ;;  %v7757_v59 = vsel %vm6857_vm7, %v5487_v63, %v2893_v62  ;;  %v2895_v6 = vrot.slane %v2893_v62, 4  ;;  %v5475_v13 = vld [vmem:[%s6527_s25 + $0xb4] sm:$0xe]  ;;  %v9191_v17 = vld [vmem:[#allocation10_spill] sm:$0xff] }
  0xcd   : > { %6177 = vmatmul.mubr.msk.bf16.gmra.mxu1 %vm706_vm3, %v6422_v58  ;;  %v9189_v58 = vld [vmem:[#allocation7_spill] sm:$0xff]  ;;  %v2907_v63 = vrot.slane %v9191_v17, 5  ;;  %v9192_v20 = vld [vmem:[#allocation2_spill] sm:$0xff]  ;;  %v5490_v62 = vrot.slane %v5474_v26, 9  ;;  %v2914_v36 = vrot.slane %v9193_v38, 5  ;;  %v5491_v26 = vrot.slane %v5475_v13, 9 }
  0xce   : > { %6180 = vmatprep.mubr.msk.bf16.mxu1 %vm706_vm3, %v6423_v27  ;;  %v2900_v30 = vrot.slane %v9189_v58, 5  ;;  %v7767_v50 = vsel %vm6857_vm7, %v2895_v6, %v2896_v29  ;;  %v2910_v51 = vrot.slane %v9192_v20, 5  ;;  %v9194_v17 = vld [vmem:[#allocation14_spill] sm:$0xff]  ;;  %v6425_v27 = vld [vmem:[%s6527_s25 + $0xb4] sm:$0xff]   ;;  %v2827_v39 = vsel %vm6857_vm7, %v7634_v44, %v2826_v34  ;;  %v7984_v7 = vld [vmem:[%s6527_s25 + $0x4c] sm:$0xf] }
  0xcf   : > { %v7782_v29 = vsel %vm6857_vm7, %v5489_v60, %v2907_v63  ;;  %v2909_v6 = vrot.slane %v2907_v63, 4  ;;  %v2917_v20 = vrot.slane %v9194_v17, 5  ;;  %v2916_v38 = vrot.slane %v2914_v36, 4  ;;  %v6444_v44 = vld [vmem:[%s6527_s25 + $0x20] sm:$0x1] }
  0xd0   : > { %v7775_v54 = vsel %vm6857_vm7, %v5488_v56, %v2900_v30  ;;  %v2902_v58 = vrot.slane %v2900_v30, 4  ;;  %v7794_v30 = vsel %vm6857_vm7, %v5490_v62, %v2914_v36  ;;  %v2921_v60 = vrot.slane %v9195_v55, 5 }
  0xd1   : > { %v5492_v63 = vrot.slane %v5476_v57, 9  ;;  %v7810_v55 = vsel %vm6857_vm7, %v2916_v38, %v2917_v20  ;;  %v2928_v57 = vrot.slane %v7529_v22, 5  ;;  %v2824_v22 = vsel %vm6857_vm7, %v5477_v37, %v2823_v46  ;;  %v6429_v38 = vld [vmem:[%s6527_s25 + $0x30] sm:$0xff]  }
  0xd2   : > { %6215 = vmatmul.mubr.msk.bf16.gmra.mxu0 %vm706_vm3, %v7617_v42  ;;  %v7790_v56 = vsel %vm6857_vm7, %v2902_v58, %v2903_v53  ;;  %v7803_v42 = vsel %vm6857_vm7, %v2909_v6, %v2910_v51  ;;  %v2924_v53 = vrot.slane %v7520_v4, 5  ;;  %v2923_v58 = vrot.slane %v2921_v60, 4 }
  0xd3   : > { %6218 = vmatprep.mubr.msk.bf16.mxu0 %vm706_vm3, %v7623_v15  ;;  %v7814_v15 = vsel %vm6857_vm7, %v5491_v26, %v2921_v60  ;;  %v2931_v51 = vrot.slane %v7541_v45, 5  ;;  %v5462_v45 = vld [vmem:[%s6527_s25 + $0x18] sm:$0xe]  ;;  %v7854_v9 = vsel %vm6857_vm7, %v5492_v63, %v2928_v57  ;;  %v2930_v46 = vrot.slane %v2928_v57, 4  ;;  %v6428_v26 = vld [vmem:[%s6527_s25 + $0x24] sm:$0xff]  }
  0xd4   : > { %v7842_v32 = vsel %vm6857_vm7, %v2923_v58, %v2924_v53  ;;  %v5478_v37 = vrot.slane %v5462_v45, 9  ;;  %v5494_v34 = vcombine.low %v2824_v22, %v2827_v39  ;;  %v9196_v60 = vld [vmem:[#allocation9_spill] sm:$0xff] }
  0xd5   : > { %6181 = vmatmul.mubr.msk.bf16.gmra.mxu1 %vm706_vm3, %v6424_v19  ;;  %v5444_v19 = vcombine.low %v2452_v16, %v2462_v21  ;;  %v7859_v47 = vsel %vm6857_vm7, %v2930_v46, %v2931_v51  ;;  %v2833_v21 = vrot.slane %v6444_v44, 5  ;;  %v4590_v53 = vsel %vm755_vm0, %v9196_v60, 0  ;;  %v5591_v63 = vld [vmem:[%s6527_s25 + $0x18] sm:$0xf]  ;;  %v5592_v57 = vld [vmem:[%s6527_s25 + $0x1c] sm:$0xf] }
  0xd6   : > { %6184 = vmatprep.mubr.msk.bf16.mxu1 %vm706_vm3, %v6425_v27  ;;  %v6443_v27 = vld [vmem:[%s6527_s25 + $0x1c] sm:$0xf]  ;;  %v5594_v51 = vld [vmem:[%s6527_s25 + $0x24] sm:$0xf]  ;;  %v3638_v45 = vshrl.u32 %v5591_v63, 16  ;;  %v3647_v39 = vshll.u32 %v5592_v57, 16 }
  0xd7   : > { %v2830_v36 = vrot.slane %v6443_v27, 5  ;;  %v3641_v27 = vshll.u32 %v5591_v63, 16  ;;  %v3662_v46 = vshrl.u32 %v5594_v51, 16  ;;  %v6431_v44 = vld [vmem:[%s6527_s25 + $0x48] sm:$0xff]   ;;  %v5672_v60 = vld [vmem:[%s6527_s25 + $0x18] sm:$0xe] }
  0xd8   : > { %v7900_v63 = vld [vmem:[%s6527_s25 + $0x2c] sm:$0x1] }
  0xd9   : > { %v2832_v16 = vrot.slane %v2830_v36, 4  ;;  %v2831_v17 = vsel %vm6857_vm7, %v5478_v37, %v2830_v36  ;;  %v7884_v36 = vld [vmem:[%s6527_s25 + $0x28] sm:$0xf]  ;;  %v6430_v37 = vld [vmem:[%s6527_s25 + $0x3c] sm:$0xff]   ;;  %v3664_v18 = vrot.slane %v3662_v46, 4 }
  0xda   : > { %6219 = vmatmul.mubr.msk.bf16.gmra.mxu0 %vm706_vm3, %v5444_v19  ;;  %v9197_v19 = vld [vmem:[#allocation11_spill] sm:$0xff] }
  0xdb   : > { %6258 = vmatprep.mubr.msk.bf16.mxu0 %vm706_vm3, %v6427_v49  ;;  %v2834_v20 = vsel %vm6857_vm7, %v2832_v16, %v2833_v21  ;;  %v4120_v22 = vsel %vm755_vm0, %v9197_v19, 0  ;;  %v3651_v49 = vshrl.u32 %v5592_v57, 16  ;;  %v3675_v16 = vshrl.u32 %v7884_v36, 16  ;;  %v5593_v21 = vld [vmem:[%s6527_s25 + $0x20] sm:$0x1] }
  0xdc   : > { %v5495_v58 = vcombine.low %v2831_v17, %v2834_v20  ;;  %v3640_v17 = vrot.slane %v3638_v45, 4  ;;  %v3643_v20 = vrot.slane %v3641_v27, 5  ;;  %v5597_v19 = vld [vmem:[%s6527_s25 + $0x30] sm:$0xf]  ;;  %v3657_v45 = vshll.u32 %v5593_v21, 16 }
  0xdd   : > { %6185 = vmatmul.mubr.msk.bf16.gmra.mxu1 %vm706_vm3, %v6426_v52  ;;  %v3665_v52 = vshll.u32 %v5594_v51, 16  ;;  %v3677_v51 = vrot.slane %v3675_v16, 4  ;;  %v5688_v27 = vrot.slane %v5672_v60, 9  ;;  %v4384_v46 = vrot.slane %v5593_v21, 5  ;;  %v5673_v16 = vld [vmem:[%s6527_s25 + $0x24] sm:$0xe] }
  0xde   : > { %6224 = vmatprep.mubr.msk.bf16.mxu1 %vm706_vm3, %v5494_v34  ;;  %v3671_v34 = vshll.u32 %v7884_v36, 16  ;;  %v6432_v21 = vld [vmem:[%s6527_s25 + $0x54] sm:$0xff]   ;;  %v3689_v10 = vshll.u32 %v5597_v19, 16  ;;  %v6433_v60 = vld [vmem:[%s6527_s25 + $0x60] sm:$0xff]  }
  0xdf   : > { %v3667_v11 = vrot.slane %v3665_v52, 5  ;;  %v3681_v52 = vshll.u32 %v7900_v63, 16 }
  0xe2   : > { %6259 = vmatmul.mubr.msk.bf16.vlgmr.msra.gmra.mxu0 %vm706_vm3, %v6428_v26  ;;  %v7896_v26 = vrot.slane %v3647_v39, 5 }
  0xe3   : > { %6325 = vmatpush3.bf16.msra.mxu0 %v4590_v53  ;;  %6262 = vmatprep.mubr.msk.bf16.mxu0 %vm706_vm3, %v6429_v38  ;;  %v3653_v38 = vrot.slane %v3651_v49, 4  ;;  %v4381_v53 = vrot.slane %v5592_v57, 5  ;;  %v7910_v57 = vld [vmem:[%s6527_s25 + $0x34] sm:$0xf] }
  0xe5   : > { %6225 = vmatmul.mubr.msk.bf16.vlgmr.msra.gmra.mxu1 %vm706_vm3, %v5495_v58  ;;  %v7905_v58 = vrot.slane %v3671_v34, 5  ;;  %v3654_v39 = vor.u32 %v3653_v38, %v7896_v26  ;;  %v4383_v49 = vrot.slane %v4381_v53, 4  ;;  %v3668_v34 = vor.u32 %v3667_v11, %v3664_v18 }
  0xe6   : > { %6291 = vmatpush3.bf16.msra.mxu1 %v4120_v22  ;;  %6228 = vmatprep.mubr.msk.bf16.mxu1 %vm706_vm3, %v5496_v5  ;;  %v7903_v5 = vpop.f32.mrf.mxu0  ;;  %v3644_v22 = vor.u32 %v3643_v20, %v3640_v17  ;;  %v3686_v17 = vshrl.u32 %v5597_v19, 16  ;;  %v3699_v38 = vshrl.u32 %v7910_v57, 16  ;;  %v7935_v61 = vsel %vm6857_vm7, %v5688_v27, %v4381_v53  ;;  %v5600_v19 = vld [vmem:[%s6527_s25 + $0x3c] sm:$0xf] }
  0xe7   : > { %v3678_v41 = vor.u32 %v3677_v51, %v7905_v58  ;;  %v3655_v8 = vrot.slane %v3654_v39, 4  ;;  %v3683_v11 = vrot.slane %v3681_v52, 5  ;;  %v5689_v51 = vrot.slane %v5673_v16, 9  ;;  %v7949_v39 = vld [vmem:[%s6527_s25 + $0x38] sm:$0x1] }
  0xe8   : > { %v7927_v20 = vpop.f32.mrf.mxu0  ;;  %v3645_v18 = vrot.slane %v3644_v22, 4  ;;  %v3669_v12 = vrot.slane %v3668_v34, 4  ;;  %v4391_v22 = vrot.slane %v7900_v63, 5  ;;  %v3701_v52 = vrot.slane %v3699_v38, 4 }
  0xe9   : > { %v3679_v27 = vrot.slane %v3678_v41, 4  ;;  %v3710_v34 = vshrl.u32 %v5600_v19, 16  ;;  %v3713_v16 = vshll.u32 %v5600_v19, 16  ;;  %v7962_v41 = vld [vmem:[%s6527_s25 + $0x40] sm:$0xf] }
  0xea   : > { %6263 = vmatmul.mubr.msk.bf16.gmra.mxu0 %vm706_vm3, %v6430_v37  ;;  %v7946_v53 = vpop.f32.mrf.mxu0  ;;  %v3650_v63 = vsel %vm6571_vm4, %v3645_v18, %v7896_v26  ;;  %v3674_v26 = vsel %vm6571_vm4, %v3669_v12, %v7905_v58  ;;  %v5674_v18 = vld [vmem:[%s6527_s25 + $0x30] sm:$0xe]  ;;  %v3719_v24 = vshll.u32 %v7962_v41, 16  ;;  %v3723_v33 = vshrl.u32 %v7962_v41, 16 }
  0xeb   : > { %6266 = vmatprep.mubr.msk.bf16.mxu0 %vm706_vm3, %v6431_v44  ;;  %v7918_v37 = vpop.f32.mrf.mxu1  ;;  %v4388_v44 = vrot.slane %v7884_v36, 5  ;;  %v3659_v36 = vrot.slane %v3657_v45, 5  ;;  %v3688_v45 = vrot.slane %v3686_v17, 4  ;;  %v3684_v58 = vsel %vm6571_vm4, %v3679_v27, %v3683_v11 }
  0xec   : > { %9198 = vst [vmem:[#allocation4_spill] sm:$0xff] %v7918_v37  ;;  %v7991_v12 = vpop.f32.mrf.mxu0  ;;  %v3715_v19 = vrot.slane %v3713_v16, 5  ;;  %v3747_v11 = vshrl.u32 %v7984_v7, 16 }
  0xed   : > { %6229 = vmatmul.mubr.msk.bf16.gmra.mxu1 %vm706_vm3, %v5497_v48  ;;  %v3695_v48 = vshll.u32 %v7910_v57, 16  ;;  %v7942_v6 = vpop.f32.mrf.mxu1  ;;  %v4390_v4 = vrot.slane %v4388_v44, 4  ;;  %v3660_v17 = vsel %vm6571_vm4, %v3655_v8, %v3659_v36  ;;  %v4395_v36 = vrot.slane %v7910_v57, 5  ;;  %v6435_v8 = vld [vmem:[%s6527_s25 + $0x78] sm:$0xff]  }
  0xee   : > { %6232 = vmatprep.mubr.msk.bf16.mxu1 %vm706_vm3, %v5498_v40  ;;  %v7939_v40 = vsel %vm6857_vm7, %v4383_v49, %v4384_v46  ;;  %9199 = vst [vmem:[#allocation3_spill] sm:$0xff] %v7942_v6  ;;  %v3691_v49 = vrot.slane %v3689_v10, 5  ;;  %v8005_v27 = vcombine.low %v3650_v63, %v3660_v17  ;;  %v8007_v57 = vcombine.low %v3674_v26, %v3684_v58  ;;  %v8021_v17 = vld [vmem:[%s6527_s25 + $0x58] sm:$0xf]  ;;  %v8027_v58 = vld [vmem:[%s6527_s25 + $0x44] sm:$0x1] }
  0xef   : > { %v7951_v46 = vrot.slane %v3695_v48, 5  ;;  %v7968_v10 = vpop.f32.mrf.mxu1  ;;  %v7975_v48 = vsel %vm6857_vm7, %v5689_v51, %v4388_v44  ;;  %v7979_v38 = vsel %vm6857_vm7, %v4390_v4, %v4391_v22  ;;  %v3712_v51 = vrot.slane %v3710_v34, 4  ;;  %v5606_v34 = vld [vmem:[%s6527_s25 + $0x54] sm:$0xf] }
  0xf0   : > { %9200 = vst [vmem:[#allocation6_spill] sm:$0xff] %v7968_v10  ;;  %v3692_v44 = vor.u32 %v3691_v49, %v3688_v45  ;;  %v3737_v22 = vshll.u32 %v5603_v3, 16  ;;  %v4397_v13 = vrot.slane %v4395_v36, 4  ;;  %v4398_v63 = vrot.slane %v7949_v39, 5  ;;  %v5675_v49 = vld [vmem:[%s6527_s25 + $0x3c] sm:$0xe] }
  0xf1   : > { %v3702_v4 = vor.u32 %v3701_v52, %v7951_v46  ;;  %v8003_v45 = vpop.f32.mrf.mxu1  ;;  %v5690_v52 = vrot.slane %v5674_v18, 9  ;;  %v3716_v18 = vor.u32 %v3715_v19, %v3712_v51  ;;  %v9203_v6 = vcombine.low %v7716_v28, %v7732_v1 }
  0xf2   : > { %6267 = vmatmul.mubr.msk.bf16.gmra.mxu0 %vm706_vm3, %v6432_v21  ;;  %v3743_v21 = vshll.u32 %v7984_v7, 16  ;;  %9201 = vst [vmem:[#allocation5_spill] sm:$0xff] %v8003_v45  ;;  %v3739_v45 = vrot.slane %v3737_v22, 5  ;;  %v3758_v51 = vshrl.u32 %v5606_v34, 16  ;;  %v3761_v19 = vshll.u32 %v5606_v34, 16 }
  0xf3   : > { %6270 = vmatprep.mubr.msk.bf16.mxu0 %vm706_vm3, %v6433_v60  ;;  %v3705_v60 = vshll.u32 %v7949_v39, 16  ;;  %v8024_v26 = vrot.slane %v3702_v4, 4  ;;  %v3749_v39 = vrot.slane %v3747_v11, 4  ;;  %v8062_v22 = vsel %vm6857_vm7, %v4397_v13, %v4398_v63 }
  0xf4   : > { %v8032_v10 = vrot.slane %v3743_v21, 5  ;;  %v9205_v21 = vcombine.low %v7725_v25, %v7744_v14  ;;  %v4402_v25 = vrot.slane %v7962_v41, 5  ;;  %v6437_v14 = vld [vmem:[%s6527_s25 + $0x90] sm:$0xff]   ;;  %v5691_v1 = vrot.slane %v5675_v49, 9  ;;  %v5609_v41 = vld [vmem:[%s6527_s25 + $0x60] sm:$0xf] }
  0xf5   : > { %6233 = vmatmul.mubr.msk.bf16.gmra.mxu1 %vm706_vm3, %v5499_v35  ;;  %v6434_v35 = vld [vmem:[%s6527_s25 + $0x6c] sm:$0xff]   ;;  %v8017_v62 = vrot.slane %v3705_v60, 5  ;;  %v3760_v37 = vrot.slane %v3758_v51, 4 }
  0xf6   : > { %6236 = vmatprep.mubr.msk.bf16.mxu1 %vm706_vm3, %v5500_v23  ;;  %v3734_v23 = vshrl.u32 %v5603_v3, 16  ;;  %v8015_v3 = vrot.slane %v3692_v44, 4  ;;  %v3725_v44 = vrot.slane %v3723_v33, 4  ;;  %v3771_v33 = vshrl.u32 %v8021_v17, 16 }
  0xf7   : > { %v8013_v16 = vpop.f32.mrf.mxu0  ;;  %v3750_v13 = vor.u32 %v3749_v39, %v8032_v10  ;;  %v4409_v39 = vrot.slane %v7984_v7, 5  ;;  %v9209_v7 = vcombine.low %v7736_v43, %v7753_v2  ;;  %v9211_v43 = vcombine.low %v7757_v59, %v7767_v50  ;;  %v6438_v2 = vld [vmem:[%s6527_s25 + $0x9c] sm:$0xff]  }
  0xf8   : > { %9202 = vst [vmem:[#allocation8_spill] sm:$0xff] %v8013_v16  ;;  %v3736_v60 = vrot.slane %v3734_v23, 4  ;;  %v6436_v23 = vld [vmem:[%s6527_s25 + $0x84] sm:$0xff]   ;;  %v8089_v16 = vld [vmem:[%s6527_s25 + $0x5c] sm:$0x1]  ;;  %v4416_v59 = vrot.slane %v8021_v17, 5 }
  0xf9   : > { %v8050_v28 = vpop.f32.mrf.mxu0 }
  0xfa   : > { %6271 = vmatmul.mubr.msk.bf16.gmra.mxu0 %vm706_vm3, %v6434_v35  ;;  %v8029_v35 = vrot.slane %v3719_v24, 5  ;;  %v3767_v24 = vshll.u32 %v8021_v17, 16  ;;  %9206 = vst [vmem:[#allocation12_spill] sm:$0xff] %v8050_v28  ;;  %v3763_v28 = vrot.slane %v3761_v19, 5 }
  0xfb   : > { %6274 = vmatprep.mubr.msk.bf16.mxu0 %vm706_vm3, %v6435_v8  ;;  %v8038_v4 = vpop.f32.mrf.mxu1  ;;  %v8041_v8 = vld [vmem:[%s6527_s25 + $0x50] sm:$0x1]  ;;  %v8082_v49 = vpop.f32.mrf.mxu0 }
  0xfc   : > { %9204 = vst [vmem:[#allocation7_spill] sm:$0xff] %v8038_v4  ;;  %v3726_v34 = vor.u32 %v3725_v44, %v8029_v35  ;;  %v8072_v4 = vrot.slane %v3716_v18, 4  ;;  %v8079_v11 = vrot.slane %v3767_v24, 5  ;;  %v3773_v44 = vrot.slane %v3771_v33, 4  ;;  %9208 = vst [vmem:[#allocation2_spill] sm:$0xff] %v8082_v49 }
  0xfd   : > { %6237 = vmatmul.mubr.msk.bf16.gmra.mxu1 %vm706_vm3, %v9203_v6  ;;  %v8058_v6 = vsel %vm6857_vm7, %v5690_v52, %v4395_v36  ;;  %v3740_v36 = vor.u32 %v3739_v45, %v3736_v60  ;;  %v3753_v52 = vshll.u32 %v8041_v8, 16  ;;  %v8077_v63 = vpop.f32.mrf.mxu1  ;;  %v4404_v18 = vrot.slane %v4402_v25, 4  ;;  %v5676_v24 = vld [vmem:[%s6527_s25 + $0x48] sm:$0xe] }
  0xfe   : > { %6240 = vmatprep.mubr.msk.bf16.mxu1 %vm706_vm3, %v9205_v21  ;;  %v3729_v21 = vshll.u32 %v8027_v58, 16  ;;  %9207 = vst [vmem:[#allocation10_spill] sm:$0xff] %v8077_v63  ;;  %v4405_v60 = vrot.slane %v8027_v58, 5  ;;  %v3727_v51 = vrot.slane %v3726_v34, 4  ;;  %v3782_v33 = vshrl.u32 %v5609_v41, 16 }
  0xff   : > { %v8095_v63 = vsel %vm6857_vm7, %v5691_v1, %v4402_v25  ;;  %v3741_v45 = vrot.slane %v3740_v36, 4  ;;  %v3751_v49 = vrot.slane %v3750_v13, 4  ;;  %v3755_v58 = vrot.slane %v3753_v52, 5  ;;  %v8110_v36 = vld [vmem:[%s6527_s25 + $0x64] sm:$0xf]  ;;  %v8117_v13 = vpop.f32.mrf.mxu0 }
 0x100   : > { %v3731_v19 = vrot.slane %v3729_v21, 5  ;;  %v3722_v34 = vsel %vm6571_vm4, %v8072_v4, %v8029_v35  ;;  %v3764_v21 = vor.u32 %v3763_v28, %v3760_v37  ;;  %v3774_v1 = vor.u32 %v3773_v44, %v8079_v11  ;;  %9212 = vst [vmem:[#allocation14_spill] sm:$0xff] %v8117_v13  ;;  %v5677_v28 = vld [vmem:[%s6527_s25 + $0x54] sm:$0xe]  ;;  %v6442_v13 = vld [vmem:[%s6527_s25 + $0xcc] sm:$0xff]  }
 0x101   : > { %v3777_v25 = vshll.u32 %v8089_v16, 16  ;;  %v8121_v52 = vsel %vm6857_vm7, %v4404_v18, %v4405_v60  ;;  %v5692_v35 = vrot.slane %v5676_v24, 9  ;;  %v4411_v37 = vrot.slane %v4409_v39, 4 }
 0x102   : > { %6275 = vmatmul.mubr.msk.bf16.gmra.mxu0 %vm706_vm3, %v6436_v23  ;;  %v3785_v23 = vshll.u32 %v5609_v41, 16  ;;  %v4412_v4 = vrot.slane %v8041_v8, 5  ;;  %v6439_v41 = vld [vmem:[%s6527_s25 + $0xa8] sm:$0xff]   ;;  %v3732_v44 = vsel %vm6571_vm4, %v3727_v51, %v3731_v19  ;;  %v3784_v50 = vrot.slane %v3782_v33, 4 }
 0x103   : > { %6278 = vmatprep.mubr.msk.bf16.mxu0 %vm706_vm3, %v6437_v14  ;;  %v8101_v14 = vpop.f32.mrf.mxu1  ;;  %v3756_v18 = vsel %vm6571_vm4, %v3751_v49, %v3755_v58  ;;  %v3791_v60 = vshll.u32 %v8110_v36, 16  ;;  %v3795_v8 = vshrl.u32 %v8110_v36, 16  ;;  %v3775_v51 = vrot.slane %v3774_v1, 4  ;;  %v8139_v33 = vld [vmem:[%s6527_s25 + $0x68] sm:$0x1] }
 0x104   : > { %9210 = vst [vmem:[#allocation13_spill] sm:$0xff] %v8101_v14  ;;  %v3765_v14 = vrot.slane %v3764_v21, 4  ;;  %v3779_v17 = vrot.slane %v3777_v25, 5  ;;  %v5693_v19 = vrot.slane %v5677_v28, 9  ;;  %v9215_v49 = vsel %vm6571_vm4, %v8024_v26, %v8017_v62  ;;  %v5612_v25 = vld [vmem:[%s6527_s25 + $0x6c] sm:$0xf] }
 0x105   : > { %6241 = vmatmul.mubr.msk.bf16.gmra.mxu1 %vm706_vm3, %v9209_v7  ;;  %v3787_v7 = vrot.slane %v3785_v23, 5  ;;  %v8136_v24 = vpop.f32.mrf.mxu1  ;;  %v8160_v21 = vsel %vm6857_vm7, %v5692_v35, %v4409_v39  ;;  %v8164_v1 = vsel %vm6857_vm7, %v4411_v37, %v4412_v4  ;;  %v8167_v62 = vcombine.low %v3722_v34, %v3732_v44  ;;  %v5678_v4 = vld [vmem:[%s6527_s25 + $0x60] sm:$0xe]  ;;  %v5618_v44 = vld [vmem:[%s6527_s25 + $0x84] sm:$0xf] }
 0x106   : > { %6244 = vmatprep.mubr.msk.bf16.mxu1 %vm706_vm3, %v9211_v43  ;;  %v3746_v43 = vsel %vm6571_vm4, %v3741_v45, %v8032_v10  ;;  %9213 = vst [vmem:[#allocation15_spill] sm:$0xff] %v8136_v24  ;;  %v9216_v45 = vsel %vm6571_vm4, %v8015_v3, %v7951_v46  ;;  %v4418_v46 = vrot.slane %v4416_v59, 4  ;;  %v4419_v3 = vrot.slane %v8089_v16, 5 }
 0x107   : > { %v8154_v23 = vcombine.low %v9216_v45, %v9215_v49  ;;  %9217 = vst [vmem:[#allocation11_spill] sm:$0xff] %v8167_v62  ;;  %v3788_v26 = vor.u32 %v3787_v7, %v3784_v50  ;;  %v8174_v28 = vcombine.low %v3746_v43, %v3756_v18  ;;  %v8176_v39 = vrot.slane %v3791_v60, 5 }
 0x108   : > { %v8142_v10 = vpop.f32.mrf.mxu0  ;;  %v8178_v35 = vrot.slane %v3795_v8, 4  ;;  %v3801_v37 = vshll.u32 %v8139_v33, 16  ;;  %v9219_v34 = vcombine.low %v7775_v54, %v7790_v56  ;;  %v3770_v50 = vsel %vm6571_vm4, %v3765_v14, %v8079_v11  ;;  %v5615_v54 = vld [vmem:[%s6527_s25 + $0x78] sm:$0xf] }
 0x109   : > { %9214 = vst [vmem:[#allocation9_spill] sm:$0xff] %v8142_v10  ;;  %9218 = vst [vmem:[#allocation16_spill] sm:$0xff] %v8174_v28  ;;  %v3780_v7 = vsel %vm6571_vm4, %v3775_v51, %v3779_v17  ;;  %v8198_v43 = vsel %vm6857_vm7, %v5693_v19, %v4416_v59  ;;  %v9221_v56 = vcombine.low %v7782_v29, %v7803_v42  ;;  %v3806_v60 = vshrl.u32 %v5612_v25, 16  ;;  %v8210_v51 = vld [vmem:[%s6527_s25 + $0x7c] sm:$0xf]  ;;  %v6441_v59 = vld [vmem:[%s6527_s25 + $0xc0] sm:$0xff]  }
 0x10a   : > { %6279 = vmatmul.mubr.msk.bf16.gmra.mxu0 %vm706_vm3, %v6438_v2  ;;  %v8172_v2 = vld [vmem:[%s6527_s25 + $0x70] sm:$0xf]  ;;  %v8205_v18 = vpop.f32.mrf.mxu0  ;;  %v3809_v8 = vshll.u32 %v5612_v25, 16  ;;  %v8215_v17 = vsel %vm6857_vm7, %v4418_v46, %v4419_v3  ;;  %v8217_v29 = vrot.slane %v3788_v26, 4  ;;  %v5694_v42 = vrot.slane %v5678_v4, 9 }
 0x10b   : > { %6282 = vmatprep.mubr.msk.bf16.mxu0 %vm706_vm3, %v6439_v41  ;;  %v6440_v41 = vld [vmem:[%s6527_s25 + $0xb4] sm:$0xff]   ;;  %9222 = vst [vmem:[#allocation18_spill] sm:$0xff] %v8205_v18  ;;  %v3815_v11 = vshll.u32 %v8172_v2, 16  ;;  %v3819_v14 = vshrl.u32 %v8172_v2, 16  ;;  %v4423_v19 = vrot.slane %v8110_v36, 5  ;;  %v8220_v49 = vcombine.low %v3770_v50, %v3780_v7 }
 0x10c   : > { %v3798_v45 = vor.u32 %v8178_v35, %v8176_v39  ;;  %v8224_v25 = vrot.slane %v3801_v37, 5  ;;  %v3830_v46 = vshrl.u32 %v5615_v54, 16  ;;  %v3833_v3 = vshll.u32 %v5615_v54, 16  ;;  %v8236_v4 = vld [vmem:[%s6527_s25 + $0x88] sm:$0xf]  ;;  %v8239_v35 = vpop.f32.mrf.mxu0 }
 0x10d   : > { %6245 = vmatmul.mubr.msk.bf16.gmra.mxu1 %vm706_vm3, %v9219_v34  ;;  %v8186_v16 = vpop.f32.mrf.mxu1  ;;  %9223 = vst [vmem:[#allocation19_spill] sm:$0xff] %v8220_v49  ;;  %v4426_v34 = vrot.slane %v8139_v33, 5  ;;  %v3839_v36 = vshll.u32 %v8210_v51, 16  ;;  %v3843_v26 = vshrl.u32 %v8210_v51, 16  ;;  %9225 = vst [vmem:[#allocation21_spill] sm:$0xff] %v8239_v35  ;;  %v3808_v33 = vrot.slane %v3806_v60, 4 }
 0x10e   : > { %9220 = vst [vmem:[#allocation17_spill] sm:$0xff] %v8186_v16  ;;  %6248 = vmatprep.mubr.msk.bf16.mxu1 %vm706_vm3, %v9221_v56  ;;  %v8228_v56 = vld [vmem:[%s6527_s25 + $0x74] sm:$0x1]  ;;  %v3811_v37 = vrot.slane %v3809_v8, 5  ;;  %v8241_v50 = vrot.slane %v3815_v11, 5  ;;  %v3821_v7 = vrot.slane %v3819_v14, 4  ;;  %v9226_v54 = vcombine.low %v7794_v30, %v7810_v55  ;;  %v8269_v49 = vpop.f32.mrf.mxu0 }
 0x10f   : > { %v8231_v58 = vpop.f32.mrf.mxu1  ;;  %v4425_v16 = vrot.slane %v4423_v19, 4  ;;  %v8254_v60 = vld [vmem:[%s6527_s25 + $0x80] sm:$0x1]  ;;  %v8257_v8 = vld [vmem:[%s6527_s25 + $0x6c] sm:$0xe]  ;;  %v3854_v11 = vshrl.u32 %v5618_v44, 16 }
 0x110   : > { %9224 = vst [vmem:[#allocation20_spill] sm:$0xff] %v8231_v58  ;;  %v8250_v58 = vsel %vm6857_vm7, %v5694_v42, %v4423_v19  ;;  %v3857_v14 = vshll.u32 %v5618_v44, 16  ;;  %v3867_v24 = vshrl.u32 %v8236_v4, 16  ;;  %v3832_v19 = vrot.slane %v3830_v46, 4  ;;  %9228 = vst [vmem:[#allocation23_spill] sm:$0xff] %v8269_v49 }
 0x111   : > { %v8265_v42 = vpop.f32.mrf.mxu1  ;;  %v3835_v35 = vrot.slane %v3833_v3, 5  ;;  %v8267_v18 = vrot.slane %v3839_v36, 5  ;;  %v3845_v10 = vrot.slane %v3843_v26, 4  ;;  %v9229_v44 = vcombine.low %v7814_v15, %v7842_v32  ;;  %v8288_v32 = vld [vmem:[%s6527_s25 + $0x8c] sm:$0x1] }
 0x112   : > { %6283 = vmatmul.mubr.msk.bf16.gmra.mxu0 %vm706_vm3, %v6440_v41  ;;  %v3825_v41 = vshll.u32 %v8228_v56, 16  ;;  %9227 = vst [vmem:[#allocation22_spill] sm:$0xff] %v8265_v42  ;;  %v3812_v30 = vor.u32 %v3811_v37, %v3808_v33  ;;  %v3822_v55 = vor.u32 %v3821_v7, %v8241_v50  ;;  %v3849_v46 = vshll.u32 %v8254_v60, 16  ;;  %v5680_v33 = vld [vmem:[%s6527_s25 + $0x78] sm:$0xe] }
 0x113   : > { %6286 = vmatprep.mubr.msk.bf16.mxu0 %vm706_vm3, %v6441_v59  ;;  %v3863_v59 = vshll.u32 %v8236_v4, 16  ;;  %v8279_v3 = vrot.slane %v3798_v45, 4  ;;  %v8283_v36 = vsel %vm6857_vm7, %v4425_v16, %v4426_v34  ;;  %v5695_v26 = vrot.slane %v8257_v8, 9  ;;  %v8293_v42 = vpop.f32.mrf.mxu1  ;;  %v5621_v8 = vld [vmem:[%s6527_s25 + $0x90] sm:$0xf] }
 0x114   : > { %v4437_v15 = vrot.slane %v8210_v51, 5  ;;  %v3856_v37 = vrot.slane %v3854_v11, 4  ;;  %v3859_v7 = vrot.slane %v3857_v14, 5  ;;  %9230 = vst [vmem:[#allocation24_spill] sm:$0xff] %v8293_v42  ;;  %v3827_v45 = vrot.slane %v3825_v41, 5 }
 0x115   : > { %6249 = vmatmul.mubr.msk.bf16.gmra.mxu1 %vm706_vm3, %v9226_v54  ;;  %v4430_v54 = vrot.slane %v8172_v2, 5  ;;  %v8291_v2 = vrot.slane %v3863_v59, 5  ;;  %v4433_v49 = vrot.slane %v8228_v56, 5  ;;  %v3836_v16 = vor.u32 %v3835_v35, %v3832_v19  ;;  %v8302_v59 = vld [vmem:[%s6527_s25 + $0x94] sm:$0xf] }
 0x116   : > { %6252 = vmatprep.mubr.msk.bf16.mxu1 %vm706_vm3, %v9229_v44  ;;  %v3869_v44 = vrot.slane %v3867_v24, 4  ;;  %v3846_v34 = vor.u32 %v3845_v10, %v8267_v18  ;;  %v3813_v51 = vrot.slane %v3812_v30, 4  ;;  %v3823_v11 = vrot.slane %v3822_v55, 4 }
 0x117   : > { %v4432_v62 = vrot.slane %v4430_v54, 4  ;;  %v3851_v14 = vrot.slane %v3849_v46, 5  ;;  %v9231_v24 = vcombine.low %v7935_v61, %v7939_v40  ;;  %v5696_v56 = vrot.slane %v5680_v33, 9 }
 0x118   : > { %v4439_v35 = vrot.slane %v4437_v15, 4  ;;  %v4440_v10 = vrot.slane %v8254_v60, 5  ;;  %v3873_v41 = vshll.u32 %v8288_v32, 16  ;;  %v3870_v30 = vor.u32 %v3869_v44, %v8291_v2 }
 0x119   : > { %v3878_v55 = vshrl.u32 %v5621_v8, 16  ;;  %v3881_v46 = vshll.u32 %v5621_v8, 16  ;;  %v9233_v61 = vcombine.low %v7854_v9, %v7859_v47  ;;  %v3837_v40 = vrot.slane %v3836_v16, 4 }
 0x11a   : > { %v8298_v28 = vpop.f32.mrf.mxu0  ;;  %6287 = vmatmul.mubr.msk.bf16.gmra.mxu0 %vm706_vm3, %v6442_v13  ;;  %v3860_v13 = vor.u32 %v3859_v7, %v3856_v37  ;;  %v3847_v33 = vrot.slane %v3846_v34, 4  ;;  %v3887_v60 = vshll.u32 %v8302_v59, 16  ;;  %v3804_v37 = vsel %vm6571_vm4, %v8279_v3, %v8224_v25 }
 0x11b   : > { %6326 = vmatprep.mubr.msk.bf16.mxu0 %vm706_vm3, %v9231_v24  ;;  %v3891_v24 = vshrl.u32 %v8302_v59, 16  ;;  %v3818_v9 = vsel %vm6571_vm4, %v3813_v51, %v8241_v50  ;;  %v8334_v47 = vsel %vm6857_vm7, %v5695_v26, %v4430_v54  ;;  %v8338_v7 = vsel %vm6857_vm7, %v4432_v62, %v4433_v49  ;;  %v5681_v54 = vld [vmem:[%s6527_s25 + $0x84] sm:$0xe]  ;;  %v9272_v31 = vld [vmem:[#allocation24_spill] sm:$0xff] }
 0x11c   : > { %v8310_v19 = vpop.f32.mrf.mxu0  ;;  %v8346_v25 = vsel %vm6857_vm7, %v5696_v56, %v4437_v15  ;;  %v8350_v50 = vsel %vm6857_vm7, %v4439_v35, %v4440_v10  ;;  %v3875_v3 = vrot.slane %v3873_v41, 5  ;;  %v3861_v62 = vrot.slane %v3860_v13, 4  ;;  %v8374_v13 = vld [vmem:[%s6527_s25 + $0x98] sm:$0x1] }
 0x11d   : > { %9232 = vst [vmem:[#allocation25_spill] sm:$0xff] %v8310_v19  ;;  %v8313_v42 = vpop.f32.mrf.mxu1  ;;  %6253 = vmatmul.mubr.msk.bf16.gmra.mxu1 %vm706_vm3, %v9233_v61  ;;  %v3871_v49 = vrot.slane %v3870_v30, 4  ;;  %v3880_v16 = vrot.slane %v3878_v55, 4  ;;  %v3883_v34 = vrot.slane %v3881_v46, 5  ;;  %v3842_v15 = vsel %vm6571_vm4, %v3837_v40, %v8267_v18  ;;  %v5624_v30 = vld [vmem:[%s6527_s25 + $0x9c] sm:$0xf] }
 0x11e   : > { %v8321_v19 = vpop.f32.mrf.mxu0  ;;  %6292 = vmatprep.mubr.msk.bf16.mxu1 %vm706_vm3, %v8005_v27  ;;  %v3828_v27 = vsel %vm6571_vm4, %v3823_v11, %v3827_v45  ;;  %v3852_v45 = vsel %vm6571_vm4, %v3847_v33, %v3851_v14  ;;  %v8362_v51 = vrot.slane %v3887_v60, 5  ;;  %v3893_v11 = vrot.slane %v3891_v24, 4  ;;  %v8405_v24 = vld [vmem:[%s6527_s25 + $0xa0] sm:$0xf] }
 0x11f   : > { %v8340_v44 = vpop.f32.mrf.mxu1  ;;  %v9234_v35 = vcombine.low %v7975_v48, %v7979_v38  ;;  %v5710_v10 = vcombine.low %v8198_v43, %v8215_v17  ;;  %v5711_v41 = vcombine.low %v8250_v58, %v8283_v36  ;;  %v5697_v18 = vrot.slane %v5681_v54, 9 }
 0x120   : > { %v8353_v26 = vpop.f32.mrf.mxu0  ;;  %v4444_v14 = vrot.slane %v8236_v4, 5  ;;  %v9235_v48 = vcombine.low %v8058_v6, %v8062_v22  ;;  %v9236_v38 = vsel %vm6571_vm4, %v8217_v29, %v8176_v39  ;;  %v8390_v61 = vcombine.low %v3818_v9, %v3828_v27  ;;  %v5682_v29 = vld [vmem:[%s6527_s25 + $0x90] sm:$0xe]  ;;  %v9243_v4 = vld [vmem:[#allocation2_spill] sm:$0xff] }
 0x121   : > { %v8355_v8 = vpop.f32.mrf.mxu1  ;;  %v8388_v46 = vcombine.low %v9236_v38, %v3804_v37  ;;  %v8396_v60 = vcombine.low %v3842_v15, %v3852_v45  ;;  %v3866_v6 = vsel %vm6571_vm4, %v3861_v62, %v8291_v2  ;;  %v3876_v22 = vsel %vm6571_vm4, %v3871_v49, %v3875_v3 }
 0x122   : > { %v6124_v56 = vpop.f32.mrf.mxu0  ;;  %6327 = vmatmul.mubr.msk.bf16.vlgmr.msra.gmra.mxu0 %vm706_vm3, %v9234_v35  ;;  %v3884_v39 = vor.u32 %v3883_v34, %v3880_v16  ;;  %v3894_v9 = vor.u32 %v3893_v11, %v8362_v51  ;;  %v3897_v27 = vshll.u32 %v8374_v13, 16  ;;  %v3902_v54 = vshrl.u32 %v5624_v30, 16 }
 0x123   : > { %v8377_v55 = vpop.f32.mrf.mxu1  ;;  %6330 = vmatprep.mubr.msk.bf16.mxu0 %vm706_vm3, %v9235_v48  ;;  %v3905_v15 = vshll.u32 %v5624_v30, 16  ;;  %v8416_v3 = vsel %vm6857_vm7, %v5697_v18, %v4444_v14  ;;  %v4446_v62 = vrot.slane %v4444_v14, 4  ;;  %v4447_v49 = vrot.slane %v8288_v32, 5 }
 0x124   : > { %v1510_v33 = vpop.f32.mrf.mxu0  ;;  %v5698_v16 = vrot.slane %v5682_v29, 9  ;;  %v4451_v34 = vrot.slane %v8302_v59, 5  ;;  %v3911_v11 = vshll.u32 %v8405_v24, 16  ;;  %v3915_v35 = vshrl.u32 %v8405_v24, 16 }
 0x125   : > { %v6090_v37 = vpop.f32.mrf.mxu1  ;;  %6293 = vmatmul.mubr.msk.bf16.vlgmr.msra.gmra.mxu1 %vm706_vm3, %v8007_v57  ;;  %v8425_v48 = vcombine.low %v3866_v6, %v3876_v22  ;;  %v8427_v18 = vrot.slane %v3884_v39, 4  ;;  %v3895_v32 = vrot.slane %v3894_v9, 4  ;;  %v3899_v38 = vrot.slane %v3897_v27, 5  ;;  %v5627_v22 = vld [vmem:[%s6527_s25 + $0xa8] sm:$0xf] }
 0x126   : > { %v1094_v45 = vadd.f32 %v6090_v37, %v7903_v5  ;;  %v6125_v2 = vpop.f32.mrf.mxu0  ;;  %6296 = vmatprep.mubr.msk.bf16.mxu1 %vm706_vm3, %v8154_v23  ;;  %v3904_v29 = vrot.slane %v3902_v54, 4  ;;  %v3907_v59 = vrot.slane %v3905_v15, 5  ;;  %v4454_v6 = vrot.slane %v8374_v13, 5  ;;  %v8453_v27 = vld [vmem:[%s6527_s25 + $0xac] sm:$0xf] }
 0x127   : > { %v1085_v57 = vpop.f32.mrf.mxu1  ;;  %v3917_v9 = vrot.slane %v3915_v35, 4  ;;  %v9240_v35 = vld [vmem:[#allocation8_spill] sm:$0xff] }
 0x128   : > { %v8422_v5 = vadd.f32 %v6124_v56, %v1094_v45  ;;  %v1086_v23 = vadd.f32 %v1085_v57, %v7927_v20  ;;  %v1513_v30 = vpop.f32.mrf.mxu0  ;;  %v9237_v45 = vcombine.low %v8095_v63, %v8121_v52  ;;  %v8438_v20 = vsel %vm6857_vm7, %v4446_v62, %v4447_v49  ;;  %v5683_v62 = vld [vmem:[%s6527_s25 + $0x9c] sm:$0xe] }
 0x129   : > { %v6091_v14 = vpop.f32.mrf.mxu1  ;;  %v4453_v63 = vrot.slane %v4451_v34, 4  ;;  %v8450_v52 = vrot.slane %v3911_v11, 5  ;;  %v4458_v49 = vrot.slane %v8405_v24, 5  ;;  %v3935_v24 = vshll.u32 %v8453_v27, 16 }
 0x12a   : > { %v8429_v37 = vadd.f32 %v1510_v33, %v1086_v23  ;;  %v1097_v40 = vadd.f32 %v6091_v14, %v7946_v53  ;;  %v6128_v56 = vpop.f32.mrf.mxu0  ;;  %6331 = vmatmul.mubr.msk.bf16.gmra.mxu0 %vm706_vm3, %v9237_v45  ;;  %v9238_v33 = vcombine.low %v8160_v21, %v8164_v1  ;;  %v8448_v53 = vsel %vm6857_vm7, %v5698_v16, %v4451_v34  ;;  %v5626_v1 = vld [vmem:[%s6527_s25 + $0xa4] sm:$0x1]  ;;  %v9239_v16 = vld [vmem:[#allocation11_spill] sm:$0xff] }
 0x12b   : > { %v1088_v39 = vpop.f32.mrf.mxu1  ;;  %v3890_v21 = vsel %vm6571_vm4, %v8427_v18, %v8362_v51  ;;  %v3926_v34 = vshrl.u32 %v5627_v22, 16  ;;  %v9241_v51 = vld [vmem:[#allocation16_spill] sm:$0xff]  ;;  %v3939_v18 = vshrl.u32 %v8453_v27, 16 }
 0x12c   : > { %6334 = vmatprep.mubr.msk.bf16.mxu0 %vm706_vm3, %v9238_v33  ;;  %v8455_v54 = vadd.f32 %v6125_v2, %v1097_v40  ;;  %v1089_v13 = vadd.f32 %v1088_v39, %v7991_v12  ;;  %v1526_v15 = vpop.f32.mrf.mxu0  ;;  %v3900_v40 = vsel %vm6571_vm4, %v3895_v32, %v3899_v38  ;;  %v3908_v2 = vor.u32 %v3907_v59, %v3904_v29  ;;  %v9242_v59 = vld [vmem:[#allocation12_spill] sm:$0xff] }
 0x12d   : > { %v6094_v57 = vpop.f32.mrf.mxu1  ;;  %6297 = vmatmul.mubr.msk.bf16.gmra.mxu1 %vm706_vm3, %v9239_v16  ;;  %v3929_v12 = vshll.u32 %v5627_v22, 16  ;;  %v8478_v39 = vsel %vm6857_vm7, %v4453_v63, %v4454_v6  ;;  %v3918_v32 = vor.u32 %v3917_v9, %v8450_v52  ;;  %v3921_v38 = vshll.u32 %v5626_v1, 16 }
 0x12e   : > { %v8469_v11 = vadd.f32 %v1513_v30, %v1089_v13  ;;  %v1110_v23 = vadd.f32 %v6094_v57, %v9240_v35  ;;  %v6129_v14 = vpop.f32.mrf.mxu0  ;;  %6300 = vmatprep.mubr.msk.bf16.mxu1 %vm706_vm3, %v9241_v51  ;;  %v5699_v30 = vrot.slane %v5683_v62, 9  ;;  %v4460_v13 = vrot.slane %v4458_v49, 4 }
 0x12f   : > { %v1101_v45 = vpop.f32.mrf.mxu1  ;;  %v4461_v57 = vrot.slane %v5626_v1, 5  ;;  %v8486_v51 = vrot.slane %v3908_v2, 4  ;;  %v3928_v6 = vrot.slane %v3926_v34, 4  ;;  %v3931_v63 = vrot.slane %v3929_v12, 5  ;;  %v8496_v1 = vld [vmem:[%s6527_s25 + $0xb0] sm:$0x1] }
 0x130   : > { %v8481_v29 = vadd.f32 %v6128_v56, %v1110_v23  ;;  %v1102_v22 = vadd.f32 %v1101_v45, %v9242_v59  ;;  %v1529_v33 = vpop.f32.mrf.mxu0  ;;  %v8498_v23 = vrot.slane %v3935_v24, 5  ;;  %v3941_v2 = vrot.slane %v3939_v18, 4  ;;  %v9244_v12 = vld [vmem:[#allocation14_spill] sm:$0xff] }
 0x131   : > { %v6095_v16 = vpop.f32.mrf.mxu1  ;;  %v8508_v43 = vrot.slane %v3918_v32, 4  ;;  %v8510_v17 = vrot.slane %v3921_v38, 5  ;;  %v8518_v58 = vsel %vm6857_vm7, %v5699_v30, %v4458_v49  ;;  %v8522_v36 = vsel %vm6857_vm7, %v4460_v13, %v4461_v57  ;;  %v8534_v30 = vld [vmem:[%s6527_s25 + $0xb8] sm:$0xf] }
 0x132   : > { %v8488_v9 = vadd.f32 %v1526_v15, %v1102_v22  ;;  %v1113_v62 = vadd.f32 %v6095_v16, %v9243_v4  ;;  %v6132_v56 = vpop.f32.mrf.mxu0  ;;  %6335 = vmatmul.mubr.msk.bf16.gmra.mxu0 %vm706_vm3, %v5710_v10  ;;  %v8504_v15 = vcombine.low %v3890_v21, %v3900_v40  ;;  %v5684_v10 = vld [vmem:[%s6527_s25 + $0xa8] sm:$0xe]  ;;  %v3932_v32 = vor.u32 %v3931_v63, %v3928_v6  ;;  %v9246_v22 = vld [vmem:[#allocation9_spill] sm:$0xff] }
 0x133   : > { %v1104_v45 = vpop.f32.mrf.mxu1  ;;  %6338 = vmatprep.mubr.msk.bf16.mxu0 %vm706_vm3, %v5711_v41  ;;  %v5630_v41 = vld [vmem:[%s6527_s25 + $0xb4] sm:$0xf]  ;;  %v9245_v40 = vld [vmem:[#allocation19_spill] sm:$0xff]  ;;  %v3945_v38 = vshll.u32 %v8496_v1, 16  ;;  %v4465_v49 = vrot.slane %v8453_v27, 5  ;;  %v3942_v16 = vor.u32 %v3941_v2, %v8498_v23  ;;  %v3924_v27 = vsel %vm6571_vm4, %v8508_v43, %v8510_v17 }
 0x134   : > { %v8513_v34 = vadd.f32 %v6129_v14, %v1113_v62  ;;  %v1105_v24 = vadd.f32 %v1104_v45, %v9244_v12  ;;  %v1542_v18 = vpop.f32.mrf.mxu0  ;;  %v5700_v62 = vrot.slane %v5684_v10, 9  ;;  %v3950_v6 = vshrl.u32 %v5630_v41, 16 }
 0x135   : > { %v6098_v21 = vpop.f32.mrf.mxu1  ;;  %6301 = vmatmul.mubr.msk.bf16.gmra.mxu1 %vm706_vm3, %v9245_v40  ;;  %v3953_v63 = vshll.u32 %v5630_v41, 16  ;;  %v3959_v2 = vshll.u32 %v8534_v30, 16  ;;  %v3963_v10 = vshrl.u32 %v8534_v30, 16  ;;  %v5633_v40 = vld [vmem:[%s6527_s25 + $0xc0] sm:$0xf]  ;;  %v3933_v4 = vrot.slane %v3932_v32, 4 }
 0x136   : > { %v8536_v59 = vadd.f32 %v1529_v33, %v1105_v24  ;;  %v1126_v13 = vadd.f32 %v6098_v21, %v9246_v22  ;;  %v6133_v57 = vpop.f32.mrf.mxu0  ;;  %6304 = vmatprep.mubr.msk.bf16.mxu1 %vm706_vm3, %v8388_v46  ;;  %v9248_v24 = vld [vmem:[#allocation18_spill] sm:$0xff]  ;;  %v3947_v43 = vrot.slane %v3945_v38, 5  ;;  %v4467_v17 = vrot.slane %v4465_v49, 4 }
 0x137   : > { %v1117_v45 = vpop.f32.mrf.mxu1  ;;  %v4468_v33 = vrot.slane %v8496_v1, 5  ;;  %v8564_v14 = vsel %vm6857_vm7, %v5700_v62, %v4465_v49  ;;  %v8567_v32 = vld [vmem:[%s6527_s25 + $0xc4] sm:$0xf]  ;;  %v9252_v1 = vcombine.low %v8346_v25, %v8350_v50  ;;  %v8579_v62 = vrot.slane %v3959_v2, 5 }
 0x138   : > { %v8548_v12 = vadd.f32 %v6132_v56, %v1126_v13  ;;  %v1118_v21 = vadd.f32 %v1117_v45, %v9248_v24  ;;  %v1545_v46 = vpop.f32.mrf.mxu0  ;;  %v9250_v56 = vld [vmem:[#allocation21_spill] sm:$0xff]  ;;  %v9251_v45 = vcombine.low %v8334_v47, %v8338_v7  ;;  %v3943_v24 = vrot.slane %v3942_v16, 4  ;;  %v9253_v16 = vld [vmem:[#allocation23_spill] sm:$0xff] }
 0x139   : > { %v6099_v22 = vpop.f32.mrf.mxu1  ;;  %v3974_v47 = vshrl.u32 %v5633_v40, 16  ;;  %v3977_v7 = vshll.u32 %v5633_v40, 16  ;;  %v3938_v25 = vsel %vm6571_vm4, %v3933_v4, %v8498_v23  ;;  %v8588_v50 = vsel %vm6857_vm7, %v4467_v17, %v4468_v33  ;;  %v5685_v40 = vld [vmem:[%s6527_s25 + $0xb4] sm:$0xe] }
 0x13a   : > { %9247 = vst [vmem:[#allocation11_spill] sm:$0xff] %v8548_v12  ;;  %v8555_v35 = vadd.f32 %v1542_v18, %v1118_v21  ;;  %v1129_v41 = vadd.f32 %v6099_v22, %v9250_v56  ;;  %v6136_v13 = vpop.f32.mrf.mxu0  ;;  %6339 = vmatmul.mubr.msk.bf16.gmra.mxu0 %vm706_vm3, %v9251_v45  ;;  %v8574_v18 = vld [vmem:[%s6527_s25 + $0xbc] sm:$0x1]  ;;  %v3952_v21 = vrot.slane %v3950_v6, 4  ;;  %v3955_v22 = vrot.slane %v3953_v63, 5 }
 0x13b   : > { %v1120_v38 = vpop.f32.mrf.mxu1  ;;  %6342 = vmatprep.mubr.msk.bf16.mxu0 %vm706_vm3, %v9252_v1  ;;  %v3987_v6 = vshrl.u32 %v8567_v32, 16  ;;  %v3969_v23 = vshll.u32 %v8574_v18, 16  ;;  %v4472_v17 = vrot.slane %v8534_v30, 5  ;;  %v9254_v1 = vld [vmem:[#allocation25_spill] sm:$0xff] }
 0x13c   : > { %9249 = vst [vmem:[#allocation8_spill] sm:$0xff] %v8555_v35  ;;  %v8576_v56 = vadd.f32 %v6133_v57, %v1129_v41  ;;  %v1121_v45 = vadd.f32 %v1120_v38, %v9253_v16  ;;  %v1558_v49 = vpop.f32.mrf.mxu0  ;;  %v3965_v35 = vrot.slane %v3963_v10, 4  ;;  %v3983_v57 = vshll.u32 %v8567_v32, 16 }
 0x13d   : > { %v6102_v12 = vpop.f32.mrf.mxu1  ;;  %6305 = vmatmul.mubr.msk.bf16.gmra.mxu1 %vm706_vm3, %v8390_v61  ;;  %v3948_v61 = vsel %vm6571_vm4, %v3943_v24, %v3947_v43  ;;  %v3956_v33 = vor.u32 %v3955_v22, %v3952_v21  ;;  %v3976_v41 = vrot.slane %v3974_v47, 4  ;;  %v3979_v38 = vrot.slane %v3977_v7, 5 }
 0x13e   : > { %v8592_v63 = vadd.f32 %v1545_v46, %v1121_v45  ;;  %v1142_v2 = vadd.f32 %v6102_v12, %v8298_v28  ;;  %v6137_v10 = vpop.f32.mrf.mxu0  ;;  %6308 = vmatprep.mubr.msk.bf16.mxu1 %vm706_vm3, %v8396_v60  ;;  %v9255_v60 = vsel %vm6571_vm4, %v8486_v51, %v8450_v52  ;;  %v3966_v24 = vor.u32 %v3965_v35, %v8579_v62 }
 0x13f   : > { %v1133_v4 = vpop.f32.mrf.mxu1  ;;  %v8610_v43 = vcombine.low %v9255_v60, %v3924_v27  ;;  %v8613_v30 = vcombine.low %v3938_v25, %v3948_v61  ;;  %v8617_v22 = vrot.slane %v3983_v57, 5  ;;  %v3989_v47 = vrot.slane %v3987_v6, 4  ;;  %v5635_v27 = vld [vmem:[%s6527_s25 + $0xc8] sm:$0x1] }
 0x140   : > { %v8602_v46 = vadd.f32 %v6136_v13, %v1142_v2  ;;  %v1134_v28 = vadd.f32 %v1133_v4, %v9254_v1  ;;  %v1561_v12 = vpop.f32.mrf.mxu0  ;;  %v5717_v13 = vcombine.low %v8564_v14, %v8588_v50  ;;  %v9256_v52 = vcombine.low %v8416_v3, %v8438_v20  ;;  %v5636_v14 = vld [vmem:[%s6527_s25 + $0xcc] sm:$0xf]  ;;  %v8638_v20 = vld [vmem:[%s6527_s25 + $0xd0] sm:$0xf]  ;;  %v5686_v4 = vld [vmem:[%s6527_s25 + $0xc0] sm:$0xe] }
 0x141   : > { %v6103_v21 = vpop.f32.mrf.mxu1  ;;  %v8626_v35 = vrot.slane %v3969_v23, 5  ;;  %v5701_v51 = vrot.slane %v5685_v40, 9  ;;  %v9257_v50 = vcombine.low %v8448_v53, %v8478_v39  ;;  %v4475_v57 = vrot.slane %v8574_v18, 5 }
 0x142   : > { %v8619_v7 = vadd.f32 %v1558_v49, %v1134_v28  ;;  %v1145_v16 = vadd.f32 %v6103_v21, %v8321_v19  ;;  %v6140_v45 = vpop.f32.mrf.mxu0  ;;  %6343 = vmatmul.mubr.msk.bf16.gmra.mxu0 %vm706_vm3, %v9256_v52  ;;  %v8634_v49 = vrot.slane %v3956_v33, 4  ;;  %v4474_v19 = vrot.slane %v4472_v17, 4 }
 0x143   : > { %v1136_v25 = vpop.f32.mrf.mxu1  ;;  %6346 = vmatprep.mubr.msk.bf16.mxu0 %vm706_vm3, %v9257_v50  ;;  %v3980_v3 = vor.u32 %v3979_v38, %v3976_v41  ;;  %v8643_v23 = vrot.slane %v3966_v24, 4  ;;  %v4479_v53 = vrot.slane %v8567_v32, 5  ;;  %v3990_v33 = vor.u32 %v3989_v47, %v8617_v22 }
 0x144   : > { %v8640_v6 = vadd.f32 %v6137_v10, %v1145_v16  ;;  %v1137_v2 = vadd.f32 %v1136_v25, %v8353_v26  ;;  %v1574_v61 = vpop.f32.mrf.mxu0  ;;  %v3993_v18 = vshll.u32 %v5635_v27, 16  ;;  %v3998_v40 = vshrl.u32 %v5636_v14, 16  ;;  %v9260_v10 = vld [vmem:[#allocation4_spill] sm:$0xff]  ;;  %v9261_v16 = vld [vmem:[#allocation3_spill] sm:$0xff] }
 0x145   : > { %v6106_v39 = vpop.f32.mrf.mxu1  ;;  %6309 = vmatmul.mubr.msk.bf16.gmra.mxu1 %vm706_vm3, %v8425_v48  ;;  %v4001_v41 = vshll.u32 %v5636_v14, 16  ;;  %v4007_v28 = vshll.u32 %v8638_v20, 16  ;;  %v4011_v32 = vshrl.u32 %v8638_v20, 16  ;;  %v4473_v48 = vsel %vm6857_vm7, %v5701_v51, %v4472_v17  ;;  %v9262_v17 = vld [vmem:[#allocation6_spill] sm:$0xff] }
 0x146   : > { %9258 = vst [vmem:[#allocation16_spill] sm:$0xff] %v8640_v6  ;;  %v8650_v38 = vadd.f32 %v1561_v12, %v1137_v2  ;;  %v1158_v1 = vadd.f32 %v6106_v39, %v9260_v10  ;;  %v6141_v26 = vpop.f32.mrf.mxu0  ;;  %6312 = vmatprep.mubr.msk.bf16.mxu1 %vm706_vm3, %v8504_v15  ;;  %v4476_v24 = vsel %vm6857_vm7, %v4474_v19, %v4475_v57  ;;  %v3981_v21 = vrot.slane %v3980_v3, 4 }
 0x147   : > { %v1149_v60 = vpop.f32.mrf.mxu1  ;;  %v5702_v12 = vrot.slane %v5686_v4, 9  ;;  %v4481_v25 = vrot.slane %v4479_v53, 4  ;;  %v4482_v15 = vrot.slane %v5635_v27, 5  ;;  %v3991_v2 = vrot.slane %v3990_v33, 4  ;;  %v5638_v33 = vld [vmem:[%s6527_s25 + $0xd4] sm:$0x1] }
 0x148   : > { %9259 = vst [vmem:[#allocation12_spill] sm:$0xff] %v8650_v38  ;;  %v8661_v47 = vadd.f32 %v6140_v45, %v1158_v1  ;;  %v1150_v52 = vadd.f32 %v1149_v60, %v9261_v16  ;;  %v1577_v14 = vpop.f32.mrf.mxu0  ;;  %v3995_v39 = vrot.slane %v3993_v18, 5  ;;  %v4000_v10 = vrot.slane %v3998_v40, 4  ;;  %v9264_v18 = vld [vmem:[#allocation5_spill] sm:$0xff] }
 0x149   : > { %v6107_v50 = vpop.f32.mrf.mxu1  ;;  %v4003_v38 = vrot.slane %v4001_v41, 5  ;;  %v9263_v45 = vcombine.low %v8518_v58, %v8522_v36  ;;  %v8671_v57 = vrot.slane %v4007_v28, 5  ;;  %v4013_v27 = vrot.slane %v4011_v32, 4 }
 0x14a   : > { %v8664_v6 = vadd.f32 %v1574_v61, %v1150_v52  ;;  %v1161_v51 = vadd.f32 %v6107_v50, %v9262_v17  ;;  %v6144_v19 = vpop.f32.mrf.mxu0  ;;  %v3962_v61 = vsel %vm6571_vm4, %v8634_v49, %v8579_v62  ;;  %v3972_v4 = vsel %vm6571_vm4, %v8643_v23, %v8626_v35  ;;  %v5687_v62 = vld [vmem:[%s6527_s25 + $0xcc] sm:$0xe] }
 0x14b   : > { %6347 = vmatmul.mubr.msk.bf16.gmra.mxu0 %vm706_vm3, %v9263_v45  ;;  %v1152_v3 = vpop.f32.mrf.mxu1  ;;  %v4486_v58 = vrot.slane %v8638_v20, 5  ;;  %v4483_v1 = vsel %vm6857_vm7, %v4481_v25, %v4482_v15  ;;  %v5718_v35 = vcombine.low %v4473_v48, %v4476_v24  ;;  %v3986_v20 = vsel %vm6571_vm4, %v3981_v21, %v8617_v22  ;;  %v9266_v25 = vld [vmem:[#allocation10_spill] sm:$0xff] }
 0x14c   : > { %6350 = vmatprep.mubr.msk.bf16.mxu0 %vm706_vm3, %v5717_v13  ;;  %v8684_v36 = vadd.f32 %v6141_v26, %v1161_v51  ;;  %v1153_v40 = vadd.f32 %v1152_v3, %v9264_v18  ;;  %v1590_v41 = vpop.f32.mrf.mxu0  ;;  %v4480_v13 = vsel %vm6857_vm7, %v5702_v12, %v4479_v53  ;;  %v3996_v23 = vsel %vm6571_vm4, %v3991_v2, %v3995_v39  ;;  %v9265_v53 = vld [vmem:[#allocation7_spill] sm:$0xff] }
 0x14d   : > { %v6110_v49 = vpop.f32.mrf.mxu1  ;;  %6313 = vmatmul.mubr.msk.bf16.gmra.mxu1 %vm706_vm3, %v8610_v43  ;;  %v4004_v26 = vor.u32 %v4003_v38, %v4000_v10  ;;  %v4014_v12 = vor.u32 %v4013_v27, %v8671_v57  ;;  %v4017_v43 = vshll.u32 %v5638_v33, 16  ;;  %v5719_v24 = vcombine.low %v4480_v13, %v4483_v1 }
 0x14e   : > { %v8699_v28 = vadd.f32 %v1577_v14, %v1153_v40  ;;  %v1174_v32 = vadd.f32 %v6110_v49, %v9265_v53  ;;  %v6145_v60 = vpop.f32.mrf.mxu0  ;;  %6316 = vmatprep.mubr.msk.bf16.mxu1 %vm706_vm3, %v8613_v30  ;;  %v5703_v16 = vrot.slane %v5687_v62, 9  ;;  %v4488_v52 = vrot.slane %v4486_v58, 4  ;;  %v9267_v30 = vld [vmem:[#allocation13_spill] sm:$0xff] }
 0x14f   : > { %v1165_v48 = vpop.f32.mrf.mxu1  ;;  %v4489_v22 = vrot.slane %v5638_v33, 5  ;;  %v5653_v50 = vcombine.low %v3962_v61, %v3972_v4  ;;  %v5654_v2 = vcombine.low %v3986_v20, %v3996_v23  ;;  %v4005_v39 = vrot.slane %v4004_v26, 4  ;;  %v9268_v33 = vld [vmem:[#allocation15_spill] sm:$0xff]  ;;  %v9269_v62 = vld [vmem:[#allocation17_spill] sm:$0xff]  ;;  %v9270_v26 = vld [vmem:[#allocation20_spill] sm:$0xff] }
 0x150   : > { %v8705_v21 = vadd.f32 %v6144_v19, %v1174_v32  ;;  %v1166_v38 = vadd.f32 %v1165_v48, %v9266_v25  ;;  %v1593_v14 = vpop.f32.mrf.mxu0  ;;  %v4015_v45 = vrot.slane %v4014_v12, 4  ;;  %v4019_v27 = vrot.slane %v4017_v43, 5  ;;  %v9271_v43 = vld [vmem:[#allocation22_spill] sm:$0xff] }
 0x151   : > { %v6111_v15 = vpop.f32.mrf.mxu1  ;;  %v4487_v19 = vsel %vm6857_vm7, %v5703_v16, %v4486_v58  ;;  %v4490_v61 = vsel %vm6857_vm7, %v4488_v52, %v4489_v22  ;;  %v4010_v13 = vsel %vm6571_vm4, %v4005_v39, %v8671_v57 }
 0x152   : > { %v8708_v10 = vadd.f32 %v1590_v41, %v1166_v38  ;;  %v1177_v17 = vadd.f32 %v6111_v15, %v9267_v30  ;;  %v6148_v51 = vpop.f32.mrf.mxu0  ;;  %v4020_v0 = vsel %vm6571_vm4, %v4015_v45, %v4019_v27 }
 0x153   : > { %6351 = vmatmul.mubr.msk.bf16.gmra.mxu0 %vm706_vm3, %v5718_v35  ;;  %v1168_v3 = vpop.f32.mrf.mxu1  ;;  %v5720_v35 = vcombine.low %v4487_v19, %v4490_v61  ;;  %v5655_v12 = vcombine.low %v4010_v13, %v4020_v0 }
 0x154   : > { %6354 = vmatprep.mubr.msk.bf16.mxu0 %vm706_vm3, %v5719_v24  ;;  %v8717_v4 = vadd.f32 %v6145_v60, %v1177_v17  ;;  %v1169_v18 = vadd.f32 %v1168_v3, %v9268_v33  ;;  %v1606_v40 = vpop.f32.mrf.mxu0 }
 0x155   : > { %v6114_v41 = vpop.f32.mrf.mxu1  ;;  %6317 = vmatmul.mubr.msk.bf16.gmra.mxu1 %vm706_vm3, %v5653_v50 }
 0x156   : > { %v8724_v1 = vadd.f32 %v1593_v14, %v1169_v18  ;;  %v1190_v49 = vadd.f32 %v6114_v41, %v9269_v62  ;;  %v6149_v58 = vpop.f32.mrf.mxu0  ;;  %6320 = vmatprep.mubr.msk.bf16.mxu1 %vm706_vm3, %v5654_v2 }
 0x157   : > { %v1181_v20 = vpop.f32.mrf.mxu1 }
 0x158   : > { %v8730_v23 = vadd.f32 %v6148_v51, %v1190_v49  ;;  %v1182_v53 = vadd.f32 %v1181_v20, %v9270_v26  ;;  %v1609_v32 = vpop.f32.mrf.mxu0 }
 0x159   : > { %v6115_v60 = vpop.f32.mrf.mxu1 }
 0x15a   : > { %v8733_v57 = vadd.f32 %v1606_v40, %v1182_v53  ;;  %v1193_v48 = vadd.f32 %v6115_v60, %v9271_v43  ;;  %v6152_v24 = vpop.f32.mrf.mxu0 }
 0x15b   : > { %6355 = vmatmul.mubr.msk.bf16.gmra.mxu0 %vm706_vm3, %v5720_v35  ;;  %v1184_v16 = vpop.f32.mrf.mxu1 }
 0x15c   : > { %v8737_v52 = vadd.f32 %v6149_v58, %v1193_v48  ;;  %v1185_v22 = vadd.f32 %v1184_v16, %v9272_v31  ;;  %v1622_v25 = vpop.f32.mrf.mxu0 }
 0x15d   : > { %v6118_v38 = vpop.f32.mrf.mxu1  ;;  %6321 = vmatmul.mubr.msk.bf16.gmra.mxu1 %vm706_vm3, %v5655_v12 }
 0x15e   : > { %v8741_v14 = vadd.f32 %v1609_v32, %v1185_v22  ;;  %v1206_v15 = vadd.f32 %v6118_v38, %v8313_v42  ;;  %v6153_v50 = vpop.f32.mrf.mxu0 }
 0x15f   : > { %v1197_v2 = vpop.f32.mrf.mxu1 }
 0x160   : > { %v8744_v39 = vadd.f32 %v6152_v24, %v1206_v15  ;;  %v1198_v30 = vadd.f32 %v1197_v2, %v8340_v44  ;;  %v1625_v17 = vpop.f32.mrf.mxu0 }
 0x161   : > { %v6119_v51 = vpop.f32.mrf.mxu1 }
 0x162   : > { %v8747_v45 = vadd.f32 %v1622_v25, %v1198_v30  ;;  %v1209_v27 = vadd.f32 %v6119_v51, %v8355_v8  ;;  %v6192_v3 = vpop.f32.mrf.mxu0  ;;  %v9273_v30 = vld [vmem:[#allocation11_spill] sm:$0xff] }
 0x163   : > { %v1200_v19 = vpop.f32.mrf.mxu1 }
 0x164   : > { %v8750_v61 = vadd.f32 %v6153_v50, %v1209_v27  ;;  %v1201_v33 = vadd.f32 %v1200_v19, %v8377_v55  ;;  %v2598_v18 = vpop.f32.mrf.mxu0 }
 0x165   : > { %v6158_v42 = vpop.f32.mrf.mxu1 }
 0x166   : > { %v8753_v40 = vadd.f32 %v1625_v17, %v1201_v33  ;;  %v2001_v41 = vadd.f32 %v6158_v42, %v8422_v5  ;;  %v6193_v13 = vpop.f32.mrf.mxu0 }
 0x167   : > { %v1872_v44 = vpop.f32.mrf.mxu1 }
 0x168   : > { %v8756_v62 = vadd.f32 %v6192_v3, %v2001_v41  ;;  %v1999_v49 = vadd.f32 %v1872_v44, %v8429_v37  ;;  %v2601_v58 = vpop.f32.mrf.mxu0  ;;  %v9274_v3 = vld [vmem:[#allocation8_spill] sm:$0xff] }
 0x169   : > { %v6159_v8 = vpop.f32.mrf.mxu1 }
 0x16a   : > { %v8759_v0 = vadd.f32 %v2598_v18, %v1999_v49  ;;  %v2002_v35 = vadd.f32 %v6159_v8, %v8455_v54  ;;  %v6196_v20 = vpop.f32.mrf.mxu0 }
 0x16b   : > { %v1875_v55 = vpop.f32.mrf.mxu1 }
 0x16c   : > { %v8762_v26 = vadd.f32 %v6193_v13, %v2002_v35  ;;  %v2000_v53 = vadd.f32 %v1875_v55, %v8469_v11  ;;  %v2614_v32 = vpop.f32.mrf.mxu0 }
 0x16d   : > { %v6162_v5 = vpop.f32.mrf.mxu1 }
 0x16e   : > { %v8765_v60 = vadd.f32 %v2601_v58, %v2000_v53  ;;  %v2005_v12 = vadd.f32 %v6162_v5, %v8481_v29  ;;  %v6197_v43 = vpop.f32.mrf.mxu0 }
 0x16f   : > { %v1888_v37 = vpop.f32.mrf.mxu1 }
 0x170   : > { %v8768_v48 = vadd.f32 %v6196_v20, %v2005_v12  ;;  %v2003_v24 = vadd.f32 %v1888_v37, %v8488_v9  ;;  %v2617_v16 = vpop.f32.mrf.mxu0 }
 0x171   : > { %v6163_v54 = vpop.f32.mrf.mxu1 }
 0x172   : > { %v8771_v31 = vadd.f32 %v2614_v32, %v2003_v24  ;;  %v2006_v22 = vadd.f32 %v6163_v54, %v8513_v34  ;;  %v6200_v25 = vpop.f32.mrf.mxu0  ;;  %v9276_v54 = vld [vmem:[#allocation12_spill] sm:$0xff] }
 0x173   : > { %v1891_v11 = vpop.f32.mrf.mxu1 }
 0x174   : > { %v8774_v38 = vadd.f32 %v6197_v43, %v2006_v22  ;;  %v2004_v15 = vadd.f32 %v1891_v11, %v8536_v59  ;;  %v2630_v50 = vpop.f32.mrf.mxu0  ;;  %v9275_v43 = vld [vmem:[#allocation16_spill] sm:$0xff] }
 0x175   : > { %v6166_v29 = vpop.f32.mrf.mxu1 }
 0x176   : > { %v8777_v2 = vadd.f32 %v2617_v16, %v2004_v15  ;;  %v2009_v17 = vadd.f32 %v6166_v29, %v9273_v30  ;;  %v6201_v51 = vpop.f32.mrf.mxu0 }
 0x177   : > { %v1904_v9 = vpop.f32.mrf.mxu1 }
 0x178   : > { %v8780_v27 = vadd.f32 %v6200_v25, %v2009_v17  ;;  %v2007_v19 = vadd.f32 %v1904_v9, %v9274_v3  ;;  %v2633_v33 = vpop.f32.mrf.mxu0 }
 0x179   : > { %v6167_v34 = vpop.f32.mrf.mxu1 }
 0x17a   : > { %v8783_v18 = vadd.f32 %v2630_v50, %v2007_v19  ;;  %v2010_v42 = vadd.f32 %v6167_v34, %v8576_v56  ;;  %v6204_v41 = vpop.f32.mrf.mxu0 }
 0x17b   : > { %v1907_v59 = vpop.f32.mrf.mxu1 }
 0x17c   : > { %v8786_v13 = vadd.f32 %v6201_v51, %v2010_v42  ;;  %v2008_v44 = vadd.f32 %v1907_v59, %v8592_v63  ;;  %v2646_v49 = vpop.f32.mrf.mxu0 }
 0x17d   : > { %v6170_v58 = vpop.f32.mrf.mxu1 }
 0x17e   : > { %v8789_v8 = vadd.f32 %v2633_v33, %v2008_v44  ;;  %v2013_v35 = vadd.f32 %v6170_v58, %v8602_v46  ;;  %v6205_v20 = vpop.f32.mrf.mxu0 }
 0x17f   : > { %v1920_v55 = vpop.f32.mrf.mxu1 }
 0x180   : > { %v8792_v53 = vadd.f32 %v6204_v41, %v2013_v35  ;;  %v2011_v32 = vadd.f32 %v1920_v55, %v8619_v7  ;;  %v2649_v5 = vpop.f32.mrf.mxu0 }
 0x181   : > { %v6171_v56 = vpop.f32.mrf.mxu1 }
 0x182   : > { %v8795_v12 = vadd.f32 %v2646_v49, %v2011_v32  ;;  %v2014_v37 = vadd.f32 %v6171_v56, %v9275_v43  ;;  %v6208_v24 = vpop.f32.mrf.mxu0 }
 0x183   : > { %v1923_v63 = vpop.f32.mrf.mxu1 }
 0x184   : > { %v8798_v16 = vadd.f32 %v6205_v20, %v2014_v37  ;;  %v2012_v22 = vadd.f32 %v1923_v63, %v9276_v54  ;;  %v2662_v25 = vpop.f32.mrf.mxu0 }
 0x185   : > { %v6174_v46 = vpop.f32.mrf.mxu1 }
 0x186   : > { %v8801_v11 = vadd.f32 %v2649_v5, %v2012_v22  ;;  %v2017_v15 = vadd.f32 %v6174_v46, %v8661_v47  ;;  %v6209_v50 = vpop.f32.mrf.mxu0 }
 0x187   : > { %v1936_v7 = vpop.f32.mrf.mxu1 }
 0x188   : > { %v8804_v29 = vadd.f32 %v6208_v24, %v2017_v15  ;;  %v2015_v30 = vadd.f32 %v1936_v7, %v8664_v6  ;;  %v2665_v17 = vpop.f32.mrf.mxu0 }
 0x189   : > { %v6175_v51 = vpop.f32.mrf.mxu1 }
 0x18a   : > { %v8807_v9 = vadd.f32 %v2662_v25, %v2015_v30  ;;  %v2018_v3 = vadd.f32 %v6175_v51, %v8684_v36  ;;  %v6212_v19 = vpop.f32.mrf.mxu0 }
 0x18b   : > { %v1939_v33 = vpop.f32.mrf.mxu1 }
 0x18c   : > { %v8810_v34 = vadd.f32 %v6209_v50, %v2018_v3  ;;  %v2016_v42 = vadd.f32 %v1939_v33, %v8699_v28  ;;  %v2678_v41 = vpop.f32.mrf.mxu0 }
 0x18d   : > { %v6178_v47 = vpop.f32.mrf.mxu1 }
 0x18e   : > { %v8813_v59 = vadd.f32 %v2665_v17, %v2016_v42  ;;  %v2021_v44 = vadd.f32 %v6178_v47, %v8705_v21  ;;  %v6213_v49 = vpop.f32.mrf.mxu0 }
 0x18f   : > { %v1952_v6 = vpop.f32.mrf.mxu1 }
 0x190   : > { %v8816_v58 = vadd.f32 %v6212_v19, %v2021_v44  ;;  %v2019_v35 = vadd.f32 %v1952_v6, %v8708_v10  ;;  %v2681_v20 = vpop.f32.mrf.mxu0 }
 0x191   : > { %v6179_v36 = vpop.f32.mrf.mxu1 }
 0x192   : > { %v8819_v55 = vadd.f32 %v2678_v41, %v2019_v35  ;;  %v2022_v32 = vadd.f32 %v6179_v36, %v8717_v4  ;;  %v6216_v5 = vpop.f32.mrf.mxu0 }
 0x193   : > { %v1955_v28 = vpop.f32.mrf.mxu1 }
 0x194   : > { %9277 = vst [vmem:[#allocation2_spill] sm:$0xff] %v8819_v55  ;;  %v8822_v56 = vadd.f32 %v6213_v49, %v2022_v32  ;;  %v2020_v43 = vadd.f32 %v1955_v28, %v8724_v1  ;;  %v2694_v37 = vpop.f32.mrf.mxu0 }
 0x195   : > { %v6182_v21 = vpop.f32.mrf.mxu1 }
 0x196   : > { %9278 = vst [vmem:[#allocation14_spill] sm:$0xff] %v8822_v56  ;;  %v8825_v24 = vadd.f32 %v2681_v20, %v2020_v43  ;;  %v2025_v63 = vadd.f32 %v6182_v21, %v8730_v23  ;;  %v6217_v54 = vpop.f32.mrf.mxu0 }
 0x197   : > { %v1968_v10 = vpop.f32.mrf.mxu1 }
 0x198   : > { %9279 = vst [vmem:[#allocation19_spill] sm:$0xff] %v8825_v24  ;;  %v8828_v22 = vadd.f32 %v6216_v5, %v2025_v63  ;;  %v2023_v25 = vadd.f32 %v1968_v10, %v8733_v57  ;;  %v2697_v46 = vpop.f32.mrf.mxu0 }
 0x199   : > { %v6183_v4 = vpop.f32.mrf.mxu1 }
 0x19a   : > { %v8831_v15 = vadd.f32 %v2694_v37, %v2023_v25  ;;  %v2026_v50 = vadd.f32 %v6183_v4, %v8737_v52  ;;  %v6220_v7 = vpop.f32.mrf.mxu0 }
 0x19b   : > { %v1971_v1 = vpop.f32.mrf.mxu1 }
 0x19c   : > { %9280 = vst [vmem:[#allocation9_spill] sm:$0xff] %v8831_v15  ;;  %v8834_v30 = vadd.f32 %v6217_v54, %v2026_v50  ;;  %v2024_v17 = vadd.f32 %v1971_v1, %v8741_v14  ;;  %v2710_v51 = vpop.f32.mrf.mxu0 }
 0x19d   : > { %v6186_v23 = vpop.f32.mrf.mxu1 }
 0x19e   : > { %9281 = vst [vmem:[#allocation18_spill] sm:$0xff] %v8834_v30  ;;  %v8837_v3 = vadd.f32 %v2697_v46, %v2024_v17  ;;  %v2029_v19 = vadd.f32 %v6186_v23, %v8744_v39  ;;  %v6221_v33 = vpop.f32.mrf.mxu0 }
 0x19f   : > { %v1984_v57 = vpop.f32.mrf.mxu1 }
 0x1a0   : > { %9282 = vst [vmem:[#allocation21_spill] sm:$0xff] %v8837_v3  ;;  %v8840_v42 = vadd.f32 %v6220_v7, %v2029_v19  ;;  %v2027_v41 = vadd.f32 %v1984_v57, %v8747_v45  ;;  %v2713_v47 = vpop.f32.mrf.mxu0 }
 0x1a1   : > { %v6187_v52 = vpop.f32.mrf.mxu1 }
 0x1a2   : > { %v8843_v44 = vadd.f32 %v2710_v51, %v2027_v41  ;;  %v2030_v49 = vadd.f32 %v6187_v52, %v8750_v61  ;;  %v6260_v6 = vpop.f32.mrf.mxu0 }
 0x1a3   : > { %v1987_v14 = vpop.f32.mrf.mxu1 }
 0x1a4   : > { %9283 = vst [vmem:[#allocation23_spill] sm:$0xff] %v8843_v44  ;;  %v8846_v35 = vadd.f32 %v6221_v33, %v2030_v49  ;;  %v2028_v20 = vadd.f32 %v1987_v14, %v8753_v40  ;;  %v3430_v36 = vpop.f32.mrf.mxu0 }
 0x1a5   : > { %v6226_v39 = vpop.f32.mrf.mxu1 }
 0x1a6   : > { %9284 = vst [vmem:[#allocation25_spill] sm:$0xff] %v8846_v35  ;;  %v8849_v32 = vadd.f32 %v2713_v47, %v2028_v20  ;;  %v3197_v5 = vadd.f32 %v6226_v39, %v8756_v62  ;;  %v8852_v28 = vpop.f32.mrf.mxu0 }
 0x1a7   : > { %v3068_v45 = vpop.f32.mrf.mxu1 }
 0x1a8   : > { %9285 = vst [vmem:[#allocation4_spill] sm:$0xff] %v8849_v32  ;;  %v8854_v43 = vadd.f32 %v6260_v6, %v3197_v5  ;;  %v3195_v37 = vadd.f32 %v3068_v45, %v8759_v0  ;;  %v8857_v61 = vpop.f32.mrf.mxu0 }
 0x1a9   : > { %v8859_v21 = vpop.f32.mrf.mxu1 }
 0x1aa   : > { %v8861_v63 = vadd.f32 %v3430_v36, %v3195_v37  ;;  %v6264_v40 = vpop.f32.mrf.mxu0 }
 0x1ab   : > { %v8863_v54 = vpop.f32.mrf.mxu1 }
 0x1ac   : > { %v8865_v10 = vpop.f32.mrf.mxu0 }
 0x1ad   : > { %v6230_v25 = vpop.f32.mrf.mxu1 }
 0x1ae   : > { %v3201_v62 = vadd.f32 %v6230_v25, %v8768_v48  ;;  %v8868_v46 = vpop.f32.mrf.mxu0 }
 0x1af   : > { %v8870_v4 = vpop.f32.mrf.mxu1 }
 0x1b0   : > { %v8872_v50 = vadd.f32 %v6264_v40, %v3201_v62  ;;  %v8874_v0 = vpop.f32.mrf.mxu0 }
 0x1b1   : > { %v8876_v7 = vpop.f32.mrf.mxu1 }
 0x1b2   : > { %v6268_v1 = vpop.f32.mrf.mxu0 }
 0x1b3   : > { %v8878_v17 = vpop.f32.mrf.mxu1 }
 0x1b4   : > { %v8880_v51 = vpop.f32.mrf.mxu0 }
 0x1b5   : > { %v6234_v23 = vpop.f32.mrf.mxu1 }
 0x1b6   : > { %v3205_v19 = vadd.f32 %v6234_v23, %v8780_v27  ;;  %v8883_v33 = vpop.f32.mrf.mxu0 }
 0x1b7   : > { %v8885_v48 = vpop.f32.mrf.mxu1 }
 0x1b8   : > { %v8887_v57 = vadd.f32 %v6268_v1, %v3205_v19  ;;  %v8889_v41 = vpop.f32.mrf.mxu0 }
 0x1b9   : > { %v8891_v47 = vpop.f32.mrf.mxu1 }
 0x1ba   : > { %v6272_v52 = vpop.f32.mrf.mxu0 }
 0x1bb   : > { %v8893_v49 = vpop.f32.mrf.mxu1 }
 0x1bc   : > { %v8895_v6 = vpop.f32.mrf.mxu0 }
 0x1bd   : > { %v6238_v14 = vpop.f32.mrf.mxu1 }
 0x1be   : > { %v3209_v20 = vadd.f32 %v6238_v14, %v8792_v53  ;;  %v8898_v36 = vpop.f32.mrf.mxu0 }
 0x1bf   : > { %v8900_v27 = vpop.f32.mrf.mxu1 }
 0x1c0   : > { %v8902_v39 = vadd.f32 %v6272_v52, %v3209_v20  ;;  %v8904_v5 = vpop.f32.mrf.mxu0 }
 0x1c1   : > { %v8906_v45 = vpop.f32.mrf.mxu1 }
 0x1c2   : > { %v6276_v37 = vpop.f32.mrf.mxu0 }
 0x1c3   : > { %v8908_v40 = vpop.f32.mrf.mxu1 }
 0x1c4   : > { %v8910_v25 = vpop.f32.mrf.mxu0 }
 0x1c5   : > { %v6242_v62 = vpop.f32.mrf.mxu1 }
 0x1c6   : > { %v3213_v1 = vadd.f32 %v6242_v62, %v8804_v29  ;;  %v8913_v23 = vpop.f32.mrf.mxu0 }
 0x1c7   : > { %v8915_v53 = vpop.f32.mrf.mxu1 }
 0x1c8   : > { %v8917_v19 = vadd.f32 %v6276_v37, %v3213_v1  ;;  %v8919_v52 = vpop.f32.mrf.mxu0 }
 0x1c9   : > { %9286 = vst [vmem:[#allocation3_spill] sm:$0xff] %v8919_v52  ;;  %v8921_v14 = vpop.f32.mrf.mxu1 }
 0x1ca   : > { %v6280_v20 = vpop.f32.mrf.mxu0 }
 0x1cb   : > { %v8923_v32 = vpop.f32.mrf.mxu1 }
 0x1cc   : > { %v8925_v35 = vpop.f32.mrf.mxu0 }
 0x1cd   : > { %9287 = vst [vmem:[#allocation6_spill] sm:$0xff] %v8925_v35  ;;  %v6246_v44 = vpop.f32.mrf.mxu1 }
 0x1ce   : > { %v3217_v3 = vadd.f32 %v6246_v44, %v8816_v58  ;;  %v8928_v30 = vpop.f32.mrf.mxu0 }
 0x1cf   : > { %9288 = vst [vmem:[#allocation5_spill] sm:$0xff] %v8928_v30  ;;  %v8930_v29 = vpop.f32.mrf.mxu1 }
 0x1d0   : > { %v8932_v62 = vadd.f32 %v6280_v20, %v3217_v3  ;;  %v8934_v37 = vpop.f32.mrf.mxu0 }
 0x1d1   : > { %9290 = vst [vmem:[#allocation10_spill] sm:$0xff] %v8934_v37  ;;  %v8936_v1 = vpop.f32.mrf.mxu1 }
 0x1d2   : > { %9289 = vst [vmem:[#allocation7_spill] sm:$0xff] %v8932_v62  ;;  %9291 = vst [vmem:[#allocation13_spill] sm:$0xff] %v8936_v1  ;;  %v6284_v15 = vpop.f32.mrf.mxu0 }
 0x1d3   : > { %v8938_v24 = vpop.f32.mrf.mxu1 }
 0x1d4   : > { %9292 = vst [vmem:[#allocation15_spill] sm:$0xff] %v8938_v24  ;;  %v8940_v56 = vpop.f32.mrf.mxu0 }
 0x1d5   : > { %9293 = vst [vmem:[#allocation17_spill] sm:$0xff] %v8940_v56  ;;  %v6250_v55 = vpop.f32.mrf.mxu1 }
 0x1d6   : > { %v3221_v35 = vadd.f32 %v6250_v55, %v8828_v22  ;;  %v8943_v52 = vpop.f32.mrf.mxu0 }
 0x1d7   : > { %9294 = vst [vmem:[#allocation20_spill] sm:$0xff] %v8943_v52  ;;  %v8945_v58 = vpop.f32.mrf.mxu1 }
 0x1d8   : > { %v8947_v44 = vadd.f32 %v6284_v15, %v3221_v35  ;;  %v8949_v3 = vpop.f32.mrf.mxu0 }
 0x1d9   : > { %9296 = vst [vmem:[#allocation24_spill] sm:$0xff] %v8949_v3  ;;  %v8951_v20 = vpop.f32.mrf.mxu1 }
 0x1da   : > { %9295 = vst [vmem:[#allocation22_spill] sm:$0xff] %v8947_v44  ;;  %9297 = vst [vmem:[#allocation11_spill] sm:$0xff] %v8951_v20  ;;  %v6288_v37 = vpop.f32.mrf.mxu0 }
 0x1db   : > { %v8953_v62 = vpop.f32.mrf.mxu1 }
 0x1dc   : > { %9298 = vst [vmem:[#allocation8_spill] sm:$0xff] %v8953_v62  ;;  %v8955_v30 = vpop.f32.mrf.mxu0 }
 0x1dd   : > { %9299 = vst [vmem:[#allocation16_spill] sm:$0xff] %v8955_v30  ;;  %v6254_v24 = vpop.f32.mrf.mxu1  ;;  %v3198_v30 = vadd.f32 %v8859_v21, %v8762_v26  ;;  %v3199_v21 = vadd.f32 %v8870_v4, %v8771_v31 }
 0x1de   : > { %v3225_v56 = vadd.f32 %v6254_v24, %v8840_v42  ;;  %v8958_v1 = vpop.f32.mrf.mxu0  ;;  %v3196_v24 = vadd.f32 %v8863_v54, %v8765_v60  ;;  %v3202_v60 = vadd.f32 %v8876_v7, %v8774_v38 }
 0x1df   : > { %9300 = vst [vmem:[#allocation12_spill] sm:$0xff] %v8958_v1  ;;  %v8960_v55 = vpop.f32.mrf.mxu1  ;;  %v3561_v38 = vadd.f32 %v8865_v10, %v3199_v21  ;;  %v3206_v21 = vadd.f32 %v8891_v47, %v8786_v13 }
 0x1e0   : > { %9301 = vst [vmem:[#allocation26_spill] sm:$0xff] %v8960_v55  ;;  %v8962_v22 = vadd.f32 %v6288_v37, %v3225_v56  ;;  %v8964_v15 = vpop.f32.mrf.mxu0  ;;  %v3560_v56 = vadd.f32 %v8852_v28, %v3198_v30  ;;  %v3564_v7 = vadd.f32 %v8868_v46, %v3202_v60 }
 0x1e1   : > { %9303 = vst [vmem:[#allocation28_spill] sm:$0xff] %v8964_v15  ;;  %v8966_v35 = vpop.f32.mrf.mxu1 }
 0x1e2   : > { %9302 = vst [vmem:[#allocation27_spill] sm:$0xff] %v8962_v22  ;;  %9304 = vst [vmem:[#allocation29_spill] sm:$0xff] %v8966_v35  ;;  %v6328_v3 = vpop.f32.mrf.mxu0 }
 0x1e3   : > { %v8968_v44 = vpop.f32.mrf.mxu1 }
 0x1e4   : > { %9305 = vst [vmem:[#allocation30_spill] sm:$0xff] %v8968_v44  ;;  %v4626_v52 = vpop.f32.mrf.mxu0  ;;  %v3558_v44 = vadd.f32 %v8857_v61, %v3196_v24 }
 0x1e5   : > { %v6294_v62 = vpop.f32.mrf.mxu1 }
 0x1e6   : > { %v6329_v42 = vpop.f32.mrf.mxu0  ;;  %v4285_v37 = vadd.f32 %v6294_v62, %v8854_v43 }
 0x1e7   : > { %v4156_v1 = vpop.f32.mrf.mxu1 }
 0x1e8   : > { %v4283_v15 = vadd.f32 %v4156_v1, %v8861_v63  ;;  %v4629_v22 = vpop.f32.mrf.mxu0  ;;  %v4755_v20 = vadd.f32 %v6328_v3, %v4285_v37  ;;  %v3200_v63 = vadd.f32 %v8878_v17, %v8777_v2 }
 0x1e9   : > { %v6295_v35 = vpop.f32.mrf.mxu1 }
 0x1ea   : > { %v4286_v55 = vadd.f32 %v6295_v35, %v3560_v56  ;;  %v6332_v26 = vpop.f32.mrf.mxu0  ;;  %v4753_v30 = vadd.f32 %v4626_v52, %v4283_v15  ;;  %v3562_v35 = vadd.f32 %v8874_v0, %v3200_v63  ;;  %v4984_v56 = vmul.f32 %v4755_v20, %v4755_v20 }
 0x1eb   : > { %v4159_v54 = vpop.f32.mrf.mxu1 }
 0x1ec   : > { %v4756_v28 = vadd.f32 %v6329_v42, %v4286_v55  ;;  %v4284_v43 = vadd.f32 %v4159_v54, %v3558_v44  ;;  %v4642_v62 = vpop.f32.mrf.mxu0  ;;  %v4982_v3 = vmul.f32 %v4753_v30, %v4753_v30 }
 0x1ed   : > { %v6298_v61 = vpop.f32.mrf.mxu1 }
 0x1ee   : > { %v5812_v31 = vpack.c.bf16 %v4756_v28, %v4755_v20  ;;  %v4754_v4 = vadd.f32 %v4629_v22, %v4284_v43  ;;  %v6333_v1 = vpop.f32.mrf.mxu0  ;;  %v4289_v52 = vadd.f32 %v6298_v61, %v8872_v50  ;;  %v3203_v22 = vadd.f32 %v8885_v48, %v8783_v18 }
 0x1ef   : > { %v4172_v44 = vpop.f32.mrf.mxu1  ;;  %v4985_v60 = vmul.f32 %v4756_v28, %v4756_v28 }
 0x1f0   : > { %5884 = vst [vmem:[%s8988_s18 + $0x8] sm:$0xff] %v5812_v31   ;;  %v5807_v2 = vpack.c.bf16 %v4754_v4, %v4753_v30  ;;  %v4945_v17 = vadd.f32 %v4754_v4, %v4753_v30  ;;  %v4983_v55 = vmul.f32 %v4754_v4, %v4754_v4  ;;  %v4645_v15 = vpop.f32.mrf.mxu0  ;;  %v4287_v24 = vadd.f32 %v4172_v44, %v3561_v38 }
 0x1f1   : > { %v6299_v42 = vpop.f32.mrf.mxu1  ;;  %v4759_v54 = vadd.f32 %v6332_v26, %v4289_v52  ;;  %v3565_v31 = vadd.f32 %v8880_v51, %v3203_v22  ;;  %v3568_v52 = vadd.f32 %v8883_v33, %v3206_v21 }
 0x1f2   : > { %5808 = vst [vmem:[%s8988_s18] sm:$0xff] %v5807_v2   ;;  %v4946_v10 = vadd.f32 %v4945_v17, %v4755_v20  ;;  %v5014_v46 = vadd.f32 %v4983_v55, %v4982_v3  ;;  %v4290_v37 = vadd.f32 %v6299_v42, %v3564_v7  ;;  %v6336_v50 = vpop.f32.mrf.mxu0  ;;  %v4757_v30 = vadd.f32 %v4642_v62, %v4287_v24 }
 0x1f3   : > { %v4175_v43 = vpop.f32.mrf.mxu1  ;;  %v3204_v20 = vadd.f32 %v8893_v49, %v8789_v8  ;;  %v4988_v24 = vmul.f32 %v4759_v54, %v4759_v54 }
 0x1f4   : > { %v5015_v61 = vadd.f32 %v5014_v46, %v4984_v56  ;;  %v4947_v0 = vadd.f32 %v4946_v10, %v4756_v28  ;;  %v4760_v63 = vadd.f32 %v6333_v1, %v4290_v37  ;;  %v4288_v18 = vadd.f32 %v4175_v43, %v3562_v35  ;;  %v4658_v48 = vpop.f32.mrf.mxu0 }
 0x1f5   : > { %v6302_v4 = vpop.f32.mrf.mxu1  ;;  %v4986_v7 = vmul.f32 %v4757_v30, %v4757_v30  ;;  %v3566_v55 = vadd.f32 %v8889_v41, %v3204_v20  ;;  %v3207_v35 = vadd.f32 %v8900_v27, %v8795_v12 }
 0x1f6   : > { %v4948_v38 = vadd.f32 %v4947_v0, %v4757_v30  ;;  %v5016_v44 = vadd.f32 %v5015_v61, %v4985_v60  ;;  %v5822_v13 = vpack.c.bf16 %v4760_v63, %v4759_v54  ;;  %v6337_v47 = vpop.f32.mrf.mxu0  ;;  %v4758_v26 = vadd.f32 %v4645_v15, %v4288_v18 }
 0x1f7   : > { %v4188_v62 = vpop.f32.mrf.mxu1  ;;  %v4293_v1 = vadd.f32 %v6302_v4, %v8887_v57  ;;  %v3210_v15 = vadd.f32 %v8906_v45, %v8798_v16  ;;  %v4989_v41 = vmul.f32 %v4760_v63, %v4760_v63  ;;  %v3569_v27 = vadd.f32 %v8895_v6, %v3207_v35 }
 0x1f8   : > { %v5017_v28 = vadd.f32 %v5016_v44, %v4986_v7  ;;  %5886 = vst [vmem:[%s8988_s18 + $0x18] sm:$0xff] %v5822_v13   ;;  %v4291_v3 = vadd.f32 %v4188_v62, %v3565_v31  ;;  %v4661_v51 = vpop.f32.mrf.mxu0  ;;  %v5817_v2 = vpack.c.bf16 %v4758_v26, %v4757_v30  ;;  %v4949_v17 = vadd.f32 %v4948_v38, %v4758_v26 }
 0x1f9   : > { %v4987_v8 = vmul.f32 %v4758_v26, %v4758_v26  ;;  %v6303_v49 = vpop.f32.mrf.mxu1  ;;  %v4763_v46 = vadd.f32 %v6336_v50, %v4293_v1  ;;  %v3208_v16 = vadd.f32 %v8908_v40, %v8801_v11  ;;  %v3572_v0 = vadd.f32 %v8898_v36, %v3210_v15 }
 0x1fa   : > { %v4294_v33 = vadd.f32 %v6303_v49, %v3568_v52  ;;  %v6340_v22 = vpop.f32.mrf.mxu0  ;;  %5885 = vst [vmem:[%s8988_s18 + $0x10] sm:$0xff] %v5817_v2   ;;  %v4950_v42 = vadd.f32 %v4949_v17, %v4759_v54  ;;  %v4761_v56 = vadd.f32 %v4658_v48, %v4291_v3  ;;  %v3211_v36 = vadd.f32 %v8915_v53, %v8807_v9 }
 0x1fb   : > { %v5018_v57 = vadd.f32 %v5017_v28, %v4987_v8  ;;  %v4191_v10 = vpop.f32.mrf.mxu1  ;;  %v3570_v40 = vadd.f32 %v8904_v5, %v3208_v16  ;;  %v3214_v13 = vadd.f32 %v8921_v14, %v8810_v34  ;;  %v4992_v62 = vmul.f32 %v4763_v46, %v4763_v46 }
 0x1fc   : > { %v4764_v37 = vadd.f32 %v6337_v47, %v4294_v33  ;;  %v4292_v21 = vadd.f32 %v4191_v10, %v3566_v55  ;;  %v4674_v60 = vpop.f32.mrf.mxu0  ;;  %v4951_v43 = vadd.f32 %v4950_v42, %v4760_v63  ;;  %v4990_v50 = vmul.f32 %v4761_v56, %v4761_v56 }
 0x1fd   : > { %v5019_v30 = vadd.f32 %v5018_v57, %v4988_v24  ;;  %v6306_v12 = vpop.f32.mrf.mxu1  ;;  %v3573_v53 = vadd.f32 %v8910_v25, %v3211_v36  ;;  %v3212_v34 = vadd.f32 %v8923_v32, %v8813_v59  ;;  %v3576_v15 = vadd.f32 %v8913_v23, %v3214_v13  ;;  %v9306_v32 = vld [vmem:[#allocation3_spill] sm:$0xff] }
 0x1fe   : > { %v5832_v45 = vpack.c.bf16 %v4764_v37, %v4763_v46  ;;  %v4762_v61 = vadd.f32 %v4661_v51, %v4292_v21  ;;  %v6341_v54 = vpop.f32.mrf.mxu0  ;;  %v4952_v18 = vadd.f32 %v4951_v43, %v4761_v56  ;;  %v4297_v63 = vadd.f32 %v6306_v12, %v8902_v39  ;;  %v9309_v43 = vld [vmem:[#allocation13_spill] sm:$0xff] }
 0x1ff   : > { %v5020_v48 = vadd.f32 %v5019_v30, %v4989_v41  ;;  %v4204_v31 = vpop.f32.mrf.mxu1  ;;  %v4993_v5 = vmul.f32 %v4764_v37, %v4764_v37  ;;  %v9307_v41 = vld [vmem:[#allocation2_spill] sm:$0xff] }
 0x200   : > { %5888 = vst [vmem:[%s8988_s18 + $0x28] sm:$0xff] %v5832_v45   ;;  %v5827_v20 = vpack.c.bf16 %v4762_v61, %v4761_v56  ;;  %v4991_v4 = vmul.f32 %v4762_v61, %v4762_v61  ;;  %v4295_v38 = vadd.f32 %v4204_v31, %v3569_v27  ;;  %v4677_v6 = vpop.f32.mrf.mxu0  ;;  %v4953_v44 = vadd.f32 %v4952_v18, %v4762_v61  ;;  %v9308_v30 = vld [vmem:[#allocation14_spill] sm:$0xff] }
 0x201   : > { %v5021_v7 = vadd.f32 %v5020_v48, %v4990_v50  ;;  %v6307_v11 = vpop.f32.mrf.mxu1  ;;  %v4767_v3 = vadd.f32 %v6340_v22, %v4297_v63  ;;  %v3215_v23 = vadd.f32 %v8930_v29, %v9307_v41  ;;  %v3218_v12 = vadd.f32 %v9309_v43, %v9308_v30  ;;  %v9320_v43 = vld [vmem:[#allocation21_spill] sm:$0xff] }
 0x202   : > { %5887 = vst [vmem:[%s8988_s18 + $0x20] sm:$0xff] %v5827_v20   ;;  %v4298_v47 = vadd.f32 %v6307_v11, %v3572_v0  ;;  %v6344_v26 = vpop.f32.mrf.mxu0  ;;  %v4954_v52 = vadd.f32 %v4953_v44, %v4763_v46  ;;  %v4765_v39 = vadd.f32 %v4674_v60, %v4295_v38  ;;  %v3574_v60 = vadd.f32 %v9306_v32, %v3212_v34  ;;  %v9310_v38 = vld [vmem:[#allocation6_spill] sm:$0xff]  ;;  %v9312_v44 = vld [vmem:[#allocation15_spill] sm:$0xff] }
 0x203   : > { %v5022_v28 = vadd.f32 %v5021_v7, %v4991_v4  ;;  %v4207_v1 = vpop.f32.mrf.mxu1  ;;  %v4996_v45 = vmul.f32 %v4767_v3, %v4767_v3  ;;  %v9311_v7 = vld [vmem:[#allocation19_spill] sm:$0xff] }
 0x204   : > { %v4768_v51 = vadd.f32 %v6341_v54, %v4298_v47  ;;  %v4296_v2 = vadd.f32 %v4207_v1, %v3570_v40  ;;  %v4690_v17 = vpop.f32.mrf.mxu0  ;;  %v4955_v49 = vadd.f32 %v4954_v52, %v4764_v37  ;;  %v4994_v22 = vmul.f32 %v4765_v39, %v4765_v39  ;;  %v9313_v47 = vld [vmem:[#allocation5_spill] sm:$0xff] }
 0x205   : > { %v5023_v8 = vadd.f32 %v5022_v28, %v4992_v62  ;;  %v6310_v9 = vpop.f32.mrf.mxu1  ;;  %v3216_v11 = vadd.f32 %v9312_v44, %v9311_v7  ;;  %v3580_v62 = vadd.f32 %v9313_v47, %v3218_v12  ;;  %v9321_v12 = vld [vmem:[#allocation8_spill] sm:$0xff] }
 0x206   : > { %v5842_v14 = vpack.c.bf16 %v4768_v51, %v4767_v3  ;;  %v4766_v55 = vadd.f32 %v4677_v6, %v4296_v2  ;;  %v6345_v35 = vpop.f32.mrf.mxu0  ;;  %v4956_v33 = vadd.f32 %v4955_v49, %v4765_v39  ;;  %v4301_v10 = vadd.f32 %v6310_v9, %v8917_v19 }
 0x207   : > { %v5024_v24 = vadd.f32 %v5023_v8, %v4993_v5  ;;  %v4220_v42 = vpop.f32.mrf.mxu1  ;;  %v4997_v20 = vmul.f32 %v4768_v51, %v4768_v51  ;;  %v3577_v6 = vadd.f32 %v9310_v38, %v3215_v23  ;;  %v9319_v23 = vld [vmem:[#allocation17_spill] sm:$0xff] }
 0x208   : > { %5890 = vst [vmem:[%s8988_s18 + $0x38] sm:$0xff] %v5842_v14   ;;  %v5837_v57 = vpack.c.bf16 %v4766_v55, %v4765_v39  ;;  %v4995_v56 = vmul.f32 %v4766_v55, %v4766_v55  ;;  %v4299_v46 = vadd.f32 %v4220_v42, %v3573_v53  ;;  %v4693_v25 = vpop.f32.mrf.mxu0  ;;  %v4957_v21 = vadd.f32 %v4956_v33, %v4766_v55  ;;  %v9315_v53 = vld [vmem:[#allocation10_spill] sm:$0xff]  ;;  %v9316_v14 = vld [vmem:[#allocation9_spill] sm:$0xff] }
 0x209   : > { %v5025_v37 = vadd.f32 %v5024_v24, %v4994_v22  ;;  %v6311_v59 = vpop.f32.mrf.mxu1  ;;  %v4771_v18 = vadd.f32 %v6344_v26, %v4301_v10  ;;  %v3578_v34 = vadd.f32 %v9315_v53, %v3216_v11  ;;  %v3219_v55 = vadd.f32 %v8945_v58, %v9316_v14  ;;  %v9324_v11 = vld [vmem:[#allocation24_spill] sm:$0xff] }
 0x20a   : > { %5889 = vst [vmem:[%s8988_s18 + $0x30] sm:$0xff] %v5837_v57   ;;  %v4302_v27 = vadd.f32 %v6311_v59, %v3576_v15  ;;  %v4958_v61 = vadd.f32 %v4957_v21, %v4767_v3  ;;  %v4769_v19 = vadd.f32 %v4690_v17, %v4299_v46  ;;  %v9318_v15 = vld [vmem:[#allocation11_spill] sm:$0xff] }
 0x20b   : > { %v6348_v16 = vpop.f32.mrf.mxu0  ;;  %v5026_v54 = vadd.f32 %v5025_v37, %v4995_v56  ;;  %v4223_v0 = vpop.f32.mrf.mxu1  ;;  %v5000_v42 = vmul.f32 %v4771_v18, %v4771_v18  ;;  %v3581_v30 = vadd.f32 %v9319_v23, %v3219_v55 }
 0x20c   : > { %v4772_v50 = vadd.f32 %v6345_v35, %v4302_v27  ;;  %v4300_v48 = vadd.f32 %v4223_v0, %v3574_v60  ;;  %v4959_v63 = vadd.f32 %v4958_v61, %v4768_v51  ;;  %v4998_v26 = vmul.f32 %v4769_v19, %v4769_v19  ;;  %v9314_v51 = vld [vmem:[#allocation7_spill] sm:$0xff]  ;;  %v9317_v35 = vld [vmem:[#allocation18_spill] sm:$0xff] }
 0x20d   : > { %v4706_v31 = vpop.f32.mrf.mxu0  ;;  %v5027_v4 = vadd.f32 %v5026_v54, %v4996_v45  ;;  %v6314_v29 = vpop.f32.mrf.mxu1  ;;  %v3222_v33 = vadd.f32 %v9318_v15, %v9317_v35  ;;  %v3220_v27 = vadd.f32 %v9321_v12, %v9320_v43  ;;  %v9329_v35 = vld [vmem:[#allocation16_spill] sm:$0xff] }
 0x20e   : > { %v5852_v40 = vpack.c.bf16 %v4772_v50, %v4771_v18  ;;  %v4770_v36 = vadd.f32 %v4693_v25, %v4300_v48  ;;  %v4960_v52 = vadd.f32 %v4959_v63, %v4769_v19  ;;  %v4305_v2 = vadd.f32 %v6314_v29, %v9314_v51 }
 0x20f   : > { %v6349_v13 = vpop.f32.mrf.mxu0  ;;  %v5028_v28 = vadd.f32 %v5027_v4, %v4997_v20  ;;  %v4236_v39 = vpop.f32.mrf.mxu1  ;;  %v5001_v32 = vmul.f32 %v4772_v50, %v4772_v50 }
 0x210   : > { %5892 = vst [vmem:[%s8988_s18 + $0x48] sm:$0xff] %v5852_v40   ;;  %v5847_v1 = vpack.c.bf16 %v4770_v36, %v4769_v19  ;;  %v4999_v3 = vmul.f32 %v4770_v36, %v4770_v36  ;;  %v4303_v17 = vadd.f32 %v4236_v39, %v3577_v6  ;;  %v4961_v49 = vadd.f32 %v4960_v52, %v4770_v36  ;;  %v9322_v19 = vld [vmem:[#allocation20_spill] sm:$0xff]  ;;  %v9325_v36 = vld [vmem:[#allocation23_spill] sm:$0xff]  ;;  %v9328_v52 = vld [vmem:[#allocation29_spill] sm:$0xff] }
 0x211   : > { %v4709_v5 = vpop.f32.mrf.mxu0  ;;  %v5029_v8 = vadd.f32 %v5028_v28, %v4998_v26  ;;  %v6315_v9 = vpop.f32.mrf.mxu1  ;;  %v4775_v25 = vadd.f32 %v6348_v16, %v4305_v2  ;;  %v3584_v0 = vadd.f32 %v9322_v19, %v3222_v33  ;;  %v3582_v40 = vadd.f32 %v9324_v11, %v3220_v27  ;;  %v9330_v33 = vld [vmem:[#allocation4_spill] sm:$0xff] }
 0x212   : > { %5891 = vst [vmem:[%s8988_s18 + $0x40] sm:$0xff] %v5847_v1   ;;  %v4306_v22 = vadd.f32 %v6315_v9, %v3580_v62  ;;  %v4962_v57 = vadd.f32 %v4961_v49, %v4771_v18  ;;  %v4773_v10 = vadd.f32 %v4706_v31, %v4303_v17  ;;  %v9327_v62 = vld [vmem:[#allocation25_spill] sm:$0xff]  ;;  %v9334_v27 = vld [vmem:[#allocation28_spill] sm:$0xff] }
 0x213   : > { %v6352_v24 = vpop.f32.mrf.mxu0  ;;  %v5030_v56 = vadd.f32 %v5029_v8, %v4999_v3  ;;  %v4239_v46 = vpop.f32.mrf.mxu1  ;;  %v3226_v26 = vadd.f32 %v9328_v52, %v9327_v62  ;;  %v5004_v1 = vmul.f32 %v4775_v25, %v4775_v25 }
 0x214   : > { %v4776_v37 = vadd.f32 %v6349_v13, %v4306_v22  ;;  %v4304_v21 = vadd.f32 %v4239_v46, %v3578_v34  ;;  %v4963_v41 = vadd.f32 %v4962_v57, %v4772_v50  ;;  %v5002_v16 = vmul.f32 %v4773_v10, %v4773_v10  ;;  %v9323_v50 = vld [vmem:[#allocation22_spill] sm:$0xff] }
 0x215   : > { %v4722_v59 = vpop.f32.mrf.mxu0  ;;  %v5031_v60 = vadd.f32 %v5030_v56, %v5000_v42  ;;  %v6318_v58 = vpop.f32.mrf.mxu1  ;;  %v9326_v13 = vld [vmem:[#allocation26_spill] sm:$0xff] }
 0x216   : > { %v5862_v45 = vpack.c.bf16 %v4776_v37, %v4775_v25  ;;  %v4774_v61 = vadd.f32 %v4709_v5, %v4304_v21  ;;  %v4964_v18 = vadd.f32 %v4963_v41, %v4773_v10  ;;  %v4309_v63 = vadd.f32 %v6318_v58, %v9323_v50  ;;  %v9331_v22 = vld [vmem:[#allocation30_spill] sm:$0xff] }
 0x217   : > { %v6353_v54 = vpop.f32.mrf.mxu0  ;;  %v5032_v48 = vadd.f32 %v5031_v60, %v5001_v32  ;;  %v4252_v31 = vpop.f32.mrf.mxu1  ;;  %v3223_v47 = vadd.f32 %v9326_v13, %v9325_v36  ;;  %v5005_v9 = vmul.f32 %v4776_v37, %v4776_v37  ;;  %v3224_v42 = vadd.f32 %v9331_v22, %v9330_v33 }
 0x218   : > { %5894 = vst [vmem:[%s8988_s18 + $0x58] sm:$0xff] %v5862_v45   ;;  %v5857_v20 = vpack.c.bf16 %v4774_v61, %v4773_v10  ;;  %v5003_v4 = vmul.f32 %v4774_v61, %v4774_v61  ;;  %v4307_v29 = vadd.f32 %v4252_v31, %v3581_v30  ;;  %v4965_v7 = vadd.f32 %v4964_v18, %v4774_v61  ;;  %v9332_v10 = vld [vmem:[#allocation12_spill] sm:$0xff] }
 0x219   : > { %v4725_v38 = vpop.f32.mrf.mxu0  ;;  %v5033_v6 = vadd.f32 %v5032_v48, %v5002_v16  ;;  %v6319_v44 = vpop.f32.mrf.mxu1  ;;  %v4779_v5 = vadd.f32 %v6352_v24, %v4309_v63  ;;  %v3585_v15 = vadd.f32 %v9329_v35, %v3223_v47  ;;  %v3588_v46 = vadd.f32 %v9332_v10, %v3226_v26 }
 0x21a   : > { %5893 = vst [vmem:[%s8988_s18 + $0x50] sm:$0xff] %v5857_v20   ;;  %v4310_v28 = vadd.f32 %v6319_v44, %v3584_v0  ;;  %v4966_v3 = vadd.f32 %v4965_v7, %v4775_v25  ;;  %v4777_v2 = vadd.f32 %v4722_v59, %v4307_v29  ;;  %v3586_v45 = vadd.f32 %v9334_v27, %v3224_v42 }
 0x21b   : > { %v6356_v39 = vpop.f32.mrf.mxu0  ;;  %v5034_v51 = vadd.f32 %v5033_v6, %v5003_v4  ;;  %v4255_v17 = vpop.f32.mrf.mxu1 }
 0x21c   : > { %v4780_v8 = vadd.f32 %v6353_v54, %v4310_v28  ;;  %v4308_v49 = vadd.f32 %v4255_v17, %v3582_v40  ;;  %v4967_v34 = vadd.f32 %v4966_v3, %v4776_v37  ;;  %v5006_v24 = vmul.f32 %v4777_v2, %v4777_v2  ;;  %v9333_v37 = vld [vmem:[#allocation27_spill] sm:$0xff] }
 0x21d   : > { %v5035_v53 = vadd.f32 %v5034_v51, %v5004_v1  ;;  %v6322_v14 = vpop.f32.mrf.mxu1  ;;  %v4738_v55 = vpop.f32.mrf.mxu0  ;;  %v5008_v54 = vmul.f32 %v4779_v5, %v4779_v5 }
 0x21e   : > { %v5872_v57 = vpack.c.bf16 %v4780_v8, %v4779_v5  ;;  %v4778_v56 = vadd.f32 %v4725_v38, %v4308_v49  ;;  %v4968_v25 = vadd.f32 %v4967_v34, %v4777_v2  ;;  %v4313_v41 = vadd.f32 %v6322_v14, %v9333_v37 }
 0x21f   : > { %v5036_v21 = vadd.f32 %v5035_v53, %v5005_v9  ;;  %v4268_v59 = vpop.f32.mrf.mxu1  ;;  %v6357_v12 = vpop.f32.mrf.mxu0  ;;  %v5009_v4 = vmul.f32 %v4780_v8, %v4780_v8 }
 0x220   : > { %5896 = vst [vmem:[%s8988_s18 + $0x68] sm:$0xff] %v5872_v57   ;;  %v5867_v32 = vpack.c.bf16 %v4778_v56, %v4777_v2  ;;  %v5007_v60 = vmul.f32 %v4778_v56, %v4778_v56  ;;  %v4311_v58 = vadd.f32 %v4268_v59, %v3585_v15  ;;  %v4969_v30 = vadd.f32 %v4968_v25, %v4778_v56 }
 0x221   : > { %v5037_v23 = vadd.f32 %v5036_v21, %v5006_v24  ;;  %v6323_v43 = vpop.f32.mrf.mxu1  ;;  %v4783_v48 = vadd.f32 %v6356_v39, %v4313_v41  ;;  %v4741_v29 = vpop.f32.mrf.mxu0 }
 0x222   : > { %5895 = vst [vmem:[%s8988_s18 + $0x60] sm:$0xff] %v5867_v32   ;;  %v4314_v61 = vadd.f32 %v6323_v43, %v3588_v46  ;;  %v4970_v19 = vadd.f32 %v4969_v30, %v4779_v5  ;;  %v4781_v18 = vadd.f32 %v4738_v55, %v4311_v58 }
 0x223   : > { %v5038_v0 = vadd.f32 %v5037_v23, %v5007_v60  ;;  %v4271_v16 = vpop.f32.mrf.mxu1  ;;  %v5012_v62 = vmul.f32 %v4783_v48, %v4783_v48 }
 0x224   : > { %v4784_v31 = vadd.f32 %v6357_v12, %v4314_v61  ;;  %v4312_v20 = vadd.f32 %v4271_v16, %v3586_v45  ;;  %v4971_v63 = vadd.f32 %v4970_v19, %v4780_v8  ;;  %v5010_v44 = vmul.f32 %v4781_v18, %v4781_v18 }
 0x225   : > { %v5039_v50 = vadd.f32 %v5038_v0, %v5008_v54 }
 0x226   : > { %v5882_v38 = vpack.c.bf16 %v4784_v31, %v4783_v48  ;;  %v4782_v6 = vadd.f32 %v4741_v29, %v4312_v20  ;;  %v4972_v7 = vadd.f32 %v4971_v63, %v4781_v18  ;;  %v5013_v28 = vmul.f32 %v4784_v31, %v4784_v31 }
 0x227   : > { %v5040_v11 = vadd.f32 %v5039_v50, %v5009_v4 }
 0x228   : > { %5898 = vst [vmem:[%s8988_s18 + $0x78] sm:$0xff] %v5882_v38   ;;  %v5877_v40 = vpack.c.bf16 %v4782_v6, %v4781_v18  ;;  %v5011_v36 = vmul.f32 %v4782_v6, %v4782_v6  ;;  %v4973_v47 = vadd.f32 %v4972_v7, %v4782_v6 }
 0x229   : > { %v5041_v13 = vadd.f32 %v5040_v11, %v5010_v44 }
 0x22a   : > { %5897 = vst [vmem:[%s8988_s18 + $0x70] sm:$0xff] %v5877_v40   ;;  %v4974_v52 = vadd.f32 %v4973_v47, %v4783_v48 }
 0x22b   : > { %v5042_v26 = vadd.f32 %v5041_v13, %v5011_v36 }
 0x22c   : > { %v4975_v39 = vadd.f32 %v4974_v52, %v4784_v31 }
 0x22d   : > { %v5043_v1 = vadd.f32 %v5042_v26, %v5012_v62 }
 0x22e   : > { %v4976_v3 = vrot.slane %v4975_v39, 4 }
 0x22f   : > { %v5044_v51 = vadd.f32 %v5043_v1, %v5013_v28 }
 0x230   : > { %v4977_v2 = vadd.f32 %v4976_v3, %v4975_v39 }
 0x231   : > { %v5045_v17 = vrot.slane %v5044_v51, 4 }
 0x232   : > { %v4978_v5 = vrot.slane %v4977_v2, 2 }
 0x233   : > { %v5046_v8 = vadd.f32 %v5045_v17, %v5044_v51 }
 0x234   : > { %v4979_v49 = vadd.f32 %v4978_v5, %v4977_v2 }
 0x235   : > { %v5047_v9 = vrot.slane %v5046_v8, 2 }
 0x236   : > { %v4980_v53 = vrot.slane %v4979_v49, 1 }
 0x237   : > { %v5048_v34 = vadd.f32 %v5047_v9, %v5046_v8 }
 0x238   : > { %v4981_v55 = vadd.f32 %v4980_v53, %v4979_v49 }
 0x239   : > { %v5049_v14 = vrot.slane %v5048_v34, 1 }
 0x23b   : > { %v5050_v35 = vadd.f32 %v5049_v14, %v5048_v34 }
 0x23d   : > { %v5052_v15 = vsel %vm5051_vm8, %v4981_v55, %v5050_v35 }
 0x23e   : > { %5053 = vst [vmem:[%s214_s22] sm:$0x3] %v5052_v15 }
 0x23f PF: > { %s14_s14 = sadd.s32 1, %s6467_s14   ;;  %s9335_s12 = smov %s6463_s13 }
 0x240   : > { %p11_p5 = scmp.ge.s32.totalorder %s14_s14, 4   ;;  %s9336_s13 = smov %s9338_s15 }
 0x242   :  { %13 = sbr.rel (!%p11_p5) target bundleno = 2 (0x2), region = 81 }

</bundles_post_ra>
